<compile_context>
chip_gen: v6e
topology: v6e:2x2x1
jax: 0.10.0
libtpu: 0.0.40
codegen_flags: <defaults>
</compile_context>

<pallas_src>
import functools

import jax
import jax.numpy as jnp
from jax.experimental import pallas as pl
from jax.experimental.pallas import tpu as pltpu


def _se_kernel(x_ref, w1_ref, b1_ref, w2_ref, b2_ref, o_ref, *, hw, k):
    """Processes one (Bt, Ck, L) block = Bt images, k channels packed per row.

    x_ref : [Bt, Ck, L]   packed activations: original channel i*k + p lives in
                          row i, lane chunk p (contiguous host reshape, no copy)
    w1_ref: [C, Cr] f32   = W1.T, rows permuted to the packed channel order
    b1_ref: [1, Cr] f32
    w2_ref: [C, Cr] f32   = W2,   rows permuted to the packed channel order
    b2_ref: [C, 1]  f32   permuted
    o_ref : [Bt, Ck, L]
    """
    bt, ck, L = x_ref.shape
    inv_hw = 1.0 / float(hw)

    # --- squeeze: per-channel spatial mean (channels stay on sublanes) -------
    sums = []
    for p in range(k):
        xs = x_ref[:, :, p * hw:(p + 1) * hw].astype(jnp.float32)   # [Bt,Ck,hw]
        sums.append(jnp.sum(xs, axis=-1, keepdims=True))            # [Bt,Ck,1]
    s_col = sums[0] if k == 1 else jnp.concatenate(sums, axis=1)    # [Bt,C,1]
    s_col = s_col * inv_hw                                          # packed order

    # --- excitation: Linear -> ReLU -> Linear -> Sigmoid ---------------------
    # Batched over Bt; channels remain on sublanes so no relayouts are needed
    # on either side.  Tiny vs. the HBM-bound block DMA (see header note).
    w1 = w1_ref[...]                                                # [C, Cr]
    h = jnp.sum(s_col * w1, axis=1, keepdims=True) + b1_ref[...]    # [Bt,1,Cr]
    h = jnp.maximum(h, 0.0)
    w2 = w2_ref[...]                                                # [C, Cr]
    e_col = jax.nn.sigmoid(
        jnp.sum(w2 * h, axis=-1, keepdims=True) + b2_ref[...])      # [Bt,C,1]

    # --- scale: per-chunk broadcast multiply, full-vreg 128-lane stores -------
    if k == 1:
        o_ref[...] = (x_ref[...].astype(jnp.float32) * e_col).astype(o_ref.dtype)
    else:
        cpg = 128 // hw                       # chunks per 128-lane store group
        for base in range(0, k, cpg):
            parts = []
            for p in range(base, base + cpg):
                xs = x_ref[:, :, p * hw:(p + 1) * hw].astype(jnp.float32)
                parts.append(xs * e_col[:, p * ck:(p + 1) * ck, :])
            blk = parts[0] if cpg == 1 else jnp.concatenate(parts, axis=-1)
            o_ref[:, :, base * hw:base * hw + 128] = blk.astype(o_ref.dtype)


def se_block(x, w1, b1, w2, b2):
    """x: [B, C, H, W].  PyTorch nn.Linear layouts: w1 [Cr, C], b1 [Cr],
    w2 [C, Cr], b2 [C]."""
    B, C, H, W = x.shape
    Cr = w1.shape[0]
    HW = H * W
    itemsize = jnp.dtype(x.dtype).itemsize
    min_sub = {1: 32, 2: 16}.get(itemsize, 8)   # min sublane count per dtype

    # ---- channel packing: k channels per row, L = k*HW lanes (<= 512) -------
    k = 1
    if HW < 128 and 128 % HW == 0:
        base_k = 128 // HW
        for m in (8, 4, 2, 1):
            k_c = base_k * m
            if k_c * HW <= 512 and C % k_c == 0 and (C // k_c) >= min_sub:
                k = k_c
                break
    Ck = C // k
    L = k * HW

    x_p = x.reshape(B, Ck, L)   # contiguous: metadata-only reshape, no HBM copy

    # Packed channel order: packed index q = p*Ck + i holds original channel
    # i*k + p.  Permute weights once on the host; kernel never reorders lanes.
    q = jnp.arange(C)
    perm = (q % Ck) * k + (q // Ck)

    w1_k = w1.T[perm, :].astype(jnp.float32)             # [C, Cr]
    w2_k = w2[perm, :].astype(jnp.float32)               # [C, Cr]
    b1_2d = b1.reshape(1, Cr).astype(jnp.float32)        # [1, Cr]
    b2_k = b2[perm].reshape(C, 1).astype(jnp.float32)    # [C, 1]

    # ---- generation-aware block-batch (Bt) and VMEM sizing -------------------
    try:
        vmem_cap = int(getattr(pltpu.get_tpu_info(), "vmem_capacity_bytes",
                               64 << 20))
    except Exception:  # pragma: no cover - conservative fallback (v7x per-TC)
        vmem_cap = 64 << 20

    slab_bytes = C * HW * itemsize                       # one image
    param_bytes = 4 * (2 * C * Cr + Cr + C)
    budget = int(0.40 * vmem_cap)                        # ~25 MiB v7x, ~51 MiB v5e/v6e
    bt_vmem = max(1, (budget - 2 * param_bytes) // (4 * slab_bytes))
    bt_target = max(1, (2 << 20) // slab_bytes)          # ~2 MiB input block
    Bt = int(max(1, min(B, 16, bt_target, bt_vmem)))
    if B >= 2:
        Bt = min(Bt, (B + 1) // 2)   # >= 2 grid steps: keep both v7x TCs busy
    nsteps = (B + Bt - 1) // Bt

    blk_bytes = Bt * Ck * L * itemsize
    vmem_limit = int(2 * (4 * blk_bytes + 2 * param_bytes)) + (1 << 20)
    vmem_limit = max(1 << 20, min(vmem_limit, int(0.9 * vmem_cap)))

    kernel = functools.partial(_se_kernel, hw=HW, k=k)

    out_p = pl.pallas_call(
        kernel,
        out_shape=jax.ShapeDtypeStruct((B, Ck, L), x.dtype),
        grid=(nsteps,),
        in_specs=[
            pl.BlockSpec((Bt, Ck, L), lambda b: (b, 0, 0)),
            pl.BlockSpec((C, Cr), lambda b: (0, 0)),
            pl.BlockSpec((1, Cr), lambda b: (0, 0)),
            pl.BlockSpec((C, Cr), lambda b: (0, 0)),
            pl.BlockSpec((C, 1), lambda b: (0, 0)),
        ],
        out_specs=pl.BlockSpec((Bt, Ck, L), lambda b: (b, 0, 0)),
        compiler_params=pltpu.CompilerParams(
            dimension_semantics=("parallel",),
            vmem_limit_bytes=vmem_limit,
        ),
        cost_estimate=pl.CostEstimate(
            flops=int(B * (2 * C * HW + 4 * C * Cr)),
            transcendentals=int(B * C),
            bytes_accessed=int(2 * B * C * HW * itemsize + param_bytes),
        ),
    )(x_p, w1_k, b1_2d, w2_k, b2_k)

    return out_p.reshape(B, C, H, W)


def _reference(x, w1, b1, w2, b2):
    # Pure-JAX reference matching the PyTorch forward.
    s = jnp.mean(x, axis=(2, 3))                       # [B, C]
    h = jnp.maximum(s @ w1.T + b1, 0.0)                # [B, Cr]
    e = jax.nn.sigmoid(h @ w2.T + b2)                  # [B, C]
    return x * e[:, :, None, None]


if __name__ == "__main__":
    # Module defaults: input_channel=256, r=16 -> hidden = 16.
    # B=8 exercises the Bt>1 batched-block path with a 2-step parallel grid.
    B, C, H, W, r = 8, 256, 8, 8, 16
    Cr = C // r

    key = jax.random.PRNGKey(0)
    kx, k1, kb1, k2, kb2 = jax.random.split(key, 5)

    x = jax.random.normal(kx, (B, C, H, W), dtype=jnp.float32)
    # Deterministic synthetic parameters (PyTorch Linear layout: [out, in]).
    w1 = jax.random.normal(k1, (Cr, C), dtype=jnp.float32) * 0.05
    b1 = jax.random.normal(kb1, (Cr,), dtype=jnp.float32) * 0.05
    w2 = jax.random.normal(k2, (C, Cr), dtype=jnp.float32) * 0.05
    b2 = jax.random.normal(kb2, (C,), dtype=jnp.float32) * 0.05

    out = jax.block_until_ready(se_block(x, w1, b1, w2, b2))
    ref = _reference(x, w1, b1, w2, b2)

    assert out.shape == (B, C, H, W)
    assert jnp.allclose(out, ref, atol=1e-5, rtol=1e-5)

    print("KERNEL_OK")
</pallas_src>

<mosaic_0001>
module attributes {stable_mosaic.version = 11 : i64} {
  func.func @_se_kernel(%arg0: i32, %arg1: memref<4x32x512xf32, #tpu.memory_space<vmem>>, %arg2: memref<256x16xf32, #tpu.memory_space<vmem>>, %arg3: memref<1x16xf32, #tpu.memory_space<vmem>>, %arg4: memref<256x16xf32, #tpu.memory_space<vmem>>, %arg5: memref<256x1xf32, #tpu.memory_space<vmem>>, %arg6: memref<4x32x512xf32, #tpu.memory_space<vmem>>) attributes {dimension_semantics = [#tpu.dimension_semantics<parallel>], iteration_bounds = array<i64: 2>, scalar_prefetch = 0 : i64, scratch_operands = 0 : i64, tpu.core_type = #tpu.core_type<tc>, window_params = [{transform_indices = @transform_0, window_bounds = array<i64: 4, 32, 512>}, {pipeline_mode = #tpu.pipeline_mode<synchronous>, transform_indices = @transform_1, window_bounds = array<i64: 256, 16>}, {pipeline_mode = #tpu.pipeline_mode<synchronous>, transform_indices = @transform_2, window_bounds = array<i64: 1, 16>}, {pipeline_mode = #tpu.pipeline_mode<synchronous>, transform_indices = @transform_3, window_bounds = array<i64: 256, 16>}, {pipeline_mode = #tpu.pipeline_mode<synchronous>, transform_indices = @transform_4, window_bounds = array<i64: 256, 1>}, {transform_indices = @transform_5, window_bounds = array<i64: 4, 32, 512>}]} {
    %c0 = arith.constant 0 : index
    %c0_0 = arith.constant 0 : index
    %c0_1 = arith.constant 0 : index
    %0 = vector.load %arg1[%c0, %c0_0, %c0_1] : memref<4x32x512xf32, #tpu.memory_space<vmem>>, vector<4x32x64xf32>
    %cst = arith.constant dense<0.000000e+00> : vector<4x32xf32>
    %1 = vector.multi_reduction <add>, %0, %cst [2] : vector<4x32x64xf32> to vector<4x32xf32>
    %2 = vector.shape_cast %1 : vector<4x32xf32> to vector<4x32x1xf32>
    %c0_2 = arith.constant 0 : index
    %c0_3 = arith.constant 0 : index
    %c64 = arith.constant 64 : index
    %3 = vector.load %arg1[%c0_2, %c0_3, %c64] : memref<4x32x512xf32, #tpu.memory_space<vmem>>, vector<4x32x64xf32>
    %cst_4 = arith.constant dense<0.000000e+00> : vector<4x32xf32>
    %4 = vector.multi_reduction <add>, %3, %cst_4 [2] : vector<4x32x64xf32> to vector<4x32xf32>
    %5 = vector.shape_cast %4 : vector<4x32xf32> to vector<4x32x1xf32>
    %c0_5 = arith.constant 0 : index
    %c0_6 = arith.constant 0 : index
    %c128 = arith.constant 128 : index
    %6 = vector.load %arg1[%c0_5, %c0_6, %c128] : memref<4x32x512xf32, #tpu.memory_space<vmem>>, vector<4x32x64xf32>
    %cst_7 = arith.constant dense<0.000000e+00> : vector<4x32xf32>
    %7 = vector.multi_reduction <add>, %6, %cst_7 [2] : vector<4x32x64xf32> to vector<4x32xf32>
    %8 = vector.shape_cast %7 : vector<4x32xf32> to vector<4x32x1xf32>
    %c0_8 = arith.constant 0 : index
    %c0_9 = arith.constant 0 : index
    %c192 = arith.constant 192 : index
    %9 = vector.load %arg1[%c0_8, %c0_9, %c192] : memref<4x32x512xf32, #tpu.memory_space<vmem>>, vector<4x32x64xf32>
    %cst_10 = arith.constant dense<0.000000e+00> : vector<4x32xf32>
    %10 = vector.multi_reduction <add>, %9, %cst_10 [2] : vector<4x32x64xf32> to vector<4x32xf32>
    %11 = vector.shape_cast %10 : vector<4x32xf32> to vector<4x32x1xf32>
    %c0_11 = arith.constant 0 : index
    %c0_12 = arith.constant 0 : index
    %c256 = arith.constant 256 : index
    %12 = vector.load %arg1[%c0_11, %c0_12, %c256] : memref<4x32x512xf32, #tpu.memory_space<vmem>>, vector<4x32x64xf32>
    %cst_13 = arith.constant dense<0.000000e+00> : vector<4x32xf32>
    %13 = vector.multi_reduction <add>, %12, %cst_13 [2] : vector<4x32x64xf32> to vector<4x32xf32>
    %14 = vector.shape_cast %13 : vector<4x32xf32> to vector<4x32x1xf32>
    %c0_14 = arith.constant 0 : index
    %c0_15 = arith.constant 0 : index
    %c320 = arith.constant 320 : index
    %15 = vector.load %arg1[%c0_14, %c0_15, %c320] : memref<4x32x512xf32, #tpu.memory_space<vmem>>, vector<4x32x64xf32>
    %cst_16 = arith.constant dense<0.000000e+00> : vector<4x32xf32>
    %16 = vector.multi_reduction <add>, %15, %cst_16 [2] : vector<4x32x64xf32> to vector<4x32xf32>
    %17 = vector.shape_cast %16 : vector<4x32xf32> to vector<4x32x1xf32>
    %c0_17 = arith.constant 0 : index
    %c0_18 = arith.constant 0 : index
    %c384 = arith.constant 384 : index
    %18 = vector.load %arg1[%c0_17, %c0_18, %c384] : memref<4x32x512xf32, #tpu.memory_space<vmem>>, vector<4x32x64xf32>
    %cst_19 = arith.constant dense<0.000000e+00> : vector<4x32xf32>
    %19 = vector.multi_reduction <add>, %18, %cst_19 [2] : vector<4x32x64xf32> to vector<4x32xf32>
    %20 = vector.shape_cast %19 : vector<4x32xf32> to vector<4x32x1xf32>
    %c0_20 = arith.constant 0 : index
    %c0_21 = arith.constant 0 : index
    %c448 = arith.constant 448 : index
    %21 = vector.load %arg1[%c0_20, %c0_21, %c448] : memref<4x32x512xf32, #tpu.memory_space<vmem>>, vector<4x32x64xf32>
    %cst_22 = arith.constant dense<0.000000e+00> : vector<4x32xf32>
    %22 = vector.multi_reduction <add>, %21, %cst_22 [2] : vector<4x32x64xf32> to vector<4x32xf32>
    %23 = vector.shape_cast %22 : vector<4x32xf32> to vector<4x32x1xf32>
    %24 = tpu.concatenate %2, %5, %8, %11, %14, %17, %20, %23 in 1 : vector<4x32x1xf32>, vector<4x32x1xf32>, vector<4x32x1xf32>, vector<4x32x1xf32>, vector<4x32x1xf32>, vector<4x32x1xf32>, vector<4x32x1xf32>, vector<4x32x1xf32> -> vector<4x256x1xf32>
    %cst_23 = arith.constant 1.562500e-02 : f32
    %25 = vector.broadcast %cst_23 : f32 to vector<4x256x1xf32>
    %26 = arith.mulf %24, %25 : vector<4x256x1xf32>
    %c0_24 = arith.constant 0 : index
    %c0_25 = arith.constant 0 : index
    %27 = vector.load %arg2[%c0_24, %c0_25] : memref<256x16xf32, #tpu.memory_space<vmem>>, vector<256x16xf32>
    %28 = vector.shape_cast %27 : vector<256x16xf32> to vector<1x256x16xf32>
    %29 = vector.broadcast %26 : vector<4x256x1xf32> to vector<4x256x16xf32>
    %30 = vector.broadcast %28 : vector<1x256x16xf32> to vector<4x256x16xf32>
    %31 = arith.mulf %29, %30 : vector<4x256x16xf32>
    %cst_26 = arith.constant dense<0.000000e+00> : vector<4x16xf32>
    %32 = vector.multi_reduction <add>, %31, %cst_26 [1] : vector<4x256x16xf32> to vector<4x16xf32>
    %33 = vector.shape_cast %32 : vector<4x16xf32> to vector<4x1x16xf32>
    %c0_27 = arith.constant 0 : index
    %c0_28 = arith.constant 0 : index
    %34 = vector.load %arg3[%c0_27, %c0_28] : memref<1x16xf32, #tpu.memory_space<vmem>>, vector<1x16xf32>
    %35 = vector.shape_cast %34 : vector<1x16xf32> to vector<1x1x16xf32>
    %36 = vector.broadcast %35 : vector<1x1x16xf32> to vector<4x1x16xf32>
    %37 = arith.addf %33, %36 : vector<4x1x16xf32>
    %cst_29 = arith.constant 0.000000e+00 : f32
    %38 = vector.broadcast %cst_29 : f32 to vector<4x1x16xf32>
    %39 = arith.maximumf %37, %38 : vector<4x1x16xf32>
    %c0_30 = arith.constant 0 : index
    %c0_31 = arith.constant 0 : index
    %40 = vector.load %arg4[%c0_30, %c0_31] : memref<256x16xf32, #tpu.memory_space<vmem>>, vector<256x16xf32>
    %41 = vector.shape_cast %40 : vector<256x16xf32> to vector<1x256x16xf32>
    %42 = vector.broadcast %41 : vector<1x256x16xf32> to vector<4x256x16xf32>
    %43 = vector.broadcast %39 : vector<4x1x16xf32> to vector<4x256x16xf32>
    %44 = arith.mulf %42, %43 : vector<4x256x16xf32>
    %cst_32 = arith.constant dense<0.000000e+00> : vector<4x256xf32>
    %45 = vector.multi_reduction <add>, %44, %cst_32 [2] : vector<4x256x16xf32> to vector<4x256xf32>
    %46 = vector.shape_cast %45 : vector<4x256xf32> to vector<4x256x1xf32>
    %c0_33 = arith.constant 0 : index
    %c0_34 = arith.constant 0 : index
    %47 = vector.load %arg5[%c0_33, %c0_34] : memref<256x1xf32, #tpu.memory_space<vmem>>, vector<256x1xf32>
    %48 = vector.shape_cast %47 : vector<256x1xf32> to vector<1x256x1xf32>
    %49 = vector.broadcast %48 : vector<1x256x1xf32> to vector<4x256x1xf32>
    %50 = arith.addf %46, %49 : vector<4x256x1xf32>
    %51 = arith.negf %50 : vector<4x256x1xf32>
    %52 = math.exp %51 : vector<4x256x1xf32>
    %cst_35 = arith.constant 1.000000e+00 : f32
    %53 = vector.broadcast %cst_35 : f32 to vector<4x256x1xf32>
    %54 = arith.addf %53, %52 : vector<4x256x1xf32>
    %55 = arith.divf %53, %54 : vector<4x256x1xf32>
    %c0_36 = arith.constant 0 : index
    %c0_37 = arith.constant 0 : index
    %c0_38 = arith.constant 0 : index
    %56 = vector.load %arg1[%c0_36, %c0_37, %c0_38] : memref<4x32x512xf32, #tpu.memory_space<vmem>>, vector<4x32x64xf32>
    %57 = vector.extract_strided_slice %55 {offsets = [0, 0, 0], sizes = [4, 32, 1], strides = [1, 1, 1]} : vector<4x256x1xf32> to vector<4x32x1xf32>
    %58 = vector.broadcast %57 : vector<4x32x1xf32> to vector<4x32x64xf32>
    %59 = arith.mulf %56, %58 : vector<4x32x64xf32>
    %c0_39 = arith.constant 0 : index
    %c0_40 = arith.constant 0 : index
    %c64_41 = arith.constant 64 : index
    %60 = vector.load %arg1[%c0_39, %c0_40, %c64_41] : memref<4x32x512xf32, #tpu.memory_space<vmem>>, vector<4x32x64xf32>
    %61 = vector.extract_strided_slice %55 {offsets = [0, 32, 0], sizes = [4, 32, 1], strides = [1, 1, 1]} : vector<4x256x1xf32> to vector<4x32x1xf32>
    %62 = vector.broadcast %61 : vector<4x32x1xf32> to vector<4x32x64xf32>
    %63 = arith.mulf %60, %62 : vector<4x32x64xf32>
    %64 = tpu.concatenate %59, %63 in 2 : vector<4x32x64xf32>, vector<4x32x64xf32> -> vector<4x32x128xf32>
    %c0_42 = arith.constant 0 : index
    %c0_43 = arith.constant 0 : index
    %c0_44 = arith.constant 0 : index
    %65 = vector.load %arg6[%c0_42, %c0_43, %c0_44] : memref<4x32x512xf32, #tpu.memory_space<vmem>>, vector<4x32x128xf32>
    tpu.vector_store %arg6[%c0_42, %c0_43, %c0_44], %64 {strides = array<i32>} : memref<4x32x512xf32, #tpu.memory_space<vmem>>, vector<4x32x128xf32>,
    %c0_45 = arith.constant 0 : index
    %c0_46 = arith.constant 0 : index
    %c128_47 = arith.constant 128 : index
    %66 = vector.load %arg1[%c0_45, %c0_46, %c128_47] : memref<4x32x512xf32, #tpu.memory_space<vmem>>, vector<4x32x64xf32>
    %67 = vector.extract_strided_slice %55 {offsets = [0, 64, 0], sizes = [4, 32, 1], strides = [1, 1, 1]} : vector<4x256x1xf32> to vector<4x32x1xf32>
    %68 = vector.broadcast %67 : vector<4x32x1xf32> to vector<4x32x64xf32>
    %69 = arith.mulf %66, %68 : vector<4x32x64xf32>
    %c0_48 = arith.constant 0 : index
    %c0_49 = arith.constant 0 : index
    %c192_50 = arith.constant 192 : index
    %70 = vector.load %arg1[%c0_48, %c0_49, %c192_50] : memref<4x32x512xf32, #tpu.memory_space<vmem>>, vector<4x32x64xf32>
    %71 = vector.extract_strided_slice %55 {offsets = [0, 96, 0], sizes = [4, 32, 1], strides = [1, 1, 1]} : vector<4x256x1xf32> to vector<4x32x1xf32>
    %72 = vector.broadcast %71 : vector<4x32x1xf32> to vector<4x32x64xf32>
    %73 = arith.mulf %70, %72 : vector<4x32x64xf32>
    %74 = tpu.concatenate %69, %73 in 2 : vector<4x32x64xf32>, vector<4x32x64xf32> -> vector<4x32x128xf32>
    %c0_51 = arith.constant 0 : index
    %c0_52 = arith.constant 0 : index
    %c128_53 = arith.constant 128 : index
    %75 = vector.load %arg6[%c0_51, %c0_52, %c128_53] : memref<4x32x512xf32, #tpu.memory_space<vmem>>, vector<4x32x128xf32>
    tpu.vector_store %arg6[%c0_51, %c0_52, %c128_53], %74 {strides = array<i32>} : memref<4x32x512xf32, #tpu.memory_space<vmem>>, vector<4x32x128xf32>,
    %c0_54 = arith.constant 0 : index
    %c0_55 = arith.constant 0 : index
    %c256_56 = arith.constant 256 : index
    %76 = vector.load %arg1[%c0_54, %c0_55, %c256_56] : memref<4x32x512xf32, #tpu.memory_space<vmem>>, vector<4x32x64xf32>
    %77 = vector.extract_strided_slice %55 {offsets = [0, 128, 0], sizes = [4, 32, 1], strides = [1, 1, 1]} : vector<4x256x1xf32> to vector<4x32x1xf32>
    %78 = vector.broadcast %77 : vector<4x32x1xf32> to vector<4x32x64xf32>
    %79 = arith.mulf %76, %78 : vector<4x32x64xf32>
    %c0_57 = arith.constant 0 : index
    %c0_58 = arith.constant 0 : index
    %c320_59 = arith.constant 320 : index
    %80 = vector.load %arg1[%c0_57, %c0_58, %c320_59] : memref<4x32x512xf32, #tpu.memory_space<vmem>>, vector<4x32x64xf32>
    %81 = vector.extract_strided_slice %55 {offsets = [0, 160, 0], sizes = [4, 32, 1], strides = [1, 1, 1]} : vector<4x256x1xf32> to vector<4x32x1xf32>
    %82 = vector.broadcast %81 : vector<4x32x1xf32> to vector<4x32x64xf32>
    %83 = arith.mulf %80, %82 : vector<4x32x64xf32>
    %84 = tpu.concatenate %79, %83 in 2 : vector<4x32x64xf32>, vector<4x32x64xf32> -> vector<4x32x128xf32>
    %c0_60 = arith.constant 0 : index
    %c0_61 = arith.constant 0 : index
    %c256_62 = arith.constant 256 : index
    %85 = vector.load %arg6[%c0_60, %c0_61, %c256_62] : memref<4x32x512xf32, #tpu.memory_space<vmem>>, vector<4x32x128xf32>
    tpu.vector_store %arg6[%c0_60, %c0_61, %c256_62], %84 {strides = array<i32>} : memref<4x32x512xf32, #tpu.memory_space<vmem>>, vector<4x32x128xf32>,
    %c0_63 = arith.constant 0 : index
    %c0_64 = arith.constant 0 : index
    %c384_65 = arith.constant 384 : index
    %86 = vector.load %arg1[%c0_63, %c0_64, %c384_65] : memref<4x32x512xf32, #tpu.memory_space<vmem>>, vector<4x32x64xf32>
    %87 = vector.extract_strided_slice %55 {offsets = [0, 192, 0], sizes = [4, 32, 1], strides = [1, 1, 1]} : vector<4x256x1xf32> to vector<4x32x1xf32>
    %88 = vector.broadcast %87 : vector<4x32x1xf32> to vector<4x32x64xf32>
    %89 = arith.mulf %86, %88 : vector<4x32x64xf32>
    %c0_66 = arith.constant 0 : index
    %c0_67 = arith.constant 0 : index
    %c448_68 = arith.constant 448 : index
    %90 = vector.load %arg1[%c0_66, %c0_67, %c448_68] : memref<4x32x512xf32, #tpu.memory_space<vmem>>, vector<4x32x64xf32>
    %91 = vector.extract_strided_slice %55 {offsets = [0, 224, 0], sizes = [4, 32, 1], strides = [1, 1, 1]} : vector<4x256x1xf32> to vector<4x32x1xf32>
    %92 = vector.broadcast %91 : vector<4x32x1xf32> to vector<4x32x64xf32>
    %93 = arith.mulf %90, %92 : vector<4x32x64xf32>
    %94 = tpu.concatenate %89, %93 in 2 : vector<4x32x64xf32>, vector<4x32x64xf32> -> vector<4x32x128xf32>
    %c0_69 = arith.constant 0 : index
    %c0_70 = arith.constant 0 : index
    %c384_71 = arith.constant 384 : index
    %95 = vector.load %arg6[%c0_69, %c0_70, %c384_71] : memref<4x32x512xf32, #tpu.memory_space<vmem>>, vector<4x32x128xf32>
    tpu.vector_store %arg6[%c0_69, %c0_70, %c384_71], %94 {strides = array<i32>} : memref<4x32x512xf32, #tpu.memory_space<vmem>>, vector<4x32x128xf32>,
    return
  }
  func.func @transform_0(%arg0: i32) -> (i32, i32, i32) {
    %c0_i32 = arith.constant 0 : i32
    %c0_i32_0 = arith.constant 0 : i32
    %c0_i32_1 = arith.constant 0 : i32
    return %arg0, %c0_i32, %c0_i32_0 : i32, i32, i32
  }
  func.func @transform_1(%arg0: i32) -> (i32, i32) {
    %c0_i32 = arith.constant 0 : i32
    %c0_i32_0 = arith.constant 0 : i32
    %c0_i32_1 = arith.constant 0 : i32
    return %c0_i32, %c0_i32_0 : i32, i32
  }
  func.func @transform_2(%arg0: i32) -> (i32, i32) {
    %c0_i32 = arith.constant 0 : i32
    %c0_i32_0 = arith.constant 0 : i32
    %c0_i32_1 = arith.constant 0 : i32
    return %c0_i32, %c0_i32_0 : i32, i32
  }
  func.func @transform_3(%arg0: i32) -> (i32, i32) {
    %c0_i32 = arith.constant 0 : i32
    %c0_i32_0 = arith.constant 0 : i32
    %c0_i32_1 = arith.constant 0 : i32
    return %c0_i32, %c0_i32_0 : i32, i32
  }
  func.func @transform_4(%arg0: i32) -> (i32, i32) {
    %c0_i32 = arith.constant 0 : i32
    %c0_i32_0 = arith.constant 0 : i32
    %c0_i32_1 = arith.constant 0 : i32
    return %c0_i32, %c0_i32_0 : i32, i32
  }
  func.func @transform_5(%arg0: i32) -> (i32, i32, i32) {
    %c0_i32 = arith.constant 0 : i32
    %c0_i32_0 = arith.constant 0 : i32
    %c0_i32_1 = arith.constant 0 : i32
    return %arg0, %c0_i32, %c0_i32_0 : i32, i32, i32
  }
}

</mosaic_0001>

<bundles_post_ra>
// kernel: tpu_custom_call.1
= control target key start
LH: loop header
LB: loop body
LE: loop exit
PB: predicated region body
PF: predicated region fallthrough
CT: control target
= control target key end

     0   :  { %10 = vsyncpa [#allocation3], 0  ;;  %s8668_s0 = inlined_call_operand.hbm [shape: f32[8,32,512], index: 0, kind: input, shape index: {}]   ;;  %s8669_s1 = inlined_call_operand.vmem [shape: f32[256,16], index: 1, kind: input, shape index: {}]   ;;  %s8670_s2 = inlined_call_operand.vmem [shape: f32[1,16], index: 2, kind: input, shape index: {}]   ;;  %s8671_s3 = inlined_call_operand.vmem [shape: f32[256,16], index: 3, kind: input, shape index: {}]   ;;  %s8672_s4 = inlined_call_operand.vmem [shape: f32[256,1], index: 4, kind: input, shape index: {}]   ;;  %s8673_s5 = inlined_call_operand.hbm [shape: f32[8,32,512], index: 5, kind: output, shape index: {}]  }
   0x1   :  { %12 = vsyncpa [#allocation3 + $0x1], 0 }
   0x2   :  { %13 = vsyncpa [#allocation4], 0 }
   0x3   :  { %15 = vsyncpa [#allocation4 + $0x1], 0  ;;  %s5608_s18 = smov 0   ;;  %s5610_s19 = smov 0  }
   0x4   :  { %s5612_s20 = smov 0   ;;  %s5614_s21 = smov 0  }
   0x5 LB: > { %s5629_s22 = sadd.s32 4294967295, %s5568_s21   ;;  %s4685_s23 = sadd.s32 4294967294, %s5568_s21   ;;  %s5568_s21 = sphi %s5614_s21, %s8919_s21   ;;  %s5564_s20 = sphi %s5612_s20, %s8918_s20   ;;  %s5560_s19 = sphi %s5610_s19, %s8917_s19   ;;  %s5556_s18 = sphi %s5608_s18, %s8916_s18  }
   0x6   : > { %s5633_s24 = sadd.s32 1, %s5568_s21   ;;  %s28_s25 = sadd.s32 1, %s5564_s20 }
   0x7   : > { %s25_s26 = ssub.s32 %s5568_s21, %s5633_s24  ;;  %p35_p0 = scmp.ne.s32.totalorder %s5564_s20, %s5560_s19 }
   0x8   : > { %p26_p1 = scmp.eq.s32.totalorder %s25_s26, 0  ;;  %p36_p2 = scmp.eq.s32.totalorder %s5568_s21, 0 }
   0x9   : > { %p41_p3 = scmp.ne.s32.totalorder %s5560_s19, %s5556_s18  ;;  %p42_p4 = scmp.eq.s32.totalorder %s5629_s22, 0 }
   0xa   : > { %s5645_s27 = scalar_select %p26_p1, %s5564_s20, %s28_s25  }
   0xb   : > { %p5647_p5 = por %p36_p2, %p35_p0  ;;  %p5651_p6 = por %p42_p4, %p41_p3 }
   0xc   : > { %p149_p7 = scmp.eq.s32.totalorder %s5629_s22, 1  ;;  %p155_p8 = scmp.eq.s32.totalorder %s4685_s23, 1 }
   0xd   : > { %s8690_s29 = scalar_select %p5651_p6, 1, 0 }
   0xe   : > { %p4845_p10 = scmp.lt.s32.totalorder %s5568_s21, 2  ;;  %p5658_p11 = por %p149_p7, %p35_p0 }
   0xf   : > { %p5662_p12 = por %p155_p8, %p41_p3  ;;  %s187_s7 = sand.u32 1, %s5564_s20  }
  0x10   : > { %s8691_s30 = scalar_select %p5658_p11, 1, 0 }
  0x11   : > { %s8692_s6 = scalar_select %p5662_p12, 1, 0 }
  0x12   : > { %s4830_s8 = sshll.u32 %s5568_s21, 13  ;;  %s4688_s9 = sshll.u32 %s187_s7, 9 }
  0x13   : > { %s5671_s12 = scalar_lea.hbm %s8668_s0, %s4830_s8  ;;  %s191_s13 = scalar_lea.vmem [#allocation2], %s4688_s9 }
  0x14   : > { %s199_s14 = sshll.u32 %s191_s13, 4  ;;  %p5675_p13 = pnand %p4845_p10, %p5647_p5  ;;  %s5679_s14 = int_to_ptr.vmem [resolvable:$true] %s199_s14 }
  0x15   : > { %s5681_s16 = scalar_lea.sflag [#allocation3], %s187_s7  ;;  %s5476_s17 = scalar_lea.hbm %s5671_s12, 8192 }
  0x16   : > { %p5477_p0 = scmp.ne.s32.totalorder %s5671_s12, %s5476_s17  ;;  %p5478_p1 = pneg %p5675_p13 }
  0x17   : > { %s5481_s26 = scalar_lea.hbm %s8668_s0, 16384  ;;  %p5482_p4 = scmp.lt.s32.totalorder %s5671_s12, %s8668_s0 }
  0x18   : > { %p5479_p2 = pnand %p5478_p1, %p5477_p0  ;;  %p5483_p5 = scmp.lt.s32.totalorder %s5481_s26, %s5476_s17 }
  0x1a   : > { %p5480_p3 = pneg %p5479_p2  ;;  %p5484_p7 = por %p5483_p5, %p5482_p4 }
  0x1c   : > { %p5485_p8 = pnand %p5484_p7, %p5480_p3 }
  0x1e   : > { %5488 = shalt.err (!%p5485_p8)
}
  0x1f   : > { %s5489_s7 = scalar_lea.vmem %s5679_s14, 8192  ;;  %s5570_s9 = smov [#allocation2]  }
  0x20   : > { %p5490_p10 = scmp.ne.s32.totalorder %s5679_s14, %s5489_s7  ;;  %s5494_s10 = sshll.u32 %s5570_s9, 4  ;;  %s5495_s10 = int_to_ptr.vmem [resolvable:$false] %s5494_s10 }
  0x21   : > { %s5496_s11 = scalar_lea.vmem %s5495_s10, 16384  ;;  %p5497_p2 = scmp.lt.s32.totalorder %s5679_s14, %s5495_s10 }
  0x22   : > { %p5492_p9 = pnand %p5490_p10, %p5478_p1  ;;  %p5498_p12 = scmp.lt.s32.totalorder %s5496_s11, %s5489_s7 }
  0x24   : > { %p5493_p0 = pneg %p5492_p9  ;;  %p5499_p11 = por %p5498_p12, %p5497_p2 }
  0x26   : > { %p5500_p6 = pnand %p5499_p11, %p5493_p0 }
  0x28   : > { %5503 = shalt.err (!%p5500_p6)
}
  0x29   : > { %s5571_s13 = smov 512   ;;  %s5572_s17 = smov 32  }
  0x2a   : > { %4840 = dma.hbm_to_vmem [thread:$0]  (!%p5675_p13), %s5671_s12, 8192, %s5679_s14, %s5681_s16, %s5571_s13, %s5571_s13, %s5572_s17  }
  0x2b   : > { %p4692_p9 = scmp.ge.s32.totalorder %s5568_s21, 1  ;;  %p207_p1 = scmp.lt.s32.totalorder %s5568_s21, 3 }
  0x2d   : > { %p208_p3 = pnand %p4692_p9, %p207_p1 }
  0x2f   : > { %211 = sbr.rel (%p208_p3) target bundleno = 1956 (0x7a4), region = 40 }
  0x34   : > { %s5705_s23 = sand.u32 1, %s5560_s19   ;;  %p8694_p6 = scmp.ne.s32.totalorder %s8690_s29, 0 }
  0x35   : > { %s4693_s25 = sshll.u32 %s5705_s23, 9  ;;  %s214_s26 = scalar_lea.sflag [#allocation3], %s5705_s23 }
  0x36   : > { %s5711_s28 = scalar_lea.vmem [#allocation2], %s4693_s25 }
  0x37   : > { %5547 = dma.done.wait (%p8694_p6), %s214_s26, 8192  }
  0x38   : > { %5549 = vsyncadd (%p8694_p6), %s214_s26, 4294959104  ;;  %vm262_vm0 = vcmask 523264   ;;  %v248_v0 = vld [vmem:[%s5711_s28 + $0x40] sm:$0xff]  ;;  %s5573_s29 = smov 64   ;;  %vm1879_vm1 = vcmask 130048   ;;  %s8251_s13 = scalar_lea.vmem [#allocation5], %s4693_s25 }
  0x39   : > { %v246_v1 = vld [vmem:[%s5711_s28] sm:$0xff]  ;;  %v269_v3 = vsel %vm262_vm0, %v248_v0, 0.0  ;;  %s4832_s8 = sshll.u32 %s5629_s22, 13  ;;  %s4612_s7 = sshll.u32 %s8251_s13, 4  ;;  %s8621_s7 = int_to_ptr.vmem [resolvable:$true] %s4612_s7 }
  0x3a   : > { %v249_v2 = vld [vmem:[%s5711_s28 + $0x60] sm:$0xff]  ;;  %v263_v4 = vsel %vm262_vm0, %v246_v1, 0.0  ;;  %270 = vadd.xlane.f32.xlu1 %v269_v3  ;;  %s8619_s22 = scalar_lea.hbm %s8673_s5, %s4832_s8  ;;  %s4598_s10 = scalar_lea.sflag [#allocation4], %s5705_s23 }
  0x3b   : > { %v247_v5 = vld [vmem:[%s5711_s28 + $0x20] sm:$0xff]  ;;  %264 = vadd.xlane.f32.xlu0 %v263_v4  ;;  %v272_v6 = vsel %vm262_vm0, %v249_v2, 0.0  ;;  %s5504_s11 = scalar_lea.vmem %s8621_s7, 8192  ;;  %p8913_p12 = scmp.ne.s32.totalorder %s8691_s30, 0 }
  0x3c   : > { %v266_v7 = vsel %vm262_vm0, %v247_v5, 0.0  ;;  %v251_v8 = vld [vmem:[%s5711_s28 + $0xa0] sm:$0xff]  ;;  %p5505_p11 = scmp.ne.s32.totalorder %s8621_s7, %s5504_s11  ;;  %s5575_s25 = smov [#allocation5]  }
  0x3d   : > { %v250_v9 = vld [vmem:[%s5711_s28 + $0x80] sm:$0xff]  ;;  %v278_v10 = vsel %vm262_vm0, %v251_v8, 0.0  ;;  %s5508_s17 = sshll.u32 %s5575_s25, 4  ;;  %s5509_s17 = int_to_ptr.vmem [resolvable:$false] %s5508_s17 }
  0x3e   : > { %273 = vadd.xlane.f32.xlu1 %v272_v6  ;;  %v275_v11 = vsel %vm262_vm0, %v250_v9, 0.0  ;;  %v253_v12 = vld [vmem:[%s5711_s28 + $0xe0] sm:$0xff]  ;;  %p5506_p13 = pnand %p5505_p11, %p8913_p12  ;;  %s5510_s26 = scalar_lea.vmem %s5509_s17, 16384 }
  0x3f   : > { %267 = vadd.xlane.f32.xlu0 %v266_v7  ;;  %v252_v13 = vld [vmem:[%s5711_s28 + $0xc0] sm:$0xff]  ;;  %v284_v14 = vsel %vm262_vm0, %v253_v12, 0.0  ;;  %p5511_p5 = scmp.lt.s32.totalorder %s8621_s7, %s5509_s17  ;;  %p5512_p7 = scmp.lt.s32.totalorder %s5510_s26, %s5504_s11 }
  0x40   : > { %v281_v15 = vsel %vm262_vm0, %v252_v13, 0.0  ;;  %v255_v16 = vld [vmem:[%s5711_s28 + $0x120] sm:$0xff]  ;;  %p5507_p4 = pneg %p5506_p13 }
  0x41   : > { %v254_v17 = vld [vmem:[%s5711_s28 + $0x100] sm:$0xff]  ;;  %v290_v18 = vsel %vm262_vm0, %v255_v16, 0.0  ;;  %p5513_p8 = por %p5512_p7, %p5511_p5 }
  0x42   : > { %279 = vadd.xlane.f32.xlu1 %v278_v10  ;;  %v287_v19 = vsel %vm262_vm0, %v254_v17, 0.0  ;;  %v257_v20 = vld [vmem:[%s5711_s28 + $0x160] sm:$0xff] }
  0x43   : > { %276 = vadd.xlane.f32.xlu0 %v275_v11  ;;  %v256_v21 = vld [vmem:[%s5711_s28 + $0x140] sm:$0xff]  ;;  %v296_v22 = vsel %vm262_vm0, %v257_v20, 0.0  ;;  %p5514_p10 = pnand %p5513_p8, %p5507_p4 }
  0x44   : > { %v293_v23 = vsel %vm262_vm0, %v256_v21, 0.0  ;;  %v259_v24 = vld [vmem:[%s5711_s28 + $0x1a0] sm:$0xff] }
  0x45   : > { %v258_v25 = vld [vmem:[%s5711_s28 + $0x180] sm:$0xff]  ;;  %v302_v26 = vsel %vm262_vm0, %v259_v24, 0.0 }
  0x46   : > { %285 = vadd.xlane.f32.xlu1 %v284_v14  ;;  %v299_v27 = vsel %vm262_vm0, %v258_v25, 0.0  ;;  %v261_v28 = vld [vmem:[%s5711_s28 + $0x1e0] sm:$0xff] }
  0x47   : > { %282 = vadd.xlane.f32.xlu0 %v281_v15  ;;  %v260_v29 = vld [vmem:[%s5711_s28 + $0x1c0] sm:$0xff]  ;;  %v308_v30 = vsel %vm262_vm0, %v261_v28, 0.0  ;;  %v424_v15 = vld [vmem:[%s5711_s28 + $0x28] sm:$0xff] }
  0x48   : > { %v305_v31 = vsel %vm262_vm0, %v260_v29, 0.0 }
  0x4a   : > { %291 = vadd.xlane.f32.xlu1 %v290_v18  ;;  %v442_v18 = vsel %vm262_vm0, %v424_v15, 0.0 }
  0x4b   : > { %288 = vadd.xlane.f32.xlu0 %v287_v19 }
  0x4e   : > { %297 = vadd.xlane.f32.xlu1 %v296_v22 }
  0x4f   : > { %294 = vadd.xlane.f32.xlu0 %v293_v23 }
  0x52   : > { %303 = vadd.xlane.f32.xlu1 %v302_v26 }
  0x53   : > { %300 = vadd.xlane.f32.xlu0 %v299_v27 }
  0x56   : > { %309 = vadd.xlane.f32.xlu1 %v308_v30 }
  0x57   : > { %306 = vadd.xlane.f32.xlu0 %v305_v31 }
  0x67   : > { %329 = vrot.lane.b32.xlu1 %v247_v5, %s5573_s29 }
  0x6b   : > { %331 = vrot.lane.b32.xlu1 %v248_v0, %s5573_s29 }
  0x6d   : > { %327 = vrot.lane.b32.xlu0 %v246_v1, %s5573_s29 }
  0x6f   : > { %333 = vrot.lane.b32.xlu1 %v249_v2, %s5573_s29 }
  0x71   : > { %335 = vrot.lane.b32.xlu0 %v250_v9, %s5573_s29 }
  0x73   : > { %337 = vrot.lane.b32.xlu1 %v251_v8, %s5573_s29 }
  0x75   : > { %339 = vrot.lane.b32.xlu0 %v252_v13, %s5573_s29 }
  0x77   : > { %341 = vrot.lane.b32.xlu1 %v253_v12, %s5573_s29 }
  0x79   : > { %343 = vrot.lane.b32.xlu0 %v254_v17, %s5573_s29 }
  0x7b   : > { %345 = vrot.lane.b32.xlu1 %v255_v16, %s5573_s29  ;;  %v423_v16 = vld [vmem:[%s5711_s28 + $0x8] sm:$0xff] }
  0x7c   : > { %v439_v19 = vsel %vm262_vm0, %v423_v16, 0.0 }
  0x7d   : > { %347 = vrot.lane.b32.xlu0 %v256_v21, %s5573_s29  ;;  %v425_v21 = vld [vmem:[%s5711_s28 + $0x48] sm:$0xff] }
  0x7e   : > { %v445_v23 = vsel %vm262_vm0, %v425_v21, 0.0 }
  0x7f   : > { %349 = vrot.lane.b32.xlu1 %v257_v20, %s5573_s29  ;;  %v426_v20 = vld [vmem:[%s5711_s28 + $0x68] sm:$0xff] }
  0x80   : > { %v448_v22 = vsel %vm262_vm0, %v426_v20, 0.0 }
  0x81   : > { %351 = vrot.lane.b32.xlu0 %v258_v25, %s5573_s29  ;;  %v427_v25 = vld [vmem:[%s5711_s28 + $0x88] sm:$0xff] }
  0x82   : > { %v451_v27 = vsel %vm262_vm0, %v427_v25, 0.0 }
  0x83   : > { %353 = vrot.lane.b32.xlu1 %v259_v24, %s5573_s29  ;;  %v428_v24 = vld [vmem:[%s5711_s28 + $0xa8] sm:$0xff] }
  0x84   : > { %v454_v26 = vsel %vm262_vm0, %v428_v24, 0.0 }
  0x85   : > { %355 = vrot.lane.b32.xlu0 %v260_v29, %s5573_s29  ;;  %v429_v29 = vld [vmem:[%s5711_s28 + $0xc8] sm:$0xff] }
  0x86   : > { %v457_v31 = vsel %vm262_vm0, %v429_v29, 0.0 }
  0x87   : > { %357 = vrot.lane.b32.xlu1 %v261_v28, %s5573_s29  ;;  %v430_v28 = vld [vmem:[%s5711_s28 + $0xe8] sm:$0xff] }
  0x88   : > { %v460_v30 = vsel %vm262_vm0, %v430_v28, 0.0 }
  0xc3   : > { %v5765_v32 = vpop.xlane.xlu1 %270 }
  0xc4   : > { %v5767_v33 = vpop.xlane.xlu0 %264 }
  0xc7   : > { %v5769_v34 = vpop.xlane.xlu1 %273 }
  0xc8   : > { %v5771_v35 = vpop.xlane.xlu0 %267 }
  0xcb   : > { %v5773_v36 = vpop.xlane.xlu1 %279 }
  0xcc   : > { %v5775_v37 = vpop.xlane.xlu0 %276 }
  0xcf   : > { %v5777_v38 = vpop.xlane.xlu1 %285 }
  0xd0   : > { %v5779_v39 = vpop.xlane.xlu0 %282 }
  0xd3   : > { %v5781_v40 = vpop.xlane.xlu1 %291 }
  0xd4   : > { %8695 = vst [vmem:[#allocation8_spill] sm:$0xff] %v5781_v40  ;;  %v5783_v41 = vpop.xlane.xlu0 %288 }
  0xd5   : > { %8696 = vst [vmem:[#allocation9_spill] sm:$0xff] %v5783_v41 }
  0xd7   : > { %v5785_v42 = vpop.xlane.xlu1 %297 }
  0xd8   : > { %8697 = vst [vmem:[#allocation10_spill] sm:$0xff] %v5785_v42  ;;  %v5787_v43 = vpop.xlane.xlu0 %294  ;;  %v790_v42 = vld [vmem:[%s5711_s28 + $0x1f8] sm:$0xff] }
  0xd9   : > { %8698 = vst [vmem:[#allocation11_spill] sm:$0xff] %v5787_v43  ;;  %v789_v43 = vld [vmem:[%s5711_s28 + $0x1d8] sm:$0xff]  ;;  %v836_v40 = vsel %vm262_vm0, %v790_v42, 0.0 }
  0xdb   : > { %v5789_v44 = vpop.xlane.xlu1 %303 }
  0xdc   : > { %8699 = vst [vmem:[#allocation12_spill] sm:$0xff] %v5789_v44  ;;  %v5791_v45 = vpop.xlane.xlu0 %300 }
  0xdd   : > { %8700 = vst [vmem:[#allocation13_spill] sm:$0xff] %v5791_v45 }
  0xdf   : > { %v5793_v46 = vpop.xlane.xlu1 %309 }
  0xe0   : > { %8701 = vst [vmem:[#allocation14_spill] sm:$0xff] %v5793_v46  ;;  %v5795_v47 = vpop.xlane.xlu0 %306 }
  0xe1   : > { %8702 = vst [vmem:[#allocation15_spill] sm:$0xff] %v5795_v47 }
  0xe3   : > { %v330_v48 = vpop.permute.xlu1 %329 }
  0xe4   : > { %v328_v49 = vpop.permute.xlu0 %327  ;;  %v378_v50 = vsel %vm262_vm0, %v330_v48, 0.0  ;;  %v432_v48 = vld [vmem:[%s5711_s28 + $0x128] sm:$0xff] }
  0xe5   : > { %v375_v51 = vsel %vm262_vm0, %v328_v49, 0.0  ;;  %379 = vadd.xlane.f32.xlu1 %v378_v50  ;;  %v431_v49 = vld [vmem:[%s5711_s28 + $0x108] sm:$0xff]  ;;  %v466_v50 = vsel %vm262_vm0, %v432_v48, 0.0 }
  0xe6   : > { %376 = vadd.xlane.f32.xlu0 %v375_v51  ;;  %v463_v51 = vsel %vm262_vm0, %v431_v49, 0.0 }
  0xe7   : > { %v332_v52 = vpop.permute.xlu1 %331 }
  0xe8   : > { %v336_v53 = vpop.permute.xlu0 %335  ;;  %v381_v54 = vsel %vm262_vm0, %v332_v52, 0.0  ;;  %v434_v52 = vld [vmem:[%s5711_s28 + $0x168] sm:$0xff] }
  0xe9   : > { %v387_v58 = vsel %vm262_vm0, %v336_v53, 0.0  ;;  %v433_v53 = vld [vmem:[%s5711_s28 + $0x148] sm:$0xff] }
  0xea   : > { %382 = vadd.xlane.f32.xlu0 %v381_v54  ;;  %v472_v54 = vsel %vm262_vm0, %v434_v52, 0.0 }
  0xeb   : > { %v334_v55 = vpop.permute.xlu1 %333 }
  0xec   : > { %v340_v56 = vpop.permute.xlu0 %339  ;;  %v384_v57 = vsel %vm262_vm0, %v334_v55, 0.0  ;;  %v469_v55 = vsel %vm262_vm0, %v433_v53, 0.0 }
  0xed   : > { %v393_v62 = vsel %vm262_vm0, %v340_v56, 0.0  ;;  %v436_v56 = vld [vmem:[%s5711_s28 + $0x1a8] sm:$0xff] }
  0xee   : > { %385 = vadd.xlane.f32.xlu0 %v384_v57  ;;  %v435_v57 = vld [vmem:[%s5711_s28 + $0x188] sm:$0xff] }
  0xef   : > { %v338_v59 = vpop.permute.xlu1 %337 }
  0xf0   : > { %v344_v60 = vpop.permute.xlu0 %343  ;;  %v390_v61 = vsel %vm262_vm0, %v338_v59, 0.0  ;;  %v475_v59 = vsel %vm262_vm0, %v435_v57, 0.0 }
  0xf1   : > { %391 = vadd.xlane.f32.xlu1 %v390_v61  ;;  %v399_v2 = vsel %vm262_vm0, %v344_v60, 0.0  ;;  %v438_v60 = vld [vmem:[%s5711_s28 + $0x1e8] sm:$0xff] }
  0xf2   : > { %388 = vadd.xlane.f32.xlu0 %v387_v58  ;;  %v478_v58 = vsel %vm262_vm0, %v436_v56, 0.0  ;;  %v437_v61 = vld [vmem:[%s5711_s28 + $0x1c8] sm:$0xff] }
  0xf3   : > { %v342_v63 = vpop.permute.xlu1 %341 }
  0xf4   : > { %v348_v0 = vpop.permute.xlu0 %347  ;;  %v396_v1 = vsel %vm262_vm0, %v342_v63, 0.0  ;;  %v481_v63 = vsel %vm262_vm0, %v437_v61, 0.0 }
  0xf5   : > { %397 = vadd.xlane.f32.xlu1 %v396_v1  ;;  %v405_v6 = vsel %vm262_vm0, %v348_v0, 0.0 }
  0xf6   : > { %394 = vadd.xlane.f32.xlu0 %v393_v62  ;;  %v484_v62 = vsel %vm262_vm0, %v438_v60, 0.0 }
  0xf7   : > { %v346_v3 = vpop.permute.xlu1 %345 }
  0xf8   : > { %v402_v4 = vsel %vm262_vm0, %v346_v3, 0.0  ;;  %v352_v5 = vpop.permute.xlu0 %351 }
  0xf9   : > { %403 = vadd.xlane.f32.xlu1 %v402_v4  ;;  %v411_v9 = vsel %vm262_vm0, %v352_v5, 0.0 }
  0xfa   : > { %400 = vadd.xlane.f32.xlu0 %v399_v2 }
  0xfb   : > { %v350_v7 = vpop.permute.xlu1 %349 }
  0xfc   : > { %v408_v8 = vsel %vm262_vm0, %v350_v7, 0.0  ;;  %v356_v11 = vpop.permute.xlu0 %355 }
  0xfd   : > { %409 = vadd.xlane.f32.xlu1 %v408_v8  ;;  %v417_v13 = vsel %vm262_vm0, %v356_v11, 0.0 }
  0xfe   : > { %406 = vadd.xlane.f32.xlu0 %v405_v6 }
  0xff   : > { %v354_v10 = vpop.permute.xlu1 %353 }
 0x100   : > { %v414_v12 = vsel %vm262_vm0, %v354_v10, 0.0 }
 0x101   : > { %415 = vadd.xlane.f32.xlu1 %v414_v12 }
 0x102   : > { %412 = vadd.xlane.f32.xlu0 %v411_v9 }
 0x103   : > { %v358_v14 = vpop.permute.xlu1 %357 }
 0x104   : > { %v420_v17 = vsel %vm262_vm0, %v358_v14, 0.0 }
 0x105   : > { %421 = vadd.xlane.f32.xlu1 %v420_v17 }
 0x106   : > { %418 = vadd.xlane.f32.xlu0 %v417_v13 }
 0x109   : > { %443 = vadd.xlane.f32.xlu1 %v442_v18 }
 0x10a   : > { %440 = vadd.xlane.f32.xlu0 %v439_v19 }
 0x10d   : > { %449 = vadd.xlane.f32.xlu1 %v448_v22 }
 0x10e   : > { %446 = vadd.xlane.f32.xlu0 %v445_v23 }
 0x111   : > { %455 = vadd.xlane.f32.xlu1 %v454_v26 }
 0x112   : > { %452 = vadd.xlane.f32.xlu0 %v451_v27 }
 0x115   : > { %461 = vadd.xlane.f32.xlu1 %v460_v30 }
 0x116   : > { %458 = vadd.xlane.f32.xlu0 %v457_v31 }
 0x119   : > { %467 = vadd.xlane.f32.xlu1 %v466_v50 }
 0x11a   : > { %464 = vadd.xlane.f32.xlu0 %v463_v51 }
 0x11d   : > { %473 = vadd.xlane.f32.xlu1 %v472_v54 }
 0x11e   : > { %470 = vadd.xlane.f32.xlu0 %v469_v55 }
 0x121   : > { %479 = vadd.xlane.f32.xlu1 %v478_v58 }
 0x122   : > { %476 = vadd.xlane.f32.xlu0 %v475_v59 }
 0x125   : > { %485 = vadd.xlane.f32.xlu1 %v484_v62 }
 0x126   : > { %482 = vadd.xlane.f32.xlu0 %v481_v63 }
 0x136   : > { %505 = vrot.lane.b32.xlu1 %v424_v15, %s5573_s29 }
 0x13a   : > { %507 = vrot.lane.b32.xlu1 %v425_v21, %s5573_s29 }
 0x13c   : > { %503 = vrot.lane.b32.xlu0 %v423_v16, %s5573_s29 }
 0x13e   : > { %509 = vrot.lane.b32.xlu1 %v426_v20, %s5573_s29 }
 0x140   : > { %511 = vrot.lane.b32.xlu0 %v427_v25, %s5573_s29 }
 0x142   : > { %513 = vrot.lane.b32.xlu1 %v428_v24, %s5573_s29 }
 0x144   : > { %515 = vrot.lane.b32.xlu0 %v429_v29, %s5573_s29 }
 0x146   : > { %517 = vrot.lane.b32.xlu1 %v430_v28, %s5573_s29 }
 0x148   : > { %519 = vrot.lane.b32.xlu0 %v431_v49, %s5573_s29 }
 0x14a   : > { %521 = vrot.lane.b32.xlu1 %v432_v48, %s5573_s29 }
 0x14c   : > { %523 = vrot.lane.b32.xlu0 %v433_v53, %s5573_s29 }
 0x14e   : > { %525 = vrot.lane.b32.xlu1 %v434_v52, %s5573_s29 }
 0x150   : > { %527 = vrot.lane.b32.xlu0 %v435_v57, %s5573_s29 }
 0x152   : > { %529 = vrot.lane.b32.xlu1 %v436_v56, %s5573_s29 }
 0x154   : > { %531 = vrot.lane.b32.xlu0 %v437_v61, %s5573_s29 }
 0x156   : > { %533 = vrot.lane.b32.xlu1 %v438_v60, %s5573_s29 }
 0x16e   : > { %v5865_v2 = vpop.xlane.xlu1 %379 }
 0x16f   : > { %v5861_v0 = vpop.xlane.xlu0 %376 }
 0x173   : > { %v5863_v1 = vpop.xlane.xlu0 %382 }
 0x177   : > { %v5867_v3 = vpop.xlane.xlu0 %385 }
 0x17a   : > { %v5869_v4 = vpop.xlane.xlu1 %391 }
 0x17b   : > { %v5871_v5 = vpop.xlane.xlu0 %388 }
 0x17e   : > { %v5873_v6 = vpop.xlane.xlu1 %397 }
 0x17f   : > { %v5875_v7 = vpop.xlane.xlu0 %394 }
 0x182   : > { %v5877_v8 = vpop.xlane.xlu1 %403 }
 0x183   : > { %8703 = vst [vmem:[#allocation16_spill] sm:$0xff] %v5877_v8  ;;  %v5879_v9 = vpop.xlane.xlu0 %400  ;;  %v788_v8 = vld [vmem:[%s5711_s28 + $0x1b8] sm:$0xff] }
 0x184   : > { %8704 = vst [vmem:[#allocation17_spill] sm:$0xff] %v5879_v9  ;;  %v787_v9 = vld [vmem:[%s5711_s28 + $0x198] sm:$0xff] }
 0x186   : > { %v5881_v10 = vpop.xlane.xlu1 %409 }
 0x187   : > { %8705 = vst [vmem:[#allocation18_spill] sm:$0xff] %v5881_v10  ;;  %v5883_v11 = vpop.xlane.xlu0 %406  ;;  %v786_v10 = vld [vmem:[%s5711_s28 + $0x178] sm:$0xff] }
 0x188   : > { %8706 = vst [vmem:[#allocation19_spill] sm:$0xff] %v5883_v11  ;;  %v785_v11 = vld [vmem:[%s5711_s28 + $0x158] sm:$0xff] }
 0x18a   : > { %v5885_v12 = vpop.xlane.xlu1 %415 }
 0x18b   : > { %8707 = vst [vmem:[#allocation20_spill] sm:$0xff] %v5885_v12  ;;  %v5887_v13 = vpop.xlane.xlu0 %412 }
 0x18c   : > { %8708 = vst [vmem:[#allocation21_spill] sm:$0xff] %v5887_v13 }
 0x18e   : > { %v5889_v14 = vpop.xlane.xlu1 %421 }
 0x18f   : > { %8709 = vst [vmem:[#allocation22_spill] sm:$0xff] %v5889_v14  ;;  %v5891_v15 = vpop.xlane.xlu0 %418  ;;  %v614_v14 = vld [vmem:[%s5711_s28 + $0x1f0] sm:$0xff] }
 0x190   : > { %8710 = vst [vmem:[#allocation23_spill] sm:$0xff] %v5891_v15  ;;  %v613_v15 = vld [vmem:[%s5711_s28 + $0x1d0] sm:$0xff]  ;;  %v660_v12 = vsel %vm262_vm0, %v614_v14, 0.0 }
 0x192   : > { %v5893_v16 = vpop.xlane.xlu1 %443 }
 0x193   : > { %v5895_v17 = vpop.xlane.xlu0 %440 }
 0x196   : > { %v5897_v18 = vpop.xlane.xlu1 %449 }
 0x197   : > { %v5899_v19 = vpop.xlane.xlu0 %446 }
 0x19a   : > { %v5901_v20 = vpop.xlane.xlu1 %455 }
 0x19b   : > { %v5903_v21 = vpop.xlane.xlu0 %452 }
 0x19e   : > { %v5905_v22 = vpop.xlane.xlu1 %461 }
 0x19f   : > { %v5907_v23 = vpop.xlane.xlu0 %458 }
 0x1a2   : > { %v5909_v24 = vpop.xlane.xlu1 %467 }
 0x1a3   : > { %8711 = vst [vmem:[#allocation24_spill] sm:$0xff] %v5909_v24  ;;  %v5911_v25 = vpop.xlane.xlu0 %464  ;;  %v784_v24 = vld [vmem:[%s5711_s28 + $0x138] sm:$0xff] }
 0x1a4   : > { %8712 = vst [vmem:[#allocation25_spill] sm:$0xff] %v5911_v25  ;;  %v783_v25 = vld [vmem:[%s5711_s28 + $0x118] sm:$0xff] }
 0x1a6   : > { %v5913_v26 = vpop.xlane.xlu1 %473 }
 0x1a7   : > { %8713 = vst [vmem:[#allocation26_spill] sm:$0xff] %v5913_v26  ;;  %v5915_v27 = vpop.xlane.xlu0 %470 }
 0x1a8   : > { %8714 = vst [vmem:[#allocation27_spill] sm:$0xff] %v5915_v27  ;;  %v781_v27 = vld [vmem:[%s5711_s28 + $0xd8] sm:$0xff] }
 0x1aa   : > { %v5917_v28 = vpop.xlane.xlu1 %479 }
 0x1ab   : > { %8715 = vst [vmem:[#allocation28_spill] sm:$0xff] %v5917_v28  ;;  %v5919_v29 = vpop.xlane.xlu0 %476  ;;  %v612_v28 = vld [vmem:[%s5711_s28 + $0x1b0] sm:$0xff] }
 0x1ac   : > { %8716 = vst [vmem:[#allocation29_spill] sm:$0xff] %v5919_v29  ;;  %v611_v29 = vld [vmem:[%s5711_s28 + $0x190] sm:$0xff] }
 0x1ae   : > { %v5921_v30 = vpop.xlane.xlu1 %485 }
 0x1af   : > { %8717 = vst [vmem:[#allocation30_spill] sm:$0xff] %v5921_v30  ;;  %v5923_v31 = vpop.xlane.xlu0 %482  ;;  %v610_v30 = vld [vmem:[%s5711_s28 + $0x170] sm:$0xff] }
 0x1b0   : > { %8718 = vst [vmem:[#allocation31_spill] sm:$0xff] %v5923_v31  ;;  %v609_v31 = vld [vmem:[%s5711_s28 + $0x150] sm:$0xff] }
 0x1b2   : > { %v506_v48 = vpop.permute.xlu1 %505 }
 0x1b3   : > { %v504_v49 = vpop.permute.xlu0 %503  ;;  %v554_v50 = vsel %vm262_vm0, %v506_v48, 0.0 }
 0x1b4   : > { %v551_v51 = vsel %vm262_vm0, %v504_v49, 0.0  ;;  %555 = vadd.xlane.f32.xlu1 %v554_v50 }
 0x1b5   : > { %552 = vadd.xlane.f32.xlu0 %v551_v51 }
 0x1b6   : > { %v508_v52 = vpop.permute.xlu1 %507 }
 0x1b7   : > { %v512_v53 = vpop.permute.xlu0 %511  ;;  %v557_v54 = vsel %vm262_vm0, %v508_v52, 0.0 }
 0x1b8   : > { %v563_v58 = vsel %vm262_vm0, %v512_v53, 0.0 }
 0x1b9   : > { %558 = vadd.xlane.f32.xlu0 %v557_v54 }
 0x1ba   : > { %v510_v55 = vpop.permute.xlu1 %509 }
 0x1bb   : > { %v516_v56 = vpop.permute.xlu0 %515  ;;  %v560_v57 = vsel %vm262_vm0, %v510_v55, 0.0 }
 0x1bc   : > { %v569_v62 = vsel %vm262_vm0, %v516_v56, 0.0 }
 0x1bd   : > { %561 = vadd.xlane.f32.xlu0 %v560_v57 }
 0x1be   : > { %v514_v59 = vpop.permute.xlu1 %513 }
 0x1bf   : > { %v520_v60 = vpop.permute.xlu0 %519  ;;  %v566_v61 = vsel %vm262_vm0, %v514_v59, 0.0 }
 0x1c0   : > { %567 = vadd.xlane.f32.xlu1 %v566_v61  ;;  %v575_v50 = vsel %vm262_vm0, %v520_v60, 0.0 }
 0x1c1   : > { %564 = vadd.xlane.f32.xlu0 %v563_v58 }
 0x1c2   : > { %v518_v63 = vpop.permute.xlu1 %517 }
 0x1c3   : > { %v524_v48 = vpop.permute.xlu0 %523  ;;  %v572_v49 = vsel %vm262_vm0, %v518_v63, 0.0  ;;  %v600_v63 = vld [vmem:[%s5711_s28 + $0x30] sm:$0xff] }
 0x1c4   : > { %573 = vadd.xlane.f32.xlu1 %v572_v49  ;;  %v581_v54 = vsel %vm262_vm0, %v524_v48, 0.0  ;;  %v599_v48 = vld [vmem:[%s5711_s28 + $0x10] sm:$0xff] }
 0x1c5   : > { %570 = vadd.xlane.f32.xlu0 %v569_v62 }
 0x1c6   : > { %v522_v51 = vpop.permute.xlu1 %521 }
 0x1c7   : > { %v578_v52 = vsel %vm262_vm0, %v522_v51, 0.0  ;;  %v528_v53 = vpop.permute.xlu0 %527  ;;  %v615_v51 = vsel %vm262_vm0, %v599_v48, 0.0 }
 0x1c8   : > { %579 = vadd.xlane.f32.xlu1 %v578_v52  ;;  %v587_v57 = vsel %vm262_vm0, %v528_v53, 0.0  ;;  %v602_v52 = vld [vmem:[%s5711_s28 + $0x70] sm:$0xff] }
 0x1c9   : > { %576 = vadd.xlane.f32.xlu0 %v575_v50  ;;  %v618_v50 = vsel %vm262_vm0, %v600_v63, 0.0  ;;  %v601_v53 = vld [vmem:[%s5711_s28 + $0x50] sm:$0xff] }
 0x1ca   : > { %v526_v55 = vpop.permute.xlu1 %525 }
 0x1cb   : > { %v584_v56 = vsel %vm262_vm0, %v526_v55, 0.0  ;;  %v532_v59 = vpop.permute.xlu0 %531  ;;  %v621_v55 = vsel %vm262_vm0, %v601_v53, 0.0 }
 0x1cc   : > { %585 = vadd.xlane.f32.xlu1 %v584_v56  ;;  %v593_v61 = vsel %vm262_vm0, %v532_v59, 0.0  ;;  %v604_v56 = vld [vmem:[%s5711_s28 + $0xb0] sm:$0xff] }
 0x1cd   : > { %582 = vadd.xlane.f32.xlu0 %v581_v54  ;;  %v624_v54 = vsel %vm262_vm0, %v602_v52, 0.0 }
 0x1ce   : > { %v530_v58 = vpop.permute.xlu1 %529 }
 0x1cf   : > { %v590_v60 = vsel %vm262_vm0, %v530_v58, 0.0  ;;  %v630_v58 = vsel %vm262_vm0, %v604_v56, 0.0 }
 0x1d0   : > { %591 = vadd.xlane.f32.xlu1 %v590_v60  ;;  %v606_v60 = vld [vmem:[%s5711_s28 + $0xf0] sm:$0xff] }
 0x1d1   : > { %588 = vadd.xlane.f32.xlu0 %v587_v57  ;;  %v603_v57 = vld [vmem:[%s5711_s28 + $0x90] sm:$0xff] }
 0x1d2   : > { %v534_v62 = vpop.permute.xlu1 %533  ;;  %v627_v59 = vsel %vm262_vm0, %v603_v57, 0.0 }
 0x1d3   : > { %v596_v49 = vsel %vm262_vm0, %v534_v62, 0.0  ;;  %v636_v62 = vsel %vm262_vm0, %v606_v60, 0.0 }
 0x1d4   : > { %597 = vadd.xlane.f32.xlu1 %v596_v49 }
 0x1d5   : > { %594 = vadd.xlane.f32.xlu0 %v593_v61  ;;  %v605_v61 = vld [vmem:[%s5711_s28 + $0xd0] sm:$0xff] }
 0x1d6   : > { %v633_v49 = vsel %vm262_vm0, %v605_v61, 0.0 }
 0x1d8   : > { %619 = vadd.xlane.f32.xlu1 %v618_v50  ;;  %v608_v50 = vld [vmem:[%s5711_s28 + $0x130] sm:$0xff] }
 0x1d9   : > { %616 = vadd.xlane.f32.xlu0 %v615_v51  ;;  %v607_v51 = vld [vmem:[%s5711_s28 + $0x110] sm:$0xff] }
 0x1dc   : > { %625 = vadd.xlane.f32.xlu1 %v624_v54  ;;  %v642_v54 = vsel %vm262_vm0, %v608_v50, 0.0 }
 0x1dd   : > { %622 = vadd.xlane.f32.xlu0 %v621_v55  ;;  %v639_v55 = vsel %vm262_vm0, %v607_v51, 0.0 }
 0x1e0   : > { %631 = vadd.xlane.f32.xlu1 %v630_v58  ;;  %v648_v58 = vsel %vm262_vm0, %v610_v30, 0.0 }
 0x1e1   : > { %628 = vadd.xlane.f32.xlu0 %v627_v59  ;;  %v645_v59 = vsel %vm262_vm0, %v609_v31, 0.0 }
 0x1e4   : > { %637 = vadd.xlane.f32.xlu1 %v636_v62  ;;  %v654_v62 = vsel %vm262_vm0, %v612_v28, 0.0 }
 0x1e5   : > { %634 = vadd.xlane.f32.xlu0 %v633_v49  ;;  %v651_v49 = vsel %vm262_vm0, %v611_v29, 0.0 }
 0x1e8   : > { %643 = vadd.xlane.f32.xlu1 %v642_v54  ;;  %v657_v54 = vsel %vm262_vm0, %v613_v15, 0.0 }
 0x1e9   : > { %640 = vadd.xlane.f32.xlu0 %v639_v55 }
 0x1ec   : > { %649 = vadd.xlane.f32.xlu1 %v648_v58 }
 0x1ed   : > { %646 = vadd.xlane.f32.xlu0 %v645_v59 }
 0x1f0   : > { %655 = vadd.xlane.f32.xlu1 %v654_v62 }
 0x1f1   : > { %652 = vadd.xlane.f32.xlu0 %v651_v49 }
 0x1f4   : > { %661 = vadd.xlane.f32.xlu1 %v660_v12 }
 0x1f5   : > { %658 = vadd.xlane.f32.xlu0 %v657_v54 }
 0x205   : > { %681 = vrot.lane.b32.xlu1 %v600_v63, %s5573_s29 }
 0x209   : > { %683 = vrot.lane.b32.xlu1 %v601_v53, %s5573_s29 }
 0x20b   : > { %679 = vrot.lane.b32.xlu0 %v599_v48, %s5573_s29 }
 0x20d   : > { %685 = vrot.lane.b32.xlu1 %v602_v52, %s5573_s29 }
 0x20f   : > { %687 = vrot.lane.b32.xlu0 %v603_v57, %s5573_s29 }
 0x211   : > { %689 = vrot.lane.b32.xlu1 %v604_v56, %s5573_s29 }
 0x213   : > { %691 = vrot.lane.b32.xlu0 %v605_v61, %s5573_s29 }
 0x215   : > { %693 = vrot.lane.b32.xlu1 %v606_v60, %s5573_s29 }
 0x217   : > { %695 = vrot.lane.b32.xlu0 %v607_v51, %s5573_s29 }
 0x219   : > { %697 = vrot.lane.b32.xlu1 %v608_v50, %s5573_s29 }
 0x21b   : > { %699 = vrot.lane.b32.xlu0 %v609_v31, %s5573_s29 }
 0x21d   : > { %701 = vrot.lane.b32.xlu1 %v610_v30, %s5573_s29 }
 0x21f   : > { %703 = vrot.lane.b32.xlu0 %v611_v29, %s5573_s29 }
 0x221   : > { %705 = vrot.lane.b32.xlu1 %v612_v28, %s5573_s29 }
 0x223   : > { %707 = vrot.lane.b32.xlu0 %v613_v15, %s5573_s29 }
 0x225   : > { %709 = vrot.lane.b32.xlu1 %v614_v14, %s5573_s29 }
 0x23d   : > { %v5993_v48 = vpop.xlane.xlu1 %555 }
 0x23e   : > { %v5989_v12 = vpop.xlane.xlu0 %552 }
 0x242   : > { %v5991_v63 = vpop.xlane.xlu0 %558 }
 0x246   : > { %v5995_v52 = vpop.xlane.xlu0 %561 }
 0x249   : > { %v5997_v53 = vpop.xlane.xlu1 %567 }
 0x24a   : > { %v5999_v31 = vpop.xlane.xlu0 %564 }
 0x24d   : > { %v6001_v30 = vpop.xlane.xlu1 %573 }
 0x24e   : > { %v6003_v29 = vpop.xlane.xlu0 %570 }
 0x251   : > { %v6005_v28 = vpop.xlane.xlu1 %579 }
 0x252   : > { %8719 = vst [vmem:[#allocation32_spill] sm:$0xff] %v6005_v28  ;;  %v6007_v15 = vpop.xlane.xlu0 %576 }
 0x253   : > { %8720 = vst [vmem:[#allocation33_spill] sm:$0xff] %v6007_v15 }
 0x255   : > { %v6009_v14 = vpop.xlane.xlu1 %585 }
 0x256   : > { %8721 = vst [vmem:[#allocation34_spill] sm:$0xff] %v6009_v14  ;;  %v6011_v56 = vpop.xlane.xlu0 %582 }
 0x257   : > { %8722 = vst [vmem:[#allocation35_spill] sm:$0xff] %v6011_v56 }
 0x259   : > { %v6013_v57 = vpop.xlane.xlu1 %591 }
 0x25a   : > { %8723 = vst [vmem:[#allocation36_spill] sm:$0xff] %v6013_v57  ;;  %v6015_v60 = vpop.xlane.xlu0 %588 }
 0x25b   : > { %8724 = vst [vmem:[#allocation37_spill] sm:$0xff] %v6015_v60 }
 0x25d   : > { %v6017_v61 = vpop.xlane.xlu1 %597 }
 0x25e   : > { %8725 = vst [vmem:[#allocation38_spill] sm:$0xff] %v6017_v61  ;;  %v6019_v50 = vpop.xlane.xlu0 %594 }
 0x25f   : > { %8726 = vst [vmem:[#allocation39_spill] sm:$0xff] %v6019_v50 }
 0x261   : > { %v6021_v51 = vpop.xlane.xlu1 %619 }
 0x262   : > { %v6023_v55 = vpop.xlane.xlu0 %616 }
 0x265   : > { %v6025_v58 = vpop.xlane.xlu1 %625 }
 0x266   : > { %v6027_v59 = vpop.xlane.xlu0 %622 }
 0x269   : > { %v6029_v62 = vpop.xlane.xlu1 %631 }
 0x26a   : > { %v6031_v49 = vpop.xlane.xlu0 %628 }
 0x26d   : > { %v6033_v54 = vpop.xlane.xlu1 %637 }
 0x26e   : > { %v6035_v57 = vpop.xlane.xlu0 %634 }
 0x271   : > { %v6037_v60 = vpop.xlane.xlu1 %643 }
 0x272   : > { %8727 = vst [vmem:[#allocation40_spill] sm:$0xff] %v6037_v60  ;;  %v6039_v61 = vpop.xlane.xlu0 %640 }
 0x273   : > { %8728 = vst [vmem:[#allocation41_spill] sm:$0xff] %v6039_v61 }
 0x275   : > { %v6041_v50 = vpop.xlane.xlu1 %649 }
 0x276   : > { %8729 = vst [vmem:[#allocation42_spill] sm:$0xff] %v6041_v50  ;;  %v6043_v13 = vpop.xlane.xlu0 %646 }
 0x277   : > { %8730 = vst [vmem:[#allocation43_spill] sm:$0xff] %v6043_v13 }
 0x279   : > { %v6045_v46 = vpop.xlane.xlu1 %655 }
 0x27a   : > { %8731 = vst [vmem:[#allocation44_spill] sm:$0xff] %v6045_v46  ;;  %v6047_v47 = vpop.xlane.xlu0 %652 }
 0x27b   : > { %8732 = vst [vmem:[#allocation45_spill] sm:$0xff] %v6047_v47 }
 0x27d   : > { %v6049_v44 = vpop.xlane.xlu1 %661 }
 0x27e   : > { %8733 = vst [vmem:[#allocation46_spill] sm:$0xff] %v6049_v44  ;;  %v6051_v45 = vpop.xlane.xlu0 %658 }
 0x27f   : > { %8734 = vst [vmem:[#allocation47_spill] sm:$0xff] %v6051_v45 }
 0x281   : > { %v682_v14 = vpop.permute.xlu1 %681 }
 0x282   : > { %v680_v56 = vpop.permute.xlu0 %679  ;;  %v730_v28 = vsel %vm262_vm0, %v682_v14, 0.0 }
 0x283   : > { %v727_v60 = vsel %vm262_vm0, %v680_v56, 0.0  ;;  %731 = vadd.xlane.f32.xlu1 %v730_v28 }
 0x284   : > { %728 = vadd.xlane.f32.xlu0 %v727_v60 }
 0x285   : > { %v684_v61 = vpop.permute.xlu1 %683 }
 0x286   : > { %v688_v50 = vpop.permute.xlu0 %687  ;;  %v733_v13 = vsel %vm262_vm0, %v684_v61, 0.0 }
 0x287   : > { %v739_v44 = vsel %vm262_vm0, %v688_v50, 0.0 }
 0x288   : > { %734 = vadd.xlane.f32.xlu0 %v733_v13 }
 0x289   : > { %v686_v46 = vpop.permute.xlu1 %685 }
 0x28a   : > { %v692_v15 = vpop.permute.xlu0 %691  ;;  %v736_v47 = vsel %vm262_vm0, %v686_v46, 0.0 }
 0x28b   : > { %v745_v28 = vsel %vm262_vm0, %v692_v15, 0.0 }
 0x28c   : > { %737 = vadd.xlane.f32.xlu0 %v736_v47 }
 0x28d   : > { %v690_v45 = vpop.permute.xlu1 %689 }
 0x28e   : > { %v696_v26 = vpop.permute.xlu0 %695  ;;  %v742_v14 = vsel %vm262_vm0, %v690_v45, 0.0 }
 0x28f   : > { %743 = vadd.xlane.f32.xlu1 %v742_v14  ;;  %v751_v13 = vsel %vm262_vm0, %v696_v26, 0.0 }
 0x290   : > { %740 = vadd.xlane.f32.xlu0 %v739_v44 }
 0x291   : > { %v694_v56 = vpop.permute.xlu1 %693 }
 0x292   : > { %v700_v60 = vpop.permute.xlu0 %699  ;;  %v748_v61 = vsel %vm262_vm0, %v694_v56, 0.0 }
 0x293   : > { %749 = vadd.xlane.f32.xlu1 %v748_v61  ;;  %v757_v44 = vsel %vm262_vm0, %v700_v60, 0.0 }
 0x294   : > { %746 = vadd.xlane.f32.xlu0 %v745_v28 }
 0x295   : > { %v698_v46 = vpop.permute.xlu1 %697 }
 0x296   : > { %v754_v47 = vsel %vm262_vm0, %v698_v46, 0.0  ;;  %v704_v45 = vpop.permute.xlu0 %703  ;;  %v775_v46 = vld [vmem:[%s5711_s28 + $0x18] sm:$0xff] }
 0x297   : > { %755 = vadd.xlane.f32.xlu1 %v754_v47  ;;  %v763_v14 = vsel %vm262_vm0, %v704_v45, 0.0 }
 0x298   : > { %752 = vadd.xlane.f32.xlu0 %v751_v13  ;;  %v776_v13 = vld [vmem:[%s5711_s28 + $0x38] sm:$0xff] }
 0x299   : > { %v702_v50 = vpop.permute.xlu1 %701  ;;  %v794_v45 = vsel %vm262_vm0, %v776_v13, 0.0 }
 0x29a   : > { %v760_v15 = vsel %vm262_vm0, %v702_v50, 0.0  ;;  %v708_v28 = vpop.permute.xlu0 %707  ;;  %v778_v50 = vld [vmem:[%s5711_s28 + $0x78] sm:$0xff] }
 0x29b   : > { %761 = vadd.xlane.f32.xlu1 %v760_v15  ;;  %v769_v61 = vsel %vm262_vm0, %v708_v28, 0.0  ;;  %v777_v15 = vld [vmem:[%s5711_s28 + $0x58] sm:$0xff] }
 0x29c   : > { %758 = vadd.xlane.f32.xlu0 %v757_v44  ;;  %v791_v44 = vsel %vm262_vm0, %v775_v46, 0.0  ;;  %v780_v28 = vld [vmem:[%s5711_s28 + $0xb8] sm:$0xff] }
 0x29d   : > { %v706_v26 = vpop.permute.xlu1 %705 }
 0x29e   : > { %v766_v56 = vsel %vm262_vm0, %v706_v26, 0.0  ;;  %v797_v26 = vsel %vm262_vm0, %v777_v15, 0.0 }
 0x29f   : > { %767 = vadd.xlane.f32.xlu1 %v766_v56  ;;  %v779_v56 = vld [vmem:[%s5711_s28 + $0x98] sm:$0xff] }
 0x2a0   : > { %764 = vadd.xlane.f32.xlu0 %v763_v14  ;;  %v800_v14 = vsel %vm262_vm0, %v778_v50, 0.0 }
 0x2a1   : > { %v710_v60 = vpop.permute.xlu1 %709 }
 0x2a2   : > { %v772_v47 = vsel %vm262_vm0, %v710_v60, 0.0  ;;  %v803_v60 = vsel %vm262_vm0, %v779_v56, 0.0 }
 0x2a3   : > { %773 = vadd.xlane.f32.xlu1 %v772_v47  ;;  %v782_v47 = vld [vmem:[%s5711_s28 + $0xf8] sm:$0xff] }
 0x2a4   : > { %770 = vadd.xlane.f32.xlu0 %v769_v61  ;;  %v806_v61 = vsel %vm262_vm0, %v780_v28, 0.0 }
 0x2a7   : > { %795 = vadd.xlane.f32.xlu1 %v794_v45  ;;  %v812_v45 = vsel %vm262_vm0, %v782_v47, 0.0 }
 0x2a8   : > { %792 = vadd.xlane.f32.xlu0 %v791_v44  ;;  %v809_v44 = vsel %vm262_vm0, %v781_v27, 0.0 }
 0x2ab   : > { %801 = vadd.xlane.f32.xlu1 %v800_v14  ;;  %v818_v14 = vsel %vm262_vm0, %v784_v24, 0.0 }
 0x2ac   : > { %798 = vadd.xlane.f32.xlu0 %v797_v26  ;;  %v815_v26 = vsel %vm262_vm0, %v783_v25, 0.0 }
 0x2af   : > { %807 = vadd.xlane.f32.xlu1 %v806_v61  ;;  %v824_v61 = vsel %vm262_vm0, %v786_v10, 0.0 }
 0x2b0   : > { %804 = vadd.xlane.f32.xlu0 %v803_v60  ;;  %v821_v60 = vsel %vm262_vm0, %v785_v11, 0.0 }
 0x2b3   : > { %813 = vadd.xlane.f32.xlu1 %v812_v45  ;;  %v830_v45 = vsel %vm262_vm0, %v788_v8, 0.0 }
 0x2b4   : > { %810 = vadd.xlane.f32.xlu0 %v809_v44  ;;  %v827_v44 = vsel %vm262_vm0, %v787_v9, 0.0 }
 0x2b7   : > { %819 = vadd.xlane.f32.xlu1 %v818_v14  ;;  %v833_v14 = vsel %vm262_vm0, %v789_v43, 0.0 }
 0x2b8   : > { %816 = vadd.xlane.f32.xlu0 %v815_v26 }
 0x2bb   : > { %825 = vadd.xlane.f32.xlu1 %v824_v61 }
 0x2bc   : > { %822 = vadd.xlane.f32.xlu0 %v821_v60 }
 0x2bf   : > { %831 = vadd.xlane.f32.xlu1 %v830_v45 }
 0x2c0   : > { %828 = vadd.xlane.f32.xlu0 %v827_v44 }
 0x2c3   : > { %837 = vadd.xlane.f32.xlu1 %v836_v40  ;;  %v5574_v40 = vmov 0  }
 0x2c4   : > { %834 = vadd.xlane.f32.xlu0 %v833_v14  ;;  %4886 = vset.pattern.permute.xlu1 %v5574_v40 }
 0x2c5   : > { %4885 = vset.pattern.permute.xlu0 %v5574_v40 }
 0x2d4   : > { %857 = vrot.lane.b32.xlu1 %v776_v13, %s5573_s29 }
 0x2d8   : > { %859 = vrot.lane.b32.xlu1 %v777_v15, %s5573_s29 }
 0x2da   : > { %855 = vrot.lane.b32.xlu0 %v775_v46, %s5573_s29 }
 0x2dc   : > { %861 = vrot.lane.b32.xlu1 %v778_v50, %s5573_s29 }
 0x2de   : > { %863 = vrot.lane.b32.xlu0 %v779_v56, %s5573_s29 }
 0x2e0   : > { %865 = vrot.lane.b32.xlu1 %v780_v28, %s5573_s29 }
 0x2e2   : > { %867 = vrot.lane.b32.xlu0 %v781_v27, %s5573_s29 }
 0x2e4   : > { %869 = vrot.lane.b32.xlu1 %v782_v47, %s5573_s29 }
 0x2e6   : > { %871 = vrot.lane.b32.xlu0 %v783_v25, %s5573_s29 }
 0x2e8   : > { %873 = vrot.lane.b32.xlu1 %v784_v24, %s5573_s29 }
 0x2ea   : > { %875 = vrot.lane.b32.xlu0 %v785_v11, %s5573_s29 }
 0x2ec   : > { %877 = vrot.lane.b32.xlu1 %v786_v10, %s5573_s29 }
 0x2ee   : > { %879 = vrot.lane.b32.xlu0 %v787_v9, %s5573_s29 }
 0x2f0   : > { %881 = vrot.lane.b32.xlu1 %v788_v8, %s5573_s29 }
 0x2f2   : > { %883 = vrot.lane.b32.xlu0 %v789_v43, %s5573_s29 }
 0x2f4   : > { %885 = vrot.lane.b32.xlu1 %v790_v42, %s5573_s29 }
 0x30c   : > { %v6121_v24 = vpop.xlane.xlu1 %731 }
 0x30d   : > { %v6117_v27 = vpop.xlane.xlu0 %728 }
 0x311   : > { %v6119_v25 = vpop.xlane.xlu0 %734 }
 0x315   : > { %v6123_v11 = vpop.xlane.xlu0 %737 }
 0x318   : > { %v6125_v10 = vpop.xlane.xlu1 %743 }
 0x319   : > { %v6127_v9 = vpop.xlane.xlu0 %740 }
 0x31c   : > { %v6129_v8 = vpop.xlane.xlu1 %749 }
 0x31d   : > { %8735 = vst [vmem:[#allocation48_spill] sm:$0xff] %v6129_v8  ;;  %v6131_v43 = vpop.xlane.xlu0 %746 }
 0x320   : > { %v6133_v13 = vpop.xlane.xlu1 %755 }
 0x321   : > { %8736 = vst [vmem:[#allocation49_spill] sm:$0xff] %v6133_v13  ;;  %v6135_v46 = vpop.xlane.xlu0 %752 }
 0x322   : > { %8737 = vst [vmem:[#allocation50_spill] sm:$0xff] %v6135_v46 }
 0x324   : > { %v6137_v42 = vpop.xlane.xlu1 %761 }
 0x325   : > { %8738 = vst [vmem:[#allocation51_spill] sm:$0xff] %v6137_v42  ;;  %v6139_v50 = vpop.xlane.xlu0 %758 }
 0x326   : > { %8739 = vst [vmem:[#allocation52_spill] sm:$0xff] %v6139_v50 }
 0x328   : > { %v6141_v15 = vpop.xlane.xlu1 %767 }
 0x329   : > { %8740 = vst [vmem:[#allocation53_spill] sm:$0xff] %v6141_v15  ;;  %v6143_v28 = vpop.xlane.xlu0 %764 }
 0x32a   : > { %8741 = vst [vmem:[#allocation54_spill] sm:$0xff] %v6143_v28 }
 0x32c   : > { %v6145_v56 = vpop.xlane.xlu1 %773 }
 0x32d   : > { %8742 = vst [vmem:[#allocation55_spill] sm:$0xff] %v6145_v56  ;;  %v6147_v47 = vpop.xlane.xlu0 %770 }
 0x32e   : > { %8743 = vst [vmem:[#allocation56_spill] sm:$0xff] %v6147_v47 }
 0x330   : > { %v6149_v26 = vpop.xlane.xlu1 %795 }
 0x331   : > { %v6151_v61 = vpop.xlane.xlu0 %792 }
 0x334   : > { %v6153_v60 = vpop.xlane.xlu1 %801 }
 0x335   : > { %v6155_v45 = vpop.xlane.xlu0 %798 }
 0x338   : > { %v6157_v44 = vpop.xlane.xlu1 %807 }
 0x339   : > { %8744 = vst [vmem:[#allocation57_spill] sm:$0xff] %v6157_v44  ;;  %v6159_v14 = vpop.xlane.xlu0 %804 }
 0x33a   : > { %8745 = vst [vmem:[#allocation58_spill] sm:$0xff] %v6159_v14 }
 0x33c   : > { %v6161_v40 = vpop.xlane.xlu1 %813 }
 0x33d   : > { %8746 = vst [vmem:[#allocation59_spill] sm:$0xff] %v6161_v40  ;;  %v6163_v15 = vpop.xlane.xlu0 %810 }
 0x33e   : > { %8747 = vst [vmem:[#allocation60_spill] sm:$0xff] %v6163_v15 }
 0x340   : > { %v6165_v28 = vpop.xlane.xlu1 %819 }
 0x341   : > { %8748 = vst [vmem:[#allocation61_spill] sm:$0xff] %v6165_v28  ;;  %v6167_v56 = vpop.xlane.xlu0 %816 }
 0x342   : > { %8749 = vst [vmem:[#allocation62_spill] sm:$0xff] %v6167_v56 }
 0x344   : > { %v6169_v47 = vpop.xlane.xlu1 %825 }
 0x345   : > { %8750 = vst [vmem:[#allocation63_spill] sm:$0xff] %v6169_v47  ;;  %v6171_v42 = vpop.xlane.xlu0 %822 }
 0x346   : > { %8751 = vst [vmem:[#allocation64_spill] sm:$0xff] %v6171_v42 }
 0x348   : > { %v6173_v50 = vpop.xlane.xlu1 %831 }
 0x349   : > { %8752 = vst [vmem:[#allocation65_spill] sm:$0xff] %v6173_v50  ;;  %v6175_v13 = vpop.xlane.xlu0 %828 }
 0x34a   : > { %8753 = vst [vmem:[#allocation66_spill] sm:$0xff] %v6175_v13 }
 0x34c   : > { %v6177_v46 = vpop.xlane.xlu1 %837 }
 0x34d   : > { %8754 = vst [vmem:[#allocation67_spill] sm:$0xff] %v6177_v46  ;;  %v6179_v41 = vpop.xlane.xlu0 %834 }
 0x34e   : > { %8755 = vst [vmem:[#allocation68_spill] sm:$0xff] %v6179_v41 }
 0x350   : > { %v858_v44 = vpop.permute.xlu1 %857 }
 0x351   : > { %v856_v40 = vpop.permute.xlu0 %855  ;;  %v906_v15 = vsel %vm262_vm0, %v858_v44, 0.0 }
 0x352   : > { %v903_v28 = vsel %vm262_vm0, %v856_v40, 0.0  ;;  %907 = vadd.xlane.f32.xlu1 %v906_v15 }
 0x353   : > { %904 = vadd.xlane.f32.xlu0 %v903_v28 }
 0x354   : > { %v860_v56 = vpop.permute.xlu1 %859 }
 0x355   : > { %v864_v47 = vpop.permute.xlu0 %863  ;;  %v909_v42 = vsel %vm262_vm0, %v860_v56, 0.0 }
 0x356   : > { %v915_v46 = vsel %vm262_vm0, %v864_v47, 0.0 }
 0x357   : > { %910 = vadd.xlane.f32.xlu0 %v909_v42 }
 0x358   : > { %v862_v50 = vpop.permute.xlu1 %861 }
 0x359   : > { %v868_v14 = vpop.permute.xlu0 %867  ;;  %v912_v13 = vsel %vm262_vm0, %v862_v50, 0.0 }
 0x35a   : > { %v921_v15 = vsel %vm262_vm0, %v868_v14, 0.0 }
 0x35b   : > { %913 = vadd.xlane.f32.xlu0 %v912_v13 }
 0x35c   : > { %v866_v41 = vpop.permute.xlu1 %865 }
 0x35d   : > { %v872_v8 = vpop.permute.xlu0 %871  ;;  %v918_v44 = vsel %vm262_vm0, %v866_v41, 0.0 }
 0x35e   : > { %919 = vadd.xlane.f32.xlu1 %v918_v44  ;;  %v927_v42 = vsel %vm262_vm0, %v872_v8, 0.0 }
 0x35f   : > { %916 = vadd.xlane.f32.xlu0 %v915_v46 }
 0x360   : > { %v870_v28 = vpop.permute.xlu1 %869 }
 0x361   : > { %v876_v40 = vpop.permute.xlu0 %875  ;;  %v924_v56 = vsel %vm262_vm0, %v870_v28, 0.0 }
 0x362   : > { %925 = vadd.xlane.f32.xlu1 %v924_v56  ;;  %v933_v41 = vsel %vm262_vm0, %v876_v40, 0.0  ;;  %v952_v40 = vmul.f32 0.015625, %v5771_v35  ;;  %v956_v35 = vmul.f32 0.015625, %v5865_v2  ;;  %v970_v2 = vmul.f32 0.015625, %v6025_v58 }
 0x363   : > { %922 = vadd.xlane.f32.xlu0 %v921_v15  ;;  %v967_v58 = vmul.f32 0.015625, %v6023_v55 }
 0x364   : > { %v874_v50 = vpop.permute.xlu1 %873 }
 0x365   : > { %v930_v13 = vsel %vm262_vm0, %v874_v50, 0.0  ;;  %v880_v47 = vpop.permute.xlu0 %879 }
 0x366   : > { %931 = vadd.xlane.f32.xlu1 %v930_v13  ;;  %v939_v14 = vsel %vm262_vm0, %v880_v47, 0.0  ;;  %v953_v13 = vmul.f32 0.015625, %v5765_v32  ;;  %v951_v47 = vmul.f32 0.015625, %v5767_v33  ;;  %v964_v32 = vmul.f32 0.015625, %v5993_v48 }
 0x367   : > { %928 = vadd.xlane.f32.xlu0 %v927_v42  ;;  %v957_v33 = vmul.f32 0.015625, %v5863_v1  ;;  %v961_v48 = vmul.f32 0.015625, %v5899_v19  ;;  %v972_v1 = vmul.f32 0.015625, %v6121_v24  ;;  %v978_v19 = vmul.f32 0.015625, %v6153_v60 }
 0x368   : > { %v878_v44 = vpop.permute.xlu1 %877  ;;  %v969_v24 = vmul.f32 0.015625, %v6027_v59 }
 0x369   : > { %v936_v46 = vsel %vm262_vm0, %v878_v44, 0.0  ;;  %v884_v56 = vpop.permute.xlu0 %883  ;;  %v960_v44 = vmul.f32 0.015625, %v5893_v16  ;;  %v958_v16 = vmul.f32 0.015625, %v5867_v3  ;;  %v974_v3 = vmul.f32 0.015625, %v6123_v11 }
 0x36a   : > { %937 = vadd.xlane.f32.xlu1 %v936_v46  ;;  %v945_v8 = vsel %vm262_vm0, %v884_v56, 0.0  ;;  %v955_v46 = vmul.f32 0.015625, %v5861_v0  ;;  %v968_v0 = vmul.f32 0.015625, %v6021_v51  ;;  %v965_v51 = vmul.f32 0.015625, %v5991_v63 }
 0x36b   : > { %934 = vadd.xlane.f32.xlu0 %v933_v41  ;;  %v954_v41 = vmul.f32 0.015625, %v5769_v34  ;;  %v966_v34 = vmul.f32 0.015625, %v5995_v52  ;;  %v963_v52 = vmul.f32 0.015625, %v5989_v12  ;;  %v971_v12 = vmul.f32 0.015625, %v6117_v27 }
 0x36c   : > { %v882_v28 = vpop.permute.xlu1 %881  ;;  %v973_v11 = vmul.f32 0.015625, %v6119_v25  ;;  %v975_v63 = vmul.f32 0.015625, %v6151_v61 }
 0x36d   : > { %v942_v15 = vsel %vm262_vm0, %v882_v28, 0.0 }
 0x36e   : > { %943 = vadd.xlane.f32.xlu1 %v942_v15 }
 0x36f   : > { %940 = vadd.xlane.f32.xlu0 %v939_v14  ;;  %v962_v14 = vmul.f32 0.015625, %v5897_v18  ;;  %v959_v18 = vmul.f32 0.015625, %v5895_v17  ;;  %v976_v17 = vmul.f32 0.015625, %v6149_v26  ;;  %v977_v26 = vmul.f32 0.015625, %v6155_v45 }
 0x370   : > { %v886_v50 = vpop.permute.xlu1 %885  ;;  %v984_v45 = vmul.f32 0.015625, %v5773_v36 }
 0x371   : > { %v948_v42 = vsel %vm262_vm0, %v886_v50, 0.0  ;;  %v985_v50 = vmul.f32 0.015625, %v5779_v39  ;;  %v990_v39 = vmul.f32 0.015625, %v5873_v6 }
 0x372   : > { %949 = vadd.xlane.f32.xlu1 %v948_v42 }
 0x373   : > { %946 = vadd.xlane.f32.xlu0 %v945_v8  ;;  %v983_v8 = vmul.f32 0.015625, %v5775_v37 }
 0x383   : > { %1118 = vperm.xlu1 %4886, %v952_v40   ;;  %v986_v40 = vmul.f32 0.015625, %v5777_v38 }
 0x387   : > { %1123 = vperm.xlu1 %4886, %v953_v13   ;;  %v987_v13 = vmul.f32 0.015625, %v5871_v5  ;;  %v992_v5 = vmul.f32 0.015625, %v5901_v20 }
 0x389   : > { %1113 = vperm.xlu0 %4885, %v951_v47   ;;  %v988_v47 = vmul.f32 0.015625, %v5869_v4 }
 0x38b   : > { %1128 = vperm.xlu1 %4886, %v954_v41   ;;  %v989_v41 = vmul.f32 0.015625, %v5875_v7  ;;  %v994_v7 = vmul.f32 0.015625, %v5905_v22 }
 0x38d   : > { %1158 = vperm.xlu0 %4885, %v960_v44   ;;  %v991_v44 = vmul.f32 0.015625, %v5903_v21 }
 0x38f   : > { %1133 = vperm.xlu1 %4886, %v955_v46   ;;  %v993_v46 = vmul.f32 0.015625, %v5907_v23  ;;  %v998_v23 = vmul.f32 0.015625, %v6001_v30  ;;  %v1002_v30 = vmul.f32 0.015625, %v6033_v54 }
 0x391   : > { %1168 = vperm.xlu0 %4885, %v962_v14  }
 0x393   : > { %1138 = vperm.xlu1 %4886, %v956_v35   ;;  %v995_v35 = vmul.f32 0.015625, %v5999_v31  ;;  %v1000_v31 = vmul.f32 0.015625, %v6029_v62  ;;  %v1005_v62 = vmul.f32 0.015625, %v6131_v43  ;;  %v8760_v43 = vld [vmem:[#allocation59_spill] sm:$0xff] }
 0x395   : > { %1178 = vperm.xlu0 %4885, %v964_v32   ;;  %v996_v32 = vmul.f32 0.015625, %v5997_v53  ;;  %v1001_v53 = vmul.f32 0.015625, %v6035_v57 }
 0x397   : > { %1143 = vperm.xlu1 %4886, %v957_v33   ;;  %v997_v33 = vmul.f32 0.015625, %v6003_v29 }
 0x399   : > { %1188 = vperm.xlu0 %4885, %v966_v34   ;;  %v999_v34 = vmul.f32 0.015625, %v6031_v49  ;;  %v1003_v49 = vmul.f32 0.015625, %v6127_v9 }
 0x39b   : > { %1148 = vperm.xlu1 %4886, %v958_v16  }
 0x39d   : > { %1198 = vperm.xlu0 %4885, %v968_v0  }
 0x39f   : > { %1153 = vperm.xlu1 %4886, %v959_v18  }
 0x3a1   : > { %1208 = vperm.xlu0 %4885, %v970_v2   ;;  %v1004_v2 = vmul.f32 0.015625, %v6125_v10 }
 0x3a3   : > { %1163 = vperm.xlu1 %4886, %v961_v48  }
 0x3a5   : > { %1218 = vperm.xlu0 %4885, %v972_v1   ;;  %v8756_v1 = vld [vmem:[#allocation48_spill] sm:$0xff] }
 0x3a7   : > { %1173 = vperm.xlu1 %4886, %v963_v52   ;;  %v1006_v52 = vmul.f32 0.015625, %v8756_v1 }
 0x3a9   : > { %1228 = vperm.xlu0 %4885, %v974_v3   ;;  %v8757_v3 = vld [vmem:[#allocation58_spill] sm:$0xff] }
 0x3aa   : > { %v1007_v54 = vmul.f32 0.015625, %v8757_v3 }
 0x3ab   : > { %1183 = vperm.xlu1 %4886, %v965_v51   ;;  %v8758_v51 = vld [vmem:[#allocation57_spill] sm:$0xff] }
 0x3ad   : > { %1238 = vperm.xlu0 %4885, %v976_v17   ;;  %v1008_v17 = vmul.f32 0.015625, %v8758_v51 }
 0x3af   : > { %1193 = vperm.xlu1 %4886, %v967_v58   ;;  %v8759_v58 = vld [vmem:[#allocation60_spill] sm:$0xff] }
 0x3b0   : > { %v1009_v10 = vmul.f32 0.015625, %v8759_v58 }
 0x3b1   : > { %1248 = vperm.xlu0 %4885, %v978_v19  }
 0x3b3   : > { %1203 = vperm.xlu1 %4886, %v969_v24   ;;  %v1010_v24 = vmul.f32 0.015625, %v8760_v43 }
 0x3b7   : > { %1213 = vperm.xlu1 %4886, %v971_v12  }
 0x3bb   : > { %1223 = vperm.xlu1 %4886, %v973_v11  }
 0x3bf   : > { %1233 = vperm.xlu1 %4886, %v975_v63  }
 0x3c3   : > { %1243 = vperm.xlu1 %4886, %v977_v26  }
 0x3db   : > { %v908_v55 = vpop.xlane.xlu1 %907 }
 0x3dc   : > { %v905_v28 = vpop.xlane.xlu0 %904  ;;  %v980_v60 = vmul.f32 0.015625, %v908_v55 }
 0x3dd   : > { %v979_v56 = vmul.f32 0.015625, %v905_v28 }
 0x3de   : > { %1258 = vperm.xlu0 %4885, %v980_v60   ;;  %v8761_v60 = vld [vmem:[#allocation9_spill] sm:$0xff] }
 0x3df   : > { %1253 = vperm.xlu1 %4886, %v979_v56   ;;  %v1015_v56 = vmul.f32 0.015625, %v8761_v60  ;;  %v8770_v60 = vld [vmem:[#allocation24_spill] sm:$0xff] }
 0x3e0   : > { %v911_v59 = vpop.xlane.xlu0 %910 }
 0x3e1   : > { %v981_v15 = vmul.f32 0.015625, %v911_v59 }
 0x3e3   : > { %1263 = vperm.xlu1 %4886, %v981_v15   ;;  %v6295_v15 = vld [vmem:[%s8669_s1] sm:$0xff] }
 0x3e4   : > { %v914_v27 = vpop.xlane.xlu0 %913 }
 0x3e5   : > { %v982_v25 = vmul.f32 0.015625, %v914_v27 }
 0x3e7   : > { %1273 = vperm.xlu1 %4886, %v983_v8   ;;  %1268 = vperm.xlu0 %4885, %v982_v25   ;;  %v6226_v61 = vpop.xlane.xlu1 %919  ;;  %v6302_v8 = vld [vmem:[%s8669_s1 + $0x8] sm:$0xff] }
 0x3e8   : > { %v917_v14 = vpop.xlane.xlu0 %916  ;;  %v1012_v26 = vmul.f32 0.015625, %v6226_v61  ;;  %v8762_v61 = vld [vmem:[#allocation8_spill] sm:$0xff] }
 0x3e9   : > { %v1011_v12 = vmul.f32 0.015625, %v917_v14 }
 0x3eb   : > { %1283 = vperm.xlu1 %4886, %v985_v50   ;;  %1278 = vperm.xlu0 %4885, %v984_v45   ;;  %v6230_v42 = vpop.xlane.xlu1 %925  ;;  %v1016_v45 = vmul.f32 0.015625, %v8762_v61  ;;  %v8763_v50 = vld [vmem:[#allocation11_spill] sm:$0xff] }
 0x3ec   : > { %v923_v6 = vpop.xlane.xlu0 %922  ;;  %v1014_v59 = vmul.f32 0.015625, %v6230_v42  ;;  %v1017_v42 = vmul.f32 0.015625, %v8763_v50 }
 0x3ed   : > { %v1013_v55 = vmul.f32 0.015625, %v923_v6 }
 0x3ef   : > { %1293 = vperm.xlu1 %4886, %v987_v13   ;;  %1288 = vperm.xlu0 %4885, %v986_v40   ;;  %v6234_v37 = vpop.xlane.xlu1 %931 }
 0x3f0   : > { %v6256_v16 = vpop.xlane.xlu0 %928 }
 0x3f3   : > { %1303 = vperm.xlu1 %4886, %v989_v41   ;;  %1298 = vperm.xlu0 %4885, %v988_v47   ;;  %v6238_v36 = vpop.xlane.xlu1 %937  ;;  %v6313_v47 = vld [vmem:[%s8669_s1 + $0x10] sm:$0xff] }
 0x3f4   : > { %v6262_v29 = vpop.xlane.xlu0 %934 }
 0x3f7   : > { %1313 = vperm.xlu1 %4886, %v991_v44   ;;  %1308 = vperm.xlu0 %4885, %v990_v39   ;;  %v6242_v38 = vpop.xlane.xlu1 %943  ;;  %v8764_v44 = vld [vmem:[#allocation10_spill] sm:$0xff] }
 0x3f8   : > { %v6272_v48 = vpop.xlane.xlu0 %940 }
 0x3fb   : > { %1323 = vperm.xlu1 %4886, %v993_v46   ;;  %1318 = vperm.xlu0 %4885, %v992_v5   ;;  %v6246_v4 = vpop.xlane.xlu1 %949  ;;  %v1018_v5 = vmul.f32 0.015625, %v8764_v44  ;;  %v8765_v46 = vld [vmem:[#allocation17_spill] sm:$0xff] }
 0x3fc   : > { %v6278_v9 = vpop.xlane.xlu0 %946  ;;  %v1019_v14 = vmul.f32 0.015625, %v8765_v46  ;;  %v8773_v44 = vld [vmem:[#allocation33_spill] sm:$0xff] }
 0x3fd   : > { %v6392_v46 = vld [vmem:[%s8669_s1 + $0x48] sm:$0xff] }
 0x3ff   : > { %1333 = vperm.xlu1 %4886, %v995_v35   ;;  %1328 = vperm.xlu0 %4885, %v994_v7   ;;  %v1119_v21 = vpop.permute.xlu1 %1118  ;;  %v6323_v7 = vld [vmem:[%s8669_s1 + $0x18] sm:$0xff] }
 0x400   : > { %v1752_v40 = vmul.f32 %v1119_v21, %v6302_v8 }
 0x402   : > { %v1881_v35 = vsel %vm1879_vm1, %v1752_v40, 0.0 }
 0x403   : > { %1343 = vperm.xlu1 %4886, %v997_v33   ;;  %1338 = vperm.xlu0 %4885, %v996_v32   ;;  %v6252_v20 = vpop.permute.xlu1 %1123  ;;  %v6331_v32 = vld [vmem:[%s8669_s1 + $0x20] sm:$0xff] }
 0x404   : > { %v1114_v11 = vpop.permute.xlu0 %1113  ;;  %v1753_v6 = vmul.f32 %v6252_v20, %v6313_v47  ;;  %v6342_v20 = vld [vmem:[%s8669_s1 + $0x28] sm:$0xff] }
 0x405   : > { %v1751_v25 = vmul.f32 %v1114_v11, %v6295_v15 }
 0x407   : > { %1353 = vperm.xlu1 %4886, %v999_v34   ;;  %1348 = vperm.xlu0 %4885, %v998_v23   ;;  %v6258_v22 = vpop.permute.xlu1 %1128  ;;  %v1880_v41 = vsel %vm1879_vm1, %v1751_v25, 0.0  ;;  %v8766_v34 = vld [vmem:[#allocation16_spill] sm:$0xff] }
 0x408   : > { %v6288_v28 = vpop.permute.xlu0 %1158  ;;  %v1882_v21 = vadd.f32 %v1881_v35, %v1880_v41  ;;  %v1754_v33 = vmul.f32 %v6258_v22, %v6323_v7  ;;  %v6352_v22 = vld [vmem:[%s8669_s1 + $0x30] sm:$0xff] }
 0x40b   : > { %1363 = vperm.xlu1 %4886, %v1001_v53   ;;  %1358 = vperm.xlu0 %4885, %v1000_v31   ;;  %v6264_v0 = vpop.permute.xlu1 %1133  ;;  %v1020_v31 = vmul.f32 0.015625, %v8766_v34  ;;  %v8767_v53 = vld [vmem:[#allocation19_spill] sm:$0xff]  ;;  %v8774_v34 = vld [vmem:[#allocation32_spill] sm:$0xff] }
 0x40c   : > { %v6308_v13 = vpop.permute.xlu0 %1168 }
 0x40f   : > { %1373 = vperm.xlu1 %4886, %v1003_v49   ;;  %1368 = vperm.xlu0 %4885, %v1002_v30   ;;  %v6268_v18 = vpop.permute.xlu1 %1138  ;;  %v1021_v30 = vmul.f32 0.015625, %v8767_v53  ;;  %v1883_v49 = vsel %vm1879_vm1, %v1753_v6, 0.0  ;;  %v8775_v53 = vld [vmem:[#allocation35_spill] sm:$0xff] }
 0x410   : > { %v6335_v23 = vpop.permute.xlu0 %1178  ;;  %v1884_v1 = vadd.f32 %v1883_v49, %v1882_v21  ;;  %v1756_v3 = vmul.f32 %v6268_v18, %v6342_v20  ;;  %v6372_v18 = vld [vmem:[%s8669_s1 + $0x40] sm:$0xff]  ;;  %v6400_v21 = vld [vmem:[%s8669_s1 + $0x50] sm:$0xff] }
 0x412   : > { %v1889_v11 = vsel %vm1879_vm1, %v1756_v3, 0.0 }
 0x413   : > { %1383 = vperm.xlu1 %4886, %v1005_v62   ;;  %1378 = vperm.xlu0 %4885, %v1004_v2   ;;  %v6274_v57 = vpop.permute.xlu1 %1143  ;;  %v1755_v2 = vmul.f32 %v6264_v0, %v6331_v32  ;;  %v6362_v0 = vld [vmem:[%s8669_s1 + $0x38] sm:$0xff] }
 0x414   : > { %v1757_v43 = vmul.f32 %v6274_v57, %v6352_v22  ;;  %v8771_v57 = vld [vmem:[#allocation27_spill] sm:$0xff] }
 0x416   : > { %v1891_v61 = vsel %vm1879_vm1, %v1757_v43, 0.0 }
 0x417   : > { %1393 = vperm.xlu1 %4886, %v1007_v54   ;;  %1388 = vperm.xlu0 %4885, %v1006_v52   ;;  %v6282_v19 = vpop.permute.xlu1 %1148  ;;  %v1885_v52 = vsel %vm1879_vm1, %v1754_v33, 0.0  ;;  %v8768_v54 = vld [vmem:[#allocation18_spill] sm:$0xff]  ;;  %v1760_v33 = vmul.f32 %v6288_v28, %v6392_v46 }
 0x418   : > { %v1022_v51 = vmul.f32 0.015625, %v8768_v54  ;;  %v8776_v54 = vld [vmem:[#allocation34_spill] sm:$0xff] }
 0x41b   : > { %1403 = vperm.xlu1 %4886, %v1009_v10   ;;  %1398 = vperm.xlu0 %4885, %v1008_v17   ;;  %v6285_v63 = vpop.permute.xlu1 %1153  ;;  %v8769_v17 = vld [vmem:[#allocation25_spill] sm:$0xff]  ;;  %v1887_v10 = vsel %vm1879_vm1, %v1755_v2, 0.0 }
 0x41c   : > { %v1023_v58 = vmul.f32 0.015625, %v8769_v17  ;;  %v8777_v17 = vld [vmem:[#allocation41_spill] sm:$0xff] }
 0x41d   : > { %v1031_v28 = vmul.f32 0.015625, %v8777_v17  ;;  %v8785_v17 = vld [vmem:[#allocation62_spill] sm:$0xff] }
 0x41f   : > { %1408 = vperm.xlu0 %4885, %v1010_v24   ;;  %1413 = vperm.xlu1 %4886, %v1011_v12   ;;  %v6297_v27 = vpop.permute.xlu1 %1163  ;;  %v6367_v24 = vpop.permute.xlu0 %1188  ;;  %v1886_v12 = vadd.f32 %v1885_v52, %v1884_v1  ;;  %v1897_v52 = vsel %vm1879_vm1, %v1760_v33, 0.0  ;;  %v8782_v33 = vld [vmem:[#allocation49_spill] sm:$0xff] }
 0x420   : > { %v1761_v1 = vmul.f32 %v6297_v27, %v6400_v21  ;;  %v6424_v27 = vld [vmem:[%s8669_s1 + $0x60] sm:$0xff] }
 0x421   : > { %v1888_v25 = vadd.f32 %v1887_v10, %v1886_v12 }
 0x422   : > { %v1899_v43 = vsel %vm1879_vm1, %v1761_v1, 0.0 }
 0x423   : > { %1418 = vperm.xlu0 %4885, %v1012_v26   ;;  %1423 = vperm.xlu1 %4886, %v1013_v55   ;;  %v6316_v39 = vpop.permute.xlu1 %1173  ;;  %v1758_v26 = vmul.f32 %v6282_v19, %v6362_v0  ;;  %v1890_v50 = vadd.f32 %v1889_v11, %v1888_v25  ;;  %v6385_v40 = vpop.permute.xlu0 %1198  ;;  %v8772_v19 = vld [vmem:[#allocation26_spill] sm:$0xff] }
 0x424   : > { %v1026_v41 = vmul.f32 0.015625, %v8772_v19  ;;  %v1763_v25 = vmul.f32 %v6316_v39, %v6424_v27  ;;  %v8781_v19 = vld [vmem:[#allocation50_spill] sm:$0xff] }
 0x425   : > { %v6450_v39 = vld [vmem:[%s8669_s1 + $0x70] sm:$0xff] }
 0x427   : > { %1428 = vperm.xlu0 %4885, %v1014_v59   ;;  %1433 = vperm.xlu1 %4886, %v1015_v56   ;;  %v6347_v62 = vpop.permute.xlu1 %1183  ;;  %v1024_v56 = vmul.f32 0.015625, %v8770_v60  ;;  %v1025_v59 = vmul.f32 0.015625, %v8771_v57  ;;  %v6406_v2 = vpop.permute.xlu0 %1208 }
 0x42b   : > { %1438 = vperm.xlu0 %4885, %v1016_v45   ;;  %1443 = vperm.xlu1 %4886, %v1017_v42   ;;  %v6377_v55 = vpop.permute.xlu1 %1193  ;;  %v1759_v45 = vmul.f32 %v6285_v63, %v6372_v18  ;;  %v1893_v42 = vsel %vm1879_vm1, %v1758_v26, 0.0  ;;  %v6428_v11 = vpop.permute.xlu0 %1218  ;;  %v8778_v26 = vld [vmem:[#allocation40_spill] sm:$0xff] }
 0x42c   : > { %v1032_v60 = vmul.f32 0.015625, %v8778_v26 }
 0x42d   : > { %v1895_v35 = vsel %vm1879_vm1, %v1759_v45, 0.0 }
 0x42f   : > { %1448 = vperm.xlu0 %4885, %v1018_v5   ;;  %1453 = vperm.xlu1 %4886, %v1019_v14   ;;  %v1027_v5 = vmul.f32 0.015625, %v8773_v44  ;;  %v1892_v14 = vadd.f32 %v1891_v61, %v1890_v50  ;;  %v6395_v63 = vpop.permute.xlu1 %1203  ;;  %v8780_v50 = vld [vmem:[#allocation42_spill] sm:$0xff] }
 0x431   : > { %v1894_v6 = vadd.f32 %v1893_v42, %v1892_v14  ;;  %v1034_v42 = vmul.f32 0.015625, %v8780_v50  ;;  %v6445_v14 = vpop.permute.xlu0 %1228 }
 0x433   : > { %1458 = vperm.xlu0 %4885, %v1020_v31   ;;  %1463 = vperm.xlu1 %4886, %v1021_v30   ;;  %v1028_v31 = vmul.f32 0.015625, %v8774_v34  ;;  %v1029_v30 = vmul.f32 0.015625, %v8775_v53  ;;  %v1896_v49 = vadd.f32 %v1895_v35, %v1894_v6  ;;  %v6411_v3 = vpop.permute.xlu1 %1213  ;;  %v1036_v34 = vmul.f32 0.015625, %v8782_v33 }
 0x435   : > { %v1898_v10 = vadd.f32 %v1897_v52, %v1896_v49  ;;  %v1765_v49 = vmul.f32 %v6347_v62, %v6450_v39  ;;  %v6461_v52 = vpop.permute.xlu0 %1238  ;;  %v6476_v62 = vld [vmem:[%s8669_s1 + $0x80] sm:$0xff] }
 0x437   : > { %1468 = vperm.xlu0 %4885, %v1022_v51   ;;  %1473 = vperm.xlu1 %4886, %v1023_v58   ;;  %v1030_v51 = vmul.f32 0.015625, %v8776_v54  ;;  %v6418_v58 = vld [vmem:[%s8669_s1 + $0x58] sm:$0xff]  ;;  %v6434_v61 = vpop.permute.xlu1 %1223 }
 0x438   : > { %v1762_v12 = vmul.f32 %v6308_v13, %v6418_v58  ;;  %v1035_v13 = vmul.f32 0.015625, %v8781_v19  ;;  %v8784_v54 = vld [vmem:[#allocation51_spill] sm:$0xff] }
 0x439   : > { %v6484_v50 = vpop.permute.xlu0 %1248 }
 0x43a   : > { %v1901_v45 = vsel %vm1879_vm1, %v1762_v12, 0.0 }
 0x43b   : > { %1478 = vperm.xlu0 %4885, %v1024_v56   ;;  %1483 = vperm.xlu1 %4886, %v1025_v59   ;;  %v8779_v56 = vld [vmem:[#allocation43_spill] sm:$0xff]  ;;  %v1900_v59 = vadd.f32 %v1899_v43, %v1898_v10  ;;  %v6454_v6 = vpop.permute.xlu1 %1233  ;;  %v1907_v43 = vsel %vm1879_vm1, %v1765_v49, 0.0 }
 0x43c   : > { %v1033_v57 = vmul.f32 0.015625, %v8779_v56 }
 0x43d   : > { %v1902_v44 = vadd.f32 %v1901_v45, %v1900_v59  ;;  %v1767_v45 = vmul.f32 %v6377_v55, %v6476_v62 }
 0x43f   : > { %1488 = vperm.xlu0 %4885, %v1026_v41   ;;  %1493 = vperm.xlu1 %4886, %v1027_v5   ;;  %v6442_v41 = vld [vmem:[%s8669_s1 + $0x68] sm:$0xff]  ;;  %v1903_v5 = vsel %vm1879_vm1, %v1763_v25, 0.0  ;;  %v6471_v12 = vpop.permute.xlu1 %1243  ;;  %v1911_v55 = vsel %vm1879_vm1, %v1767_v45, 0.0 }
 0x440   : > { %v1764_v35 = vmul.f32 %v6335_v23, %v6442_v41  ;;  %v1039_v23 = vmul.f32 0.015625, %v8785_v17 }
 0x442   : > { %v1905_v1 = vsel %vm1879_vm1, %v1764_v35, 0.0 }
 0x443   : > { %1498 = vperm.xlu0 %4885, %v1028_v31   ;;  %1503 = vperm.xlu1 %4886, %v1029_v30   ;;  %v8783_v31 = vld [vmem:[#allocation52_spill] sm:$0xff]  ;;  %v1904_v30 = vadd.f32 %v1903_v5, %v1902_v44  ;;  %v6494_v5 = vld [vmem:[%s8669_s1 + $0x88] sm:$0xff] }
 0x444   : > { %v1037_v53 = vmul.f32 0.015625, %v8783_v31  ;;  %v6504_v31 = vld [vmem:[%s8669_s1 + $0x90] sm:$0xff] }
 0x445   : > { %v1906_v10 = vadd.f32 %v1905_v1, %v1904_v30  ;;  %v1045_v30 = vmul.f32 0.015625, %v6262_v29  ;;  %v1769_v1 = vmul.f32 %v6395_v63, %v6504_v31 }
 0x447   : > { %1508 = vperm.xlu0 %4885, %v1030_v51   ;;  %1513 = vperm.xlu1 %4886, %v1031_v28   ;;  %v1038_v51 = vmul.f32 0.015625, %v8784_v54  ;;  %v6468_v28 = vld [vmem:[%s8669_s1 + $0x78] sm:$0xff]  ;;  %v1908_v25 = vadd.f32 %v1907_v43, %v1906_v10  ;;  %v1046_v43 = vmul.f32 0.015625, %v6238_v36  ;;  %v1915_v63 = vsel %vm1879_vm1, %v1769_v1, 0.0 }
 0x448   : > { %8786 = vst [vmem:[#allocation48_spill] sm:$0xff] %v6468_v28  ;;  %v1766_v26 = vmul.f32 %v6367_v24, %v6468_v28  ;;  %v1043_v24 = vmul.f32 0.015625, %v6256_v16  ;;  %v1768_v16 = vmul.f32 %v6385_v40, %v6494_v5 }
 0x44a   : > { %v1909_v19 = vsel %vm1879_vm1, %v1766_v26, 0.0  ;;  %v1913_v17 = vsel %vm1879_vm1, %v1768_v16, 0.0 }
 0x44b   : > { %1518 = vperm.xlu0 %4885, %v1032_v60   ;;  %1523 = vperm.xlu1 %4886, %v1033_v57   ;;  %v8787_v60 = vld [vmem:[#allocation61_spill] sm:$0xff]  ;;  %v8788_v57 = vld [vmem:[#allocation64_spill] sm:$0xff]  ;;  %v1910_v35 = vadd.f32 %v1909_v19, %v1908_v25  ;;  %v8792_v19 = vld [vmem:[#allocation15_spill] sm:$0xff] }
 0x44c   : > { %v1040_v56 = vmul.f32 0.015625, %v8787_v60  ;;  %v1041_v59 = vmul.f32 0.015625, %v8788_v57 }
 0x44d   : > { %v1912_v49 = vadd.f32 %v1911_v55, %v1910_v35 }
 0x44f   : > { %1528 = vperm.xlu0 %4885, %v1034_v42   ;;  %1533 = vperm.xlu1 %4886, %v1035_v13   ;;  %v8789_v13 = vld [vmem:[#allocation63_spill] sm:$0xff]  ;;  %v1914_v29 = vadd.f32 %v1913_v17, %v1912_v49 }
 0x450   : > { %v1042_v44 = vmul.f32 0.015625, %v8789_v13  ;;  %v1049_v13 = vmul.f32 0.015625, %v8792_v19 }
 0x453   : > { %1538 = vperm.xlu0 %4885, %v1036_v34   ;;  %1543 = vperm.xlu1 %4886, %v1037_v53   ;;  %v1044_v53 = vmul.f32 0.015625, %v6234_v37  ;;  %v6520_v37 = vld [vmem:[%s8669_s1 + $0x98] sm:$0xff] }
 0x454   : > { %v1770_v45 = vmul.f32 %v6406_v2, %v6520_v37 }
 0x456   : > { %v1917_v2 = vsel %vm1879_vm1, %v1770_v45, 0.0 }
 0x457   : > { %1548 = vperm.xlu0 %4885, %v1038_v51   ;;  %1553 = vperm.xlu1 %4886, %v1039_v23   ;;  %v8790_v23 = vld [vmem:[#allocation13_spill] sm:$0xff] }
 0x458   : > { %v1047_v10 = vmul.f32 0.015625, %v8790_v23  ;;  %v8793_v23 = vld [vmem:[#allocation14_spill] sm:$0xff] }
 0x459   : > { %v6497_v33 = vpop.permute.xlu0 %1258 }
 0x45a   : > { %v6486_v42 = vpop.permute.xlu1 %1253 }
 0x45b   : > { %1558 = vperm.xlu0 %4885, %v1040_v56   ;;  %1563 = vperm.xlu1 %4886, %v1041_v59   ;;  %v6527_v56 = vld [vmem:[%s8669_s1 + $0xa0] sm:$0xff] }
 0x45c   : > { %v8791_v59 = vld [vmem:[#allocation12_spill] sm:$0xff]  ;;  %v1771_v55 = vmul.f32 %v6411_v3, %v6527_v56  ;;  %v6548_v3 = vld [vmem:[%s8669_s1 + $0xa8] sm:$0xff] }
 0x45d   : > { %v1048_v25 = vmul.f32 0.015625, %v8791_v59  ;;  %v6555_v59 = vld [vmem:[%s8669_s1 + $0xb0] sm:$0xff]  ;;  %v1772_v19 = vmul.f32 %v6428_v11, %v6548_v3 }
 0x45e   : > { %v6499_v34 = vpop.permute.xlu1 %1263 }
 0x45f   : > { %1568 = vperm.xlu0 %4885, %v1042_v44   ;;  %1573 = vperm.xlu1 %4886, %v1043_v24   ;;  %v1916_v44 = vadd.f32 %v1915_v63, %v1914_v29  ;;  %v1921_v11 = vsel %vm1879_vm1, %v1772_v19, 0.0 }
 0x462   : > { %v1274_v54 = vpop.permute.xlu1 %1273  ;;  %v6512_v51 = vpop.permute.xlu0 %1268 }
 0x463   : > { %1578 = vperm.xlu0 %4885, %v1044_v53   ;;  %1583 = vperm.xlu1 %4886, %v1045_v30   ;;  %v1783_v40 = vmul.f32 %v1274_v54, %v6295_v15 }
 0x465   : > { %v1949_v24 = vsel %vm1879_vm1, %v1783_v40, 0.0  ;;  %v1918_v40 = vadd.f32 %v1917_v2, %v1916_v44 }
 0x466   : > { %v1284_v26 = vpop.permute.xlu1 %1283  ;;  %v1279_v60 = vpop.permute.xlu0 %1278 }
 0x467   : > { %v1785_v57 = vmul.f32 %v1284_v26, %v6313_v47  ;;  %v1784_v36 = vmul.f32 %v1279_v60, %v6302_v8  ;;  %1588 = vperm.xlu0 %4885, %v1046_v43   ;;  %1593 = vperm.xlu1 %4886, %v1047_v10   ;;  %v1050_v10 = vmul.f32 0.015625, %v8793_v23  ;;  %v8794_v43 = vld [vmem:[#allocation21_spill] sm:$0xff]  ;;  %v1919_v26 = vsel %vm1879_vm1, %v1771_v55, 0.0  ;;  %v8796_v55 = vld [vmem:[#allocation23_spill] sm:$0xff] }
 0x468   : > { %v1051_v29 = vmul.f32 0.015625, %v8794_v43 }
 0x469   : > { %v1950_v35 = vsel %vm1879_vm1, %v1784_v36, 0.0  ;;  %v1952_v49 = vsel %vm1879_vm1, %v1785_v57, 0.0 }
 0x46a   : > { %v1951_v16 = vadd.f32 %v1950_v35, %v1949_v24  ;;  %v1294_v53 = vpop.permute.xlu1 %1293  ;;  %v1289_v30 = vpop.permute.xlu0 %1288  ;;  %v8795_v24 = vld [vmem:[#allocation20_spill] sm:$0xff] }
 0x46b   : > { %v1787_v1 = vmul.f32 %v1294_v53, %v6331_v32  ;;  %v1786_v54 = vmul.f32 %v1289_v30, %v6323_v7  ;;  %1598 = vperm.xlu0 %4885, %v1048_v25   ;;  %1603 = vperm.xlu1 %4886, %v1049_v13   ;;  %v1052_v35 = vmul.f32 0.015625, %v8795_v24  ;;  %v1920_v53 = vadd.f32 %v1919_v26, %v1918_v40 }
 0x46c   : > { %v1953_v17 = vadd.f32 %v1952_v49, %v1951_v16  ;;  %v1053_v16 = vmul.f32 0.015625, %v8796_v55  ;;  %v1773_v49 = vmul.f32 %v6434_v61, %v6555_v59 }
 0x46d   : > { %v1954_v63 = vsel %vm1879_vm1, %v1786_v54, 0.0  ;;  %v1956_v25 = vsel %vm1879_vm1, %v1787_v1, 0.0  ;;  %v1922_v61 = vadd.f32 %v1921_v11, %v1920_v53 }
 0x46e   : > { %v1955_v60 = vadd.f32 %v1954_v63, %v1953_v17  ;;  %v1304_v57 = vpop.permute.xlu1 %1303  ;;  %v1299_v36 = vpop.permute.xlu0 %1298  ;;  %v6575_v63 = vld [vmem:[%s8669_s1 + $0xb8] sm:$0xff] }
 0x46f   : > { %v1788_v45 = vmul.f32 %v1299_v36, %v6342_v20  ;;  %1613 = vperm.xlu1 %4886, %v1051_v29   ;;  %1608 = vperm.xlu0 %4885, %v1050_v10   ;;  %v1789_v13 = vmul.f32 %v1304_v57, %v6352_v22  ;;  %v8797_v10 = vld [vmem:[#allocation22_spill] sm:$0xff]  ;;  %v8798_v29 = vld [vmem:[#allocation29_spill] sm:$0xff]  ;;  %v1774_v19 = vmul.f32 %v6445_v14, %v6575_v63 }
 0x470   : > { %v1957_v44 = vadd.f32 %v1956_v25, %v1955_v60  ;;  %v1054_v43 = vmul.f32 0.015625, %v8797_v10  ;;  %v1055_v40 = vmul.f32 0.015625, %v8798_v29  ;;  %v1923_v60 = vsel %vm1879_vm1, %v1773_v49, 0.0 }
 0x471   : > { %v1958_v30 = vsel %vm1879_vm1, %v1788_v45, 0.0  ;;  %v1960_v23 = vsel %vm1879_vm1, %v1789_v13, 0.0  ;;  %v6582_v45 = vld [vmem:[%s8669_s1 + $0xc0] sm:$0xff] }
 0x472   : > { %v1959_v1 = vadd.f32 %v1958_v30, %v1957_v44  ;;  %v1314_v54 = vpop.permute.xlu1 %1313  ;;  %v1309_v2 = vpop.permute.xlu0 %1308  ;;  %v8799_v44 = vld [vmem:[#allocation28_spill] sm:$0xff]  ;;  %v1775_v30 = vmul.f32 %v6454_v6, %v6582_v45 }
 0x473   : > { %v1790_v17 = vmul.f32 %v1309_v2, %v6362_v0  ;;  %1623 = vperm.xlu1 %4886, %v1053_v16   ;;  %1618 = vperm.xlu0 %4885, %v1052_v35   ;;  %v1791_v13 = vmul.f32 %v1314_v54, %v6372_v18  ;;  %v1056_v24 = vmul.f32 0.015625, %v8799_v44  ;;  %v8800_v35 = vld [vmem:[#allocation31_spill] sm:$0xff]  ;;  %v1924_v16 = vadd.f32 %v1923_v60, %v1922_v61  ;;  %v8801_v54 = vld [vmem:[#allocation30_spill] sm:$0xff] }
 0x474   : > { %v1961_v26 = vadd.f32 %v1960_v23, %v1959_v1  ;;  %v1057_v55 = vmul.f32 0.015625, %v8800_v35  ;;  %v1058_v11 = vmul.f32 0.015625, %v8801_v54  ;;  %v8802_v23 = vld [vmem:[#allocation37_spill] sm:$0xff] }
 0x475   : > { %v1962_v57 = vsel %vm1879_vm1, %v1790_v17, 0.0  ;;  %v1925_v17 = vsel %vm1879_vm1, %v1774_v19, 0.0  ;;  %v1964_v14 = vsel %vm1879_vm1, %v1791_v13, 0.0  ;;  %v1059_v10 = vmul.f32 0.015625, %v8802_v23  ;;  %v8803_v13 = vld [vmem:[#allocation36_spill] sm:$0xff] }
 0x476   : > { %v1324_v36 = vpop.permute.xlu1 %1323  ;;  %v1319_v25 = vpop.permute.xlu0 %1318  ;;  %v1963_v53 = vadd.f32 %v1962_v57, %v1961_v26  ;;  %v1926_v6 = vadd.f32 %v1925_v17, %v1924_v16  ;;  %v6606_v57 = vld [vmem:[%s8669_s1 + $0xd0] sm:$0xff]  ;;  %v1060_v44 = vmul.f32 0.015625, %v8803_v13 }
 0x477   : > { %1633 = vperm.xlu1 %4886, %v1055_v40   ;;  %1628 = vperm.xlu0 %4885, %v1054_v43   ;;  %v1792_v49 = vmul.f32 %v1319_v25, %v6392_v46  ;;  %v6599_v43 = vld [vmem:[%s8669_s1 + $0xc8] sm:$0xff]  ;;  %v1927_v40 = vsel %vm1879_vm1, %v1775_v30, 0.0  ;;  %v1793_v19 = vmul.f32 %v1324_v36, %v6400_v21 }
 0x478   : > { %v1965_v29 = vadd.f32 %v1964_v14, %v1963_v53  ;;  %v1776_v25 = vmul.f32 %v6461_v52, %v6599_v43  ;;  %v1777_v53 = vmul.f32 %v6471_v12, %v6606_v57  ;;  %v8805_v14 = vld [vmem:[#allocation38_spill] sm:$0xff] }
 0x479   : > { %v1966_v61 = vsel %vm1879_vm1, %v1792_v49, 0.0  ;;  %v1968_v36 = vsel %vm1879_vm1, %v1793_v19, 0.0  ;;  %v1062_v54 = vmul.f32 0.015625, %v8805_v14 }
 0x47a   : > { %v1334_v1 = vpop.permute.xlu1 %1333  ;;  %v1329_v2 = vpop.permute.xlu0 %1328  ;;  %v1967_v16 = vadd.f32 %v1966_v61, %v1965_v29  ;;  %v1929_v52 = vsel %vm1879_vm1, %v1776_v25, 0.0  ;;  %v1931_v29 = vsel %vm1879_vm1, %v1777_v53, 0.0 }
 0x47b   : > { %1643 = vperm.xlu1 %4886, %v1057_v55   ;;  %1638 = vperm.xlu0 %4885, %v1056_v24   ;;  %v8804_v24 = vld [vmem:[#allocation39_spill] sm:$0xff]  ;;  %v1928_v55 = vadd.f32 %v1927_v40, %v1926_v6  ;;  %v1794_v30 = vmul.f32 %v1329_v2, %v6418_v58  ;;  %v6630_v2 = vld [vmem:[%s8669_s1 + $0xe0] sm:$0xff] }
 0x47c   : > { %v1061_v35 = vmul.f32 0.015625, %v8804_v24  ;;  %v1969_v6 = vadd.f32 %v1968_v36, %v1967_v16  ;;  %v1779_v13 = vmul.f32 %v6486_v42, %v6630_v2  ;;  %v8807_v24 = vld [vmem:[#allocation44_spill] sm:$0xff] }
 0x47d   : > { %v1930_v12 = vadd.f32 %v1929_v52, %v1928_v55  ;;  %v1970_v40 = vsel %vm1879_vm1, %v1794_v30, 0.0  ;;  %v8808_v55 = vld [vmem:[#allocation47_spill] sm:$0xff] }
 0x47e   : > { %v1344_v26 = vpop.permute.xlu1 %1343  ;;  %v1339_v60 = vpop.permute.xlu0 %1338  ;;  %v1065_v16 = vmul.f32 0.015625, %v8808_v55  ;;  %v1971_v52 = vadd.f32 %v1970_v40, %v1969_v6  ;;  %v6673_v55 = vld [vmem:[%s8669_s1 + $0xf8] sm:$0xff] }
 0x47f   : > { %1653 = vperm.xlu1 %4886, %v1059_v10   ;;  %1648 = vperm.xlu0 %4885, %v1058_v11   ;;  %v8806_v11 = vld [vmem:[#allocation45_spill] sm:$0xff]  ;;  %v6625_v10 = vld [vmem:[%s8669_s1 + $0xd8] sm:$0xff]  ;;  %v1932_v53 = vadd.f32 %v1931_v29, %v1930_v12  ;;  %v1796_v30 = vmul.f32 %v1339_v60, %v6442_v41  ;;  %v8810_v60 = vld [vmem:[#allocation54_spill] sm:$0xff]  ;;  %8811 = vst [vmem:[#allocation58_spill] sm:$0xff] %v6673_v55 }
 0x480   : > { %v1063_v23 = vmul.f32 0.015625, %v8806_v11  ;;  %v1778_v19 = vmul.f32 %v6484_v50, %v6625_v10  ;;  %v6651_v50 = vld [vmem:[%s8669_s1 + $0xe8] sm:$0xff]  ;;  %v8809_v11 = vld [vmem:[#allocation46_spill] sm:$0xff]  ;;  %v1067_v12 = vmul.f32 0.015625, %v8810_v60 }
 0x481   : > { %v6661_v29 = vld [vmem:[%s8669_s1 + $0xf0] sm:$0xff] }
 0x482   : > { %v6616_v49 = vpop.permute.xlu1 %1353  ;;  %v1349_v17 = vpop.permute.xlu0 %1348  ;;  %v1933_v42 = vsel %vm1879_vm1, %v1778_v19, 0.0  ;;  %v1974_v19 = vsel %vm1879_vm1, %v1796_v30, 0.0  ;;  %v8813_v30 = vld [vmem:[#allocation56_spill] sm:$0xff] }
 0x483   : > { %1663 = vperm.xlu1 %4886, %v1061_v35   ;;  %1658 = vperm.xlu0 %4885, %v1060_v44   ;;  %v1795_v44 = vmul.f32 %v1334_v1, %v6424_v27  ;;  %v1064_v35 = vmul.f32 0.015625, %v8807_v24  ;;  %v1935_v1 = vsel %vm1879_vm1, %v1779_v13, 0.0  ;;  %v1934_v6 = vadd.f32 %v1933_v42, %v1932_v53 }
 0x484   : > { %v1780_v24 = vmul.f32 %v6497_v33, %v6651_v50  ;;  %v1797_v53 = vmul.f32 %v1344_v26, %v6450_v39  ;;  %v8812_v33 = vld [vmem:[#allocation53_spill] sm:$0xff]  ;;  %v1069_v42 = vmul.f32 0.015625, %v8813_v30  ;;  %v1798_v60 = vmul.f32 %v1349_v17, %v6468_v28 }
 0x486   : > { %v6634_v61 = vpop.permute.xlu1 %1363  ;;  %v1359_v25 = vpop.permute.xlu0 %1358  ;;  %v1976_v26 = vsel %vm1879_vm1, %v1797_v53, 0.0  ;;  %v1978_v17 = vsel %vm1879_vm1, %v1798_v60, 0.0  ;;  %v8816_v53 = vld [vmem:[#allocation65_spill] sm:$0xff] }
 0x487   : > { %1673 = vperm.xlu1 %4886, %v1063_v23   ;;  %1668 = vperm.xlu0 %4885, %v1062_v54   ;;  %v1972_v54 = vsel %vm1879_vm1, %v1795_v44, 0.0  ;;  %v1066_v23 = vmul.f32 0.015625, %v8809_v11  ;;  %v1936_v44 = vadd.f32 %v1935_v1, %v1934_v6  ;;  %v1937_v11 = vsel %vm1879_vm1, %v1780_v24, 0.0 }
 0x488   : > { %v1973_v40 = vadd.f32 %v1972_v54, %v1971_v52  ;;  %v1068_v52 = vmul.f32 0.015625, %v8812_v33  ;;  %v1782_v1 = vmul.f32 %v6512_v51, %v6673_v55  ;;  %v8814_v33 = vld [vmem:[#allocation55_spill] sm:$0xff] }
 0x48a   : > { %v6644_v36 = vpop.permute.xlu1 %1373  ;;  %v6646_v14 = vpop.permute.xlu0 %1368  ;;  %v1975_v54 = vadd.f32 %v1974_v19, %v1973_v40  ;;  %v1070_v40 = vmul.f32 0.015625, %v8814_v33  ;;  %v8815_v19 = vld [vmem:[#allocation66_spill] sm:$0xff]  ;;  %v1941_v51 = vsel %vm1879_vm1, %v1782_v1, 0.0  ;;  %v1800_v1 = vmul.f32 %v1359_v25, %v6494_v5 }
 0x48b   : > { %1683 = vperm.xlu1 %4886, %v1065_v16   ;;  %1678 = vperm.xlu0 %4885, %v1064_v35   ;;  %v1781_v16 = vmul.f32 %v6499_v34, %v6661_v29  ;;  %v1071_v24 = vmul.f32 0.015625, %v8815_v19  ;;  %v1801_v25 = vmul.f32 %v6634_v61, %v6504_v31 }
 0x48c   : > { %v1977_v30 = vadd.f32 %v1976_v26, %v1975_v54 }
 0x48d   : > { %v1939_v34 = vsel %vm1879_vm1, %v1781_v16, 0.0  ;;  %v1799_v16 = vmul.f32 %v6616_v49, %v6476_v62  ;;  %v1075_v49 = vmul.f32 0.015625, %v6272_v48  ;;  %v1802_v48 = vmul.f32 %v6646_v14, %v6520_v37 }
 0x48e   : > { %v6666_v35 = vpop.permute.xlu1 %1383  ;;  %v6668_v13 = vpop.permute.xlu0 %1378  ;;  %v1979_v54 = vadd.f32 %v1978_v17, %v1977_v30  ;;  %v1076_v17 = vmul.f32 0.015625, %v6242_v38 }
 0x48f   : > { %1693 = vperm.xlu1 %4886, %v1067_v12   ;;  %1688 = vperm.xlu0 %4885, %v1066_v23   ;;  %v1938_v12 = vadd.f32 %v1937_v11, %v1936_v44 }
 0x491   : > { %v1940_v44 = vadd.f32 %v1939_v34, %v1938_v12  ;;  %v1980_v12 = vsel %vm1879_vm1, %v1799_v16, 0.0  ;;  %v8818_v34 = vld [vmem:[#allocation67_spill] sm:$0xff] }
 0x492   : > { %v6684_v6 = vpop.permute.xlu1 %1393  ;;  %v6686_v23 = vpop.permute.xlu0 %1388 }
 0x493   : > { %1703 = vperm.xlu1 %4886, %v1069_v42   ;;  %1698 = vperm.xlu0 %4885, %v1068_v52   ;;  %v1072_v52 = vmul.f32 0.015625, %v8816_v53  ;;  %v8817_v42 = vld [vmem:[#allocation68_spill] sm:$0xff]  ;;  %v1942_v33 = vadd.f32 %v1941_v51, %v1940_v44  ;;  %v1982_v53 = vsel %vm1879_vm1, %v1800_v1, 0.0  ;;  %v1077_v44 = vmul.f32 0.015625, %v6278_v9 }
 0x494   : > { %v1073_v11 = vmul.f32 0.015625, %v8817_v42  ;;  %v1078_v1 = vmul.f32 0.015625, %v6246_v4  ;;  %v1986_v9 = vsel %vm1879_vm1, %v1802_v48, 0.0 }
 0x495   : > { %v1943_v19 = vrot.slane %v1942_v33, 4 }
 0x496   : > { %v6694_v28 = vpop.permute.xlu1 %1403  ;;  %v6696_v55 = vpop.permute.xlu0 %1398 }
 0x497   : > { %1713 = vperm.xlu1 %4886, %v1071_v24   ;;  %1708 = vperm.xlu0 %4885, %v1070_v40   ;;  %v1074_v40 = vmul.f32 0.015625, %v8818_v34  ;;  %v1981_v24 = vadd.f32 %v1980_v12, %v1979_v54  ;;  %v1944_v16 = vadd.f32 %v1943_v19, %v1942_v33  ;;  %v1984_v54 = vsel %vm1879_vm1, %v1801_v25, 0.0 }
 0x499   : > { %v1945_v12 = vrot.slane %v1944_v16, 2 }
 0x49a   : > { %v6703_v26 = vpop.permute.xlu1 %1413  ;;  %v6705_v60 = vpop.permute.xlu0 %1408 }
 0x49b   : > { %1723 = vperm.xlu1 %4886, %v1073_v11   ;;  %1718 = vperm.xlu0 %4885, %v1072_v52   ;;  %v1983_v52 = vadd.f32 %v1982_v53, %v1981_v24  ;;  %v1946_v19 = vadd.f32 %v1945_v12, %v1944_v16 }
 0x49d   : > { %v1985_v61 = vadd.f32 %v1984_v54, %v1983_v52  ;;  %v1947_v48 = vrot.slane %v1946_v19, 1 }
 0x49e   : > { %v6711_v51 = vpop.permute.xlu1 %1423  ;;  %v6713_v30 = vpop.permute.xlu0 %1418 }
 0x49f   : > { %1733 = vperm.xlu1 %4886, %v1075_v49   ;;  %1728 = vperm.xlu0 %4885, %v1074_v40   ;;  %v1803_v49 = vmul.f32 %v6644_v36, %v6527_v56  ;;  %v1987_v24 = vadd.f32 %v1986_v9, %v1985_v61 }
 0x4a1   : > { %v1988_v36 = vsel %vm1879_vm1, %v1803_v49, 0.0 }
 0x4a2   : > { %v1434_v42 = vpop.permute.xlu1 %1433  ;;  %v6721_v11 = vpop.permute.xlu0 %1428 }
 0x4a3   : > { %1743 = vperm.xlu1 %4886, %v1077_v44   ;;  %1738 = vperm.xlu0 %4885, %v1076_v17   ;;  %v1815_v38 = vmul.f32 %v1434_v42, %v6295_v15  ;;  %v1804_v15 = vmul.f32 %v6668_v13, %v6548_v3  ;;  %v1989_v42 = vadd.f32 %v1988_v36, %v1987_v24  ;;  %v6750_v24 = vld [vmem:[%s8670_s2] sm:$0x1] }
 0x4a5   : > { %v2018_v4 = vsel %vm1879_vm1, %v1815_v38, 0.0 }
 0x4a6   : > { %v1444_v33 = vpop.permute.xlu1 %1443  ;;  %v1439_v34 = vpop.permute.xlu0 %1438 }
 0x4a7   : > { %v1817_v40 = vmul.f32 %v1444_v33, %v6313_v47  ;;  %v1816_v14 = vmul.f32 %v1439_v34, %v6302_v8  ;;  %1748 = vperm.xlu0 %4885, %v1078_v1   ;;  %v1990_v1 = vsel %vm1879_vm1, %v1804_v15, 0.0  ;;  %v2197_v34 = vlaneseq }
 0x4a9   : > { %v2019_v53 = vsel %vm1879_vm1, %v1816_v14, 0.0  ;;  %v2021_v47 = vsel %vm1879_vm1, %v1817_v40, 0.0  ;;  %v1948_v40 = vadd.f32 %v1947_v48, %v1946_v19  ;;  %v1991_v14 = vadd.f32 %v1990_v1, %v1989_v42 }
 0x4aa   : > { %v2020_v25 = vadd.f32 %v2019_v53, %v2018_v4  ;;  %v1454_v17 = vpop.permute.xlu1 %1453  ;;  %v1449_v44 = vpop.permute.xlu0 %1448  ;;  %v1806_v4 = vmul.f32 %v6686_v23, %v6575_v63 }
 0x4ab   : > { %v1819_v8 = vmul.f32 %v1454_v17, %v6331_v32  ;;  %v1818_v52 = vmul.f32 %v1449_v44, %v6323_v7  ;;  %v1805_v32 = vmul.f32 %v6666_v35, %v6555_v59  ;;  %v2157_v17 = vadd.f32 %v6750_v24, %v1948_v40 }
 0x4ac   : > { %v2022_v16 = vadd.f32 %v2021_v47, %v2020_v25  ;;  %v2198_v25 = vshrl.u32 %v2197_v34, 7 }
 0x4ad   : > { %v2023_v54 = vsel %vm1879_vm1, %v1818_v52, 0.0  ;;  %v2025_v38 = vsel %vm1879_vm1, %v1819_v8, 0.0  ;;  %v1994_v8 = vsel %vm1879_vm1, %v1806_v4, 0.0  ;;  %v2161_v42 = vmax.f32 %v2157_v17, 0.0 }
 0x4ae   : > { %v2024_v12 = vadd.f32 %v2023_v54, %v2022_v16  ;;  %v1464_v13 = vpop.permute.xlu1 %1463  ;;  %v1459_v61 = vpop.permute.xlu0 %1458  ;;  %v1807_v16 = vmul.f32 %v6684_v6, %v6582_v45  ;;  %v6763_v48 = vsub.s32 0, %v2198_v25 }
 0x4af   : > { %v1820_v9 = vmul.f32 %v1459_v61, %v6342_v20  ;;  %v1821_v7 = vmul.f32 %v1464_v13, %v6352_v22  ;;  %v1992_v22 = vsel %vm1879_vm1, %v1805_v32, 0.0 }
 0x4b0   : > { %v2026_v33 = vadd.f32 %v2025_v38, %v2024_v12  ;;  %v1993_v44 = vadd.f32 %v1992_v22, %v1991_v14  ;;  %v1808_v12 = vmul.f32 %v6696_v55, %v6599_v43  ;;  %v6771_v6 = vrot.slane %v2161_v42, %v6763_v48  ;;  %v6785_v14 = vld [vmem:[%s8671_s3] sm:$0xff] }
 0x4b1   : > { %v2027_v49 = vsel %vm1879_vm1, %v1820_v9, 0.0  ;;  %v2029_v19 = vsel %vm1879_vm1, %v1821_v7, 0.0  ;;  %v1996_v9 = vsel %vm1879_vm1, %v1807_v16, 0.0 }
 0x4b2   : > { %v2028_v20 = vadd.f32 %v2027_v49, %v2026_v33  ;;  %v1474_v53 = vpop.permute.xlu1 %1473  ;;  %v1469_v15 = vpop.permute.xlu0 %1468  ;;  %v1995_v54 = vadd.f32 %v1994_v8, %v1993_v44  ;;  %v1998_v33 = vsel %vm1879_vm1, %v1808_v12, 0.0  ;;  %v1809_v49 = vmul.f32 %v6694_v28, %v6606_v57  ;;  %v6807_v28 = vld [vmem:[%s8671_s3 + $0x18] sm:$0xff]  ;;  %v6831_v12 = vld [vmem:[%s8671_s3 + $0x28] sm:$0xff] }
 0x4b3   : > { %v1822_v35 = vmul.f32 %v1469_v15, %v6362_v0  ;;  %v1823_v0 = vmul.f32 %v1474_v53, %v6372_v18  ;;  %v2213_v17 = vmul.f32 %v6771_v6, %v6785_v14 }
 0x4b4   : > { %v2030_v47 = vadd.f32 %v2029_v19, %v2028_v20  ;;  %v1997_v18 = vadd.f32 %v1996_v9, %v1995_v54  ;;  %v2216_v54 = vmul.f32 %v6771_v6, %v6807_v28 }
 0x4b5   : > { %v2031_v52 = vsel %vm1879_vm1, %v1822_v35, 0.0  ;;  %v2033_v32 = vsel %vm1879_vm1, %v1823_v0, 0.0  ;;  %v1810_v35 = vmul.f32 %v6705_v60, %v6625_v10  ;;  %v2000_v60 = vsel %vm1879_vm1, %v1809_v49, 0.0 }
 0x4b6   : > { %v1484_v36 = vpop.permute.xlu1 %1483  ;;  %v1479_v23 = vpop.permute.xlu0 %1478  ;;  %v2032_v1 = vadd.f32 %v2031_v52, %v2030_v47  ;;  %v1999_v20 = vadd.f32 %v1998_v33, %v1997_v18  ;;  %v2341_v42 = vsel %vm1879_vm1, %v2213_v17, 0.0  ;;  %v1812_v33 = vmul.f32 %v6713_v30, %v6651_v50 }
 0x4b7   : > { %v1824_v13 = vmul.f32 %v1479_v23, %v6392_v46  ;;  %v6780_v46 = vld [vmem:[%s8671_s3 + $0x8] sm:$0xff]  ;;  %v1825_v4 = vmul.f32 %v1484_v36, %v6400_v21  ;;  %v6802_v21 = vld [vmem:[%s8671_s3 + $0x10] sm:$0xff]  ;;  %v2002_v36 = vsel %vm1879_vm1, %v1810_v35, 0.0 }
 0x4b8   : > { %v2034_v7 = vadd.f32 %v2033_v32, %v2032_v1  ;;  %v2214_v15 = vmul.f32 %v6771_v6, %v6780_v46  ;;  %v2001_v44 = vadd.f32 %v2000_v60, %v1999_v20  ;;  %v2215_v52 = vmul.f32 %v6771_v6, %v6802_v21  ;;  %v6826_v1 = vld [vmem:[%s8671_s3 + $0x20] sm:$0xff] }
 0x4b9   : > { %v2035_v34 = vsel %vm1879_vm1, %v1824_v13, 0.0  ;;  %v1811_v13 = vmul.f32 %v6703_v26, %v6630_v2  ;;  %v2350_v26 = vsel %vm1879_vm1, %v2216_v54, 0.0 }
 0x4ba   : > { %v1494_v61 = vpop.permute.xlu1 %1493  ;;  %v1489_v38 = vpop.permute.xlu0 %1488  ;;  %v2036_v53 = vadd.f32 %v2035_v34, %v2034_v7  ;;  %v2344_v8 = vsel %vm1879_vm1, %v2214_v15, 0.0  ;;  %v2003_v9 = vadd.f32 %v2002_v36, %v2001_v44  ;;  %v2347_v18 = vsel %vm1879_vm1, %v2215_v52, 0.0  ;;  %v6881_v52 = vld [vmem:[%s8671_s3 + $0x48] sm:$0xff] }
 0x4bb   : > { %v1826_v22 = vmul.f32 %v1489_v38, %v6418_v58  ;;  %v2037_v58 = vsel %vm1879_vm1, %v1825_v4, 0.0  ;;  %v1827_v38 = vmul.f32 %v1494_v61, %v6424_v27  ;;  %v2217_v7 = vmul.f32 %v6771_v6, %v6826_v1  ;;  %v6852_v61 = vld [vmem:[%s8671_s3 + $0x30] sm:$0xff] }
 0x4bc   : > { %v2038_v47 = vadd.f32 %v2037_v58, %v2036_v53  ;;  %v2218_v27 = vmul.f32 %v6771_v6, %v6831_v12  ;;  %v2004_v30 = vsel %vm1879_vm1, %v1811_v13, 0.0  ;;  %v2219_v35 = vmul.f32 %v6771_v6, %v6852_v61 }
 0x4bd   : > { %v2039_v23 = vsel %vm1879_vm1, %v1826_v22, 0.0  ;;  %v2005_v20 = vadd.f32 %v2004_v30, %v2003_v9  ;;  %v2353_v15 = vsel %vm1879_vm1, %v2217_v7, 0.0  ;;  %v2006_v22 = vsel %vm1879_vm1, %v1812_v33, 0.0  ;;  %v8819_v9 = vld [vmem:[#allocation58_spill] sm:$0xff] }
 0x4be   : > { %v6775_v40 = vpop.permute.xlu1 %1503  ;;  %v1499_v55 = vpop.permute.xlu0 %1498  ;;  %v2040_v32 = vadd.f32 %v2039_v23, %v2038_v47  ;;  %v2356_v44 = vsel %vm1879_vm1, %v2218_v27, 0.0  ;;  %v1813_v36 = vmul.f32 %v6711_v51, %v6661_v29  ;;  %v2359_v13 = vsel %vm1879_vm1, %v2219_v35, 0.0 }
 0x4bf   : > { %v1828_v34 = vmul.f32 %v1499_v55, %v6442_v41  ;;  %v6857_v41 = vld [vmem:[%s8671_s3 + $0x38] sm:$0xff]  ;;  %v2041_v55 = vsel %vm1879_vm1, %v1827_v38, 0.0  ;;  %v1829_v23 = vmul.f32 %v6775_v40, %v6450_v39  ;;  %v2222_v39 = vmul.f32 %v6771_v6, %v6881_v52  ;;  %v6903_v40 = vld [vmem:[%s8671_s3 + $0x50] sm:$0xff] }
 0x4c0   : > { %v2042_v53 = vadd.f32 %v2041_v55, %v2040_v32  ;;  %v2220_v47 = vmul.f32 %v6771_v6, %v6857_v41  ;;  %v1814_v32 = vmul.f32 %v6721_v11, %v8819_v9  ;;  %v6908_v11 = vld [vmem:[%s8671_s3 + $0x58] sm:$0xff] }
 0x4c1   : > { %v2043_v17 = vsel %vm1879_vm1, %v1828_v34, 0.0 }
 0x4c2   : > { %v6795_v19 = vpop.permute.xlu1 %1513  ;;  %v1509_v25 = vpop.permute.xlu0 %1508  ;;  %v2044_v54 = vadd.f32 %v2043_v17, %v2042_v53  ;;  %v2362_v51 = vsel %vm1879_vm1, %v2220_v47, 0.0  ;;  %v2010_v53 = vsel %vm1879_vm1, %v1814_v32, 0.0  ;;  %v2368_v17 = vsel %vm1879_vm1, %v2222_v39, 0.0  ;;  %v6927_v47 = vld [vmem:[%s8671_s3 + $0x60] sm:$0xff] }
 0x4c6   : > { %v6816_v16 = vpop.permute.xlu1 %1523  ;;  %2345 = vadd.xlane.f32.xlu0 %v2344_v8  ;;  %v6818_v0 = vpop.permute.xlu0 %1518  ;;  %v6876_v8 = vld [vmem:[%s8671_s3 + $0x40] sm:$0xff] }
 0x4c7   : > { %2342 = vadd.xlane.f32.xlu1 %v2341_v42  ;;  %v2007_v42 = vadd.f32 %v2006_v22, %v2005_v20  ;;  %v2221_v38 = vmul.f32 %v6771_v6, %v6876_v8  ;;  %v2223_v20 = vmul.f32 %v6771_v6, %v6903_v40  ;;  %v1832_v32 = vmul.f32 %v6818_v0, %v6494_v5  ;;  %v6956_v5 = vld [vmem:[%s8671_s3 + $0x78] sm:$0xff] }
 0x4c9   : > { %v2365_v55 = vsel %vm1879_vm1, %v2221_v38, 0.0  ;;  %v2225_v38 = vmul.f32 %v6771_v6, %v6927_v47 }
 0x4ca   : > { %v6842_v49 = vpop.permute.xlu1 %1533  ;;  %2348 = vadd.xlane.f32.xlu0 %v2347_v18  ;;  %v6844_v4 = vpop.permute.xlu0 %1528  ;;  %v8820_v18 = vld [vmem:[#allocation48_spill] sm:$0xff] }
 0x4cb   : > { %2351 = vadd.xlane.f32.xlu1 %v2350_v26  ;;  %v1830_v7 = vmul.f32 %v1509_v25, %v8820_v18  ;;  %v2008_v25 = vsel %vm1879_vm1, %v1813_v36, 0.0  ;;  %v2045_v26 = vsel %vm1879_vm1, %v1829_v23, 0.0  ;;  %v6932_v36 = vld [vmem:[%s8671_s3 + $0x68] sm:$0xff]  ;;  %v1831_v23 = vmul.f32 %v6795_v19, %v6476_v62  ;;  %v6951_v19 = vld [vmem:[%s8671_s3 + $0x70] sm:$0xff] }
 0x4cc   : > { %v2009_v27 = vadd.f32 %v2008_v25, %v2007_v42  ;;  %v2046_v30 = vadd.f32 %v2045_v26, %v2044_v54  ;;  %v2226_v62 = vmul.f32 %v6771_v6, %v6932_v36  ;;  %v2377_v26 = vsel %vm1879_vm1, %v2225_v38, 0.0 }
 0x4cd   : > { %v2049_v0 = vsel %vm1879_vm1, %v1831_v23, 0.0  ;;  %v1833_v23 = vmul.f32 %v6816_v16, %v6504_v31 }
 0x4ce   : > { %v6866_v60 = vpop.permute.xlu1 %1543  ;;  %2354 = vadd.xlane.f32.xlu0 %v2353_v15  ;;  %v6868_v58 = vpop.permute.xlu0 %1538  ;;  %v2047_v15 = vsel %vm1879_vm1, %v1830_v7, 0.0  ;;  %v2011_v42 = vadd.f32 %v2010_v53, %v2009_v27  ;;  %v2227_v27 = vmul.f32 %v6771_v6, %v6951_v19  ;;  %v2380_v53 = vsel %vm1879_vm1, %v2226_v62, 0.0 }
 0x4cf   : > { %2357 = vadd.xlane.f32.xlu1 %v2356_v44  ;;  %v2224_v44 = vmul.f32 %v6771_v6, %v6908_v11  ;;  %v2048_v54 = vadd.f32 %v2047_v15, %v2046_v30  ;;  %v2051_v30 = vsel %vm1879_vm1, %v1832_v32, 0.0  ;;  %v2228_v15 = vmul.f32 %v6771_v6, %v6956_v5 }
 0x4d0   : > { %v2012_v39 = vrot.slane %v2011_v42, 4  ;;  %v2383_v38 = vsel %vm1879_vm1, %v2227_v27, 0.0  ;;  %v1834_v62 = vmul.f32 %v6844_v4, %v6520_v37  ;;  %v5399_v27 = vld [vmem:[%s8669_s1] sm:$0xff] }
 0x4d1   : > { %v2050_v25 = vadd.f32 %v2049_v0, %v2048_v54  ;;  %v2386_v31 = vsel %vm1879_vm1, %v2228_v15, 0.0  ;;  %v7012_v15 = vld [vmem:[%s8671_s3 + $0xa0] sm:$0xff] }
 0x4d2   : > { %v6893_v33 = vpop.permute.xlu1 %1553  ;;  %2360 = vadd.xlane.f32.xlu0 %v2359_v13  ;;  %v6895_v34 = vpop.permute.xlu0 %1548  ;;  %v2371_v13 = vsel %vm1879_vm1, %v2223_v20, 0.0  ;;  %v2013_v54 = vadd.f32 %v2012_v39, %v2011_v42  ;;  %v7000_v42 = vld [vmem:[%s8671_s3 + $0x98] sm:$0xff]  ;;  %v2053_v39 = vsel %vm1879_vm1, %v1833_v23, 0.0  ;;  %8824 = vst [vmem:[#allocation9_spill] sm:$0xff] %v7012_v15 }
 0x4d3   : > { %2363 = vadd.xlane.f32.xlu1 %v2362_v51  ;;  %v2374_v51 = vsel %vm1879_vm1, %v2224_v44, 0.0  ;;  %v6978_v44 = vld [vmem:[%s8671_s3 + $0x88] sm:$0xff]  ;;  %8823 = vst [vmem:[#allocation59_spill] sm:$0xff] %v7000_v42 }
 0x4d4   : > { %8821 = vst [vmem:[#allocation57_spill] sm:$0xff] %v6978_v44  ;;  %v2230_v16 = vmul.f32 %v6771_v6, %v6978_v44  ;;  %v2014_v4 = vrot.slane %v2013_v54, 2 }
 0x4d6   : > { %v6917_v35 = vpop.permute.xlu1 %1563  ;;  %2366 = vadd.xlane.f32.xlu0 %v2365_v55  ;;  %v6919_v22 = vpop.permute.xlu0 %1558 }
 0x4d7   : > { %2369 = vadd.xlane.f32.xlu1 %v2368_v17  ;;  %v6973_v17 = vld [vmem:[%s8671_s3 + $0x80] sm:$0xff] }
 0x4d8   : > { %v2229_v32 = vmul.f32 %v6771_v6, %v6973_v17 }
 0x4da   : > { %v6941_v18 = vpop.permute.xlu1 %1573  ;;  %2372 = vadd.xlane.f32.xlu0 %v2371_v13  ;;  %v6943_v7 = vpop.permute.xlu0 %1568  ;;  %v2052_v13 = vadd.f32 %v2051_v30, %v2050_v25 }
 0x4db   : > { %2375 = vadd.xlane.f32.xlu1 %v2374_v51  ;;  %v6988_v51 = vld [vmem:[%s8671_s3 + $0x90] sm:$0xff] }
 0x4dc   : > { %8822 = vst [vmem:[#allocation60_spill] sm:$0xff] %v6988_v51  ;;  %v2231_v37 = vmul.f32 %v6771_v6, %v6988_v51  ;;  %v2054_v25 = vadd.f32 %v2053_v39, %v2052_v13  ;;  %v2392_v51 = vsel %vm1879_vm1, %v2230_v16, 0.0  ;;  %v2232_v13 = vmul.f32 %v6771_v6, %v7000_v42  ;;  %v5401_v39 = vld [vmem:[%s8669_s1 + $0x8] sm:$0xff] }
 0x4dd   : > { %v1835_v16 = vmul.f32 %v6842_v49, %v6527_v56  ;;  %v2233_v42 = vmul.f32 %v6771_v6, %v7012_v15 }
 0x4de   : > { %v6963_v55 = vpop.permute.xlu1 %1583  ;;  %2378 = vadd.xlane.f32.xlu0 %v2377_v26  ;;  %v6965_v20 = vpop.permute.xlu0 %1578  ;;  %v2398_v15 = vsel %vm1879_vm1, %v2232_v13, 0.0 }
 0x4df   : > { %2381 = vadd.xlane.f32.xlu1 %v2380_v53  ;;  %v2389_v53 = vsel %vm1879_vm1, %v2229_v32, 0.0 }
 0x4e2   : > { %v1594_v0 = vpop.permute.xlu1 %1593  ;;  %2384 = vadd.xlane.f32.xlu0 %v2383_v38  ;;  %v6992_v26 = vpop.permute.xlu0 %1588  ;;  %v2055_v38 = vsel %vm1879_vm1, %v1834_v62, 0.0  ;;  %v7027_v62 = vld [vmem:[%s8671_s3 + $0xa8] sm:$0xff] }
 0x4e3   : > { %2387 = vadd.xlane.f32.xlu1 %v2386_v31  ;;  %v1847_v30 = vmul.f32 %v5399_v27, %v1594_v0  ;;  %v5400_v0 = vld [vmem:[%s8669_s1 + $0x10] sm:$0xff]  ;;  %8825 = vst [vmem:[#allocation8_spill] sm:$0xff] %v7027_v62 }
 0x4e5   : > { %v2087_v44 = vsel %vm1879_vm1, %v1847_v30, 0.0 }
 0x4e6   : > { %v1604_v23 = vpop.permute.xlu1 %1603  ;;  %2390 = vadd.xlane.f32.xlu0 %v2389_v53  ;;  %v1599_v31 = vpop.permute.xlu0 %1598  ;;  %v2395_v53 = vsel %vm1879_vm1, %v2231_v37, 0.0 }
 0x4e7   : > { %v1849_v32 = vmul.f32 %v5400_v0, %v1604_v23  ;;  %v1848_v27 = vmul.f32 %v5401_v39, %v1599_v31  ;;  %2393 = vadd.xlane.f32.xlu1 %v2392_v51  ;;  %v2015_v23 = vadd.f32 %v2014_v4, %v2013_v54  ;;  %v2056_v0 = vadd.f32 %v2055_v38, %v2054_v25  ;;  %v7039_v51 = vld [vmem:[%s8671_s3 + $0xb0] sm:$0xff]  ;;  %v5402_v25 = vld [vmem:[%s8669_s1 + $0x20] sm:$0xff] }
 0x4e8   : > { %v1836_v39 = vmul.f32 %v6868_v58, %v6548_v3  ;;  %v2234_v54 = vmul.f32 %v6771_v6, %v7027_v62  ;;  %v5403_v3 = vld [vmem:[%s8669_s1 + $0x18] sm:$0xff]  ;;  %v2057_v38 = vsel %vm1879_vm1, %v1835_v16, 0.0 }
 0x4e9   : > { %v2088_v31 = vsel %vm1879_vm1, %v1848_v27, 0.0  ;;  %v2090_v4 = vsel %vm1879_vm1, %v1849_v32, 0.0  ;;  %v2235_v32 = vmul.f32 %v6771_v6, %v7039_v51  ;;  %v2016_v27 = vrot.slane %v2015_v23, 1 }
 0x4ea   : > { %v2089_v56 = vadd.f32 %v2088_v31, %v2087_v44  ;;  %v1614_v49 = vpop.permute.xlu1 %1613  ;;  %2396 = vadd.xlane.f32.xlu0 %v2395_v53  ;;  %v1609_v37 = vpop.permute.xlu0 %1608  ;;  %v7056_v44 = vld [vmem:[%s8671_s3 + $0xb8] sm:$0xff]  ;;  %v2058_v53 = vadd.f32 %v2057_v38, %v2056_v0  ;;  %v2404_v62 = vsel %vm1879_vm1, %v2234_v54, 0.0  ;;  %v7079_v54 = vld [vmem:[%s8671_s3 + $0xc8] sm:$0xff] }
 0x4eb   : > { %v1851_v30 = vmul.f32 %v5402_v25, %v1614_v49  ;;  %v1850_v58 = vmul.f32 %v5403_v3, %v1609_v37  ;;  %2399 = vadd.xlane.f32.xlu1 %v2398_v15  ;;  %v2401_v49 = vsel %vm1879_vm1, %v2233_v42, 0.0  ;;  %v2059_v37 = vsel %vm1879_vm1, %v1836_v39, 0.0  ;;  %v5404_v42 = vld [vmem:[%s8669_s1 + $0x28] sm:$0xff] }
 0x4ec   : > { %v2091_v13 = vadd.f32 %v2090_v4, %v2089_v56  ;;  %v2236_v16 = vmul.f32 %v6771_v6, %v7056_v44  ;;  %v7070_v56 = vld [vmem:[%s8671_s3 + $0xc0] sm:$0xff]  ;;  %v1837_v4 = vmul.f32 %v6866_v60, %v6555_v59  ;;  %v1838_v59 = vmul.f32 %v6895_v34, %v6575_v63 }
 0x4ed   : > { %v2092_v31 = vsel %vm1879_vm1, %v1850_v58, 0.0  ;;  %v2094_v0 = vsel %vm1879_vm1, %v1851_v30, 0.0  ;;  %v5405_v58 = vld [vmem:[%s8669_s1 + $0x30] sm:$0xff] }
 0x4ee   : > { %v2093_v15 = vadd.f32 %v2092_v31, %v2091_v13  ;;  %v1624_v25 = vpop.permute.xlu1 %1623  ;;  %2402 = vadd.xlane.f32.xlu0 %v2401_v49  ;;  %v1619_v3 = vpop.permute.xlu0 %1618  ;;  %v2407_v13 = vsel %vm1879_vm1, %v2235_v32, 0.0  ;;  %v2017_v31 = vadd.f32 %v2016_v27, %v2015_v23  ;;  %v2060_v49 = vadd.f32 %v2059_v37, %v2058_v53  ;;  %v5406_v27 = vld [vmem:[%s8669_s1 + $0x38] sm:$0xff] }
 0x4ef   : > { %v1852_v39 = vmul.f32 %v5404_v42, %v1619_v3  ;;  %2405 = vadd.xlane.f32.xlu1 %v2404_v62  ;;  %v1853_v38 = vmul.f32 %v5405_v58, %v1624_v25  ;;  %v2237_v3 = vmul.f32 %v6771_v6, %v7070_v56  ;;  %v7093_v42 = vld [vmem:[%s8671_s3 + $0xd0] sm:$0xff]  ;;  %v2410_v32 = vsel %vm1879_vm1, %v2236_v16, 0.0  ;;  %v7106_v37 = vld [vmem:[%s8671_s3 + $0xd8] sm:$0xff] }
 0x4f0   : > { %v2095_v30 = vadd.f32 %v2094_v0, %v2093_v15  ;;  %v2238_v23 = vmul.f32 %v6771_v6, %v7079_v54  ;;  %v2061_v63 = vsel %vm1879_vm1, %v1837_v4, 0.0  ;;  %v2239_v25 = vmul.f32 %v6771_v6, %v7093_v42 }
 0x4f1   : > { %v2096_v62 = vsel %vm1879_vm1, %v1852_v39, 0.0  ;;  %v2098_v34 = vsel %vm1879_vm1, %v1853_v38, 0.0  ;;  %v2158_v16 = vadd.f32 %v6750_v24, %v2017_v31  ;;  %v2062_v0 = vadd.f32 %v2061_v63, %v2060_v49 }
 0x4f2   : > { %v2097_v60 = vadd.f32 %v2096_v62, %v2095_v30  ;;  %2408 = vadd.xlane.f32.xlu0 %v2407_v13  ;;  %v1629_v15 = vpop.permute.xlu0 %1628  ;;  %v1634_v39 = vpop.permute.xlu1 %1633  ;;  %v2413_v30 = vsel %vm1879_vm1, %v2237_v3, 0.0  ;;  %v7117_v13 = vld [vmem:[%s8671_s3 + $0xe0] sm:$0xff]  ;;  %v2063_v62 = vsel %vm1879_vm1, %v1838_v59, 0.0  ;;  %v2416_v38 = vsel %vm1879_vm1, %v2238_v23, 0.0  ;;  %v7127_v3 = vld [vmem:[%s8671_s3 + $0xe8] sm:$0xff] }
 0x4f3   : > { %v1854_v53 = vmul.f32 %v5406_v27, %v1629_v15  ;;  %2411 = vadd.xlane.f32.xlu1 %v2410_v32  ;;  %v2240_v31 = vmul.f32 %v6771_v6, %v7106_v37  ;;  %v5407_v59 = vld [vmem:[%s8669_s1 + $0x40] sm:$0xff]  ;;  %v2241_v32 = vmul.f32 %v6771_v6, %v7117_v13  ;;  %v2162_v23 = vmax.f32 %v2158_v16, 0.0  ;;  %v7148_v16 = vld [vmem:[%s8671_s3 + $0xf0] sm:$0xff] }
 0x4f4   : > { %v2099_v58 = vadd.f32 %v2098_v34, %v2097_v60  ;;  %v1839_v60 = vmul.f32 %v6893_v33, %v6582_v45  ;;  %v1855_v15 = vmul.f32 %v5407_v59, %v1634_v39  ;;  %v2064_v27 = vadd.f32 %v2063_v62, %v2062_v0  ;;  %v5408_v45 = vld [vmem:[%s8669_s1 + $0x48] sm:$0xff] }
 0x4f5   : > { %v2100_v4 = vsel %vm1879_vm1, %v1854_v53, 0.0  ;;  %v2419_v63 = vsel %vm1879_vm1, %v2239_v25, 0.0  ;;  %v1840_v34 = vmul.f32 %v6919_v22, %v6599_v43  ;;  %v2242_v39 = vmul.f32 %v6771_v6, %v7127_v3  ;;  %v7153_v43 = vld [vmem:[%s8671_s3 + $0xf8] sm:$0xff] }
 0x4f6   : > { %2414 = vadd.xlane.f32.xlu0 %v2413_v30  ;;  %v1639_v49 = vpop.permute.xlu0 %1638  ;;  %v2101_v53 = vadd.f32 %v2100_v4, %v2099_v58  ;;  %v2422_v30 = vsel %vm1879_vm1, %v2240_v31, 0.0  ;;  %v2065_v22 = vsel %vm1879_vm1, %v1839_v60, 0.0  ;;  %v2102_v25 = vsel %vm1879_vm1, %v1855_v15, 0.0  ;;  %v1644_v4 = vpop.permute.xlu1 %1643 }
 0x4f7   : > { %2417 = vadd.xlane.f32.xlu1 %v2416_v38  ;;  %v1856_v33 = vmul.f32 %v5408_v45, %v1639_v49  ;;  %v2425_v0 = vsel %vm1879_vm1, %v2241_v32, 0.0  ;;  %v7159_v58 = vrot.slane %v2162_v23, %v6763_v48  ;;  %v2066_v62 = vadd.f32 %v2065_v22, %v2064_v27  ;;  %v5409_v27 = vld [vmem:[%s8669_s1 + $0x50] sm:$0xff] }
 0x4f8   : > { %v2103_v38 = vadd.f32 %v2102_v25, %v2101_v53  ;;  %v2243_v31 = vmul.f32 %v6771_v6, %v7148_v16  ;;  %v2067_v49 = vsel %vm1879_vm1, %v1840_v34, 0.0  ;;  %v2428_v60 = vsel %vm1879_vm1, %v2242_v39, 0.0 }
 0x4f9   : > { %v2104_v59 = vsel %vm1879_vm1, %v1856_v33, 0.0  ;;  %v2244_v15 = vmul.f32 %v6771_v6, %v7153_v43  ;;  %v1841_v23 = vmul.f32 %v6917_v35, %v6606_v57  ;;  %v1857_v53 = vmul.f32 %v5409_v27, %v1644_v4 }
 0x4fa   : > { %2420 = vadd.xlane.f32.xlu0 %v2419_v63  ;;  %v1649_v32 = vpop.permute.xlu0 %1648  ;;  %v2068_v63 = vadd.f32 %v2067_v49, %v2066_v62  ;;  %v2105_v34 = vadd.f32 %v2104_v59, %v2103_v38  ;;  %v2431_v45 = vsel %vm1879_vm1, %v2243_v31, 0.0  ;;  %v2245_v33 = vmul.f32 %v7159_v58, %v6785_v14  ;;  %v1654_v62 = vpop.permute.xlu1 %1653 }
 0x4fb   : > { %2423 = vadd.xlane.f32.xlu1 %v2422_v30  ;;  %v1842_v6 = vmul.f32 %v6943_v7, %v6625_v10  ;;  %v5410_v30 = vld [vmem:[%s8669_s1 + $0x58] sm:$0xff]  ;;  %v2434_v35 = vsel %vm1879_vm1, %v2244_v15, 0.0  ;;  %v2246_v39 = vmul.f32 %v7159_v58, %v6780_v46  ;;  %v2069_v22 = vsel %vm1879_vm1, %v1841_v23, 0.0 }
 0x4fc   : > { %v1858_v57 = vmul.f32 %v5410_v30, %v1649_v32  ;;  %v2106_v25 = vsel %vm1879_vm1, %v1857_v53, 0.0  ;;  %v2437_v10 = vsel %vm1879_vm1, %v2245_v33, 0.0  ;;  %v2247_v7 = vmul.f32 %v7159_v58, %v6802_v21  ;;  %v5411_v32 = vld [vmem:[%s8669_s1 + $0x60] sm:$0xff]  ;;  %v5412_v33 = vld [vmem:[%s8669_s1 + $0x68] sm:$0xff] }
 0x4fd   : > { %v2107_v4 = vadd.f32 %v2106_v25, %v2105_v34  ;;  %v2071_v38 = vsel %vm1879_vm1, %v1842_v6, 0.0  ;;  %v2440_v49 = vsel %vm1879_vm1, %v2246_v39, 0.0  ;;  %v2248_v59 = vmul.f32 %v7159_v58, %v6807_v28 }
 0x4fe   : > { %2426 = vadd.xlane.f32.xlu0 %v2425_v0  ;;  %v2070_v0 = vadd.f32 %v2069_v22, %v2068_v63  ;;  %v2108_v31 = vsel %vm1879_vm1, %v1858_v57, 0.0  ;;  %v1843_v15 = vmul.f32 %v6941_v18, %v6630_v2  ;;  %v1859_v23 = vmul.f32 %v5411_v32, %v1654_v62  ;;  %v1664_v39 = vpop.permute.xlu1 %1663 }
 0x4ff   : > { %2429 = vadd.xlane.f32.xlu1 %v2428_v60  ;;  %v1659_v60 = vpop.permute.xlu0 %1658  ;;  %v2109_v53 = vadd.f32 %v2108_v31, %v2107_v4  ;;  %v2443_v63 = vsel %vm1879_vm1, %v2247_v7, 0.0  ;;  %v2249_v34 = vmul.f32 %v7159_v58, %v6826_v1  ;;  %v2446_v18 = vsel %vm1879_vm1, %v2248_v59, 0.0 }
 0x500   : > { %v2072_v27 = vadd.f32 %v2071_v38, %v2070_v0  ;;  %v1860_v2 = vmul.f32 %v5412_v33, %v1659_v60  ;;  %v2250_v6 = vmul.f32 %v7159_v58, %v6831_v12  ;;  %v2073_v30 = vsel %vm1879_vm1, %v1843_v15, 0.0  ;;  %v5413_v38 = vld [vmem:[%s8669_s1 + $0x70] sm:$0xff] }
 0x501   : > { %v2110_v57 = vsel %vm1879_vm1, %v1859_v23, 0.0  ;;  %v2252_v4 = vmul.f32 %v7159_v58, %v6857_v41  ;;  %v1845_v7 = vmul.f32 %v6963_v55, %v6661_v29  ;;  %v1861_v31 = vmul.f32 %v5413_v38, %v1664_v39  ;;  %v5414_v23 = vld [vmem:[%s8669_s1 + $0x78] sm:$0xff] }
 0x502   : > { %2432 = vadd.xlane.f32.xlu0 %v2431_v45  ;;  %v1844_v45 = vmul.f32 %v6965_v20, %v6651_v50  ;;  %v2111_v22 = vadd.f32 %v2110_v57, %v2109_v53  ;;  %v2449_v50 = vsel %vm1879_vm1, %v2249_v34, 0.0  ;;  %v2251_v20 = vmul.f32 %v7159_v58, %v6852_v61 }
 0x503   : > { %2435 = vadd.xlane.f32.xlu1 %v2434_v35  ;;  %v2074_v35 = vadd.f32 %v2073_v30, %v2072_v27  ;;  %v2112_v0 = vsel %vm1879_vm1, %v1860_v2, 0.0  ;;  %v2452_v62 = vsel %vm1879_vm1, %v2250_v6, 0.0  ;;  %v2253_v15 = vmul.f32 %v7159_v58, %v6876_v8 }
 0x504   : > { %v2075_v25 = vsel %vm1879_vm1, %v1844_v45, 0.0  ;;  %v2113_v59 = vadd.f32 %v2112_v0, %v2111_v22  ;;  %v2455_v60 = vsel %vm1879_vm1, %v2251_v20, 0.0  ;;  %v1846_v32 = vmul.f32 %v6992_v26, %v8819_v9  ;;  %v1674_v45 = vpop.permute.xlu1 %1673  ;;  %v5416_v0 = vld [vmem:[%s8669_s1 + $0x88] sm:$0xff] }
 0x505   : > { %v2458_v55 = vsel %vm1879_vm1, %v2252_v4, 0.0  ;;  %v2254_v27 = vmul.f32 %v7159_v58, %v6881_v52  ;;  %v2077_v53 = vsel %vm1879_vm1, %v1845_v7, 0.0  ;;  %v2461_v9 = vsel %vm1879_vm1, %v2253_v15, 0.0 }
 0x506   : > { %2438 = vadd.xlane.f32.xlu0 %v2437_v10  ;;  %v1669_v10 = vpop.permute.xlu0 %1668  ;;  %v2255_v26 = vmul.f32 %v7159_v58, %v6903_v40  ;;  %v2079_v2 = vsel %vm1879_vm1, %v1846_v32, 0.0  ;;  %v2256_v30 = vmul.f32 %v7159_v58, %v6908_v11 }
 0x507   : > { %2441 = vadd.xlane.f32.xlu1 %v2440_v49  ;;  %v2076_v49 = vadd.f32 %v2075_v25, %v2074_v35  ;;  %v1862_v29 = vmul.f32 %v5414_v23, %v1669_v10  ;;  %v2464_v6 = vsel %vm1879_vm1, %v2254_v27, 0.0  ;;  %v5415_v35 = vld [vmem:[%s8669_s1 + $0x80] sm:$0xff]  ;;  %v2257_v25 = vmul.f32 %v7159_v58, %v6927_v47 }
 0x508   : > { %v1863_v39 = vmul.f32 %v5415_v35, %v1674_v45  ;;  %v2467_v20 = vsel %vm1879_vm1, %v2255_v26, 0.0  ;;  %v2470_v4 = vsel %vm1879_vm1, %v2256_v30, 0.0  ;;  %v2258_v10 = vmul.f32 %v7159_v58, %v6932_v36 }
 0x509   : > { %v2078_v34 = vadd.f32 %v2077_v53, %v2076_v49  ;;  %v2260_v23 = vmul.f32 %v7159_v58, %v6956_v5  ;;  %v2261_v45 = vmul.f32 %v7159_v58, %v6973_v17 }
 0x50a   : > { %2444 = vadd.xlane.f32.xlu0 %v2443_v63  ;;  %v2114_v63 = vsel %vm1879_vm1, %v1861_v31, 0.0  ;;  %v1679_v57 = vpop.permute.xlu0 %1678  ;;  %v2118_v7 = vsel %vm1879_vm1, %v1863_v39, 0.0  ;;  %v1684_v31 = vpop.permute.xlu1 %1683  ;;  %v2476_v32 = vsel %vm1879_vm1, %v2258_v10, 0.0  ;;  %v5419_v10 = vld [vmem:[%s8669_s1 + $0xa0] sm:$0xff] }
 0x50b   : > { %2447 = vadd.xlane.f32.xlu1 %v2446_v18  ;;  %v2115_v33 = vadd.f32 %v2114_v63, %v2113_v59  ;;  %v2116_v18 = vsel %vm1879_vm1, %v1862_v29, 0.0  ;;  %v2080_v22 = vadd.f32 %v2079_v2, %v2078_v34  ;;  %v2473_v59 = vsel %vm1879_vm1, %v2257_v25, 0.0  ;;  %v8826_v2 = vld [vmem:[#allocation57_spill] sm:$0xff] }
 0x50c   : > { %v2482_v26 = vsel %vm1879_vm1, %v2260_v23, 0.0  ;;  %v2485_v39 = vsel %vm1879_vm1, %v2261_v45, 0.0 }
 0x50d   : > { %v2081_v38 = vrot.slane %v2080_v22, 4 }
 0x50e   : > { %2450 = vadd.xlane.f32.xlu0 %v2449_v50  ;;  %v2117_v50 = vadd.f32 %v2116_v18, %v2115_v33  ;;  %v1689_v29 = vpop.permute.xlu0 %1688  ;;  %v5418_v33 = vld [vmem:[%s8669_s1 + $0x98] sm:$0xff]  ;;  %v2262_v18 = vmul.f32 %v7159_v58, %v8826_v2 }
 0x50f   : > { %2453 = vadd.xlane.f32.xlu1 %v2452_v62  ;;  %v1864_v62 = vmul.f32 %v5416_v0, %v1679_v57  ;;  %v2082_v53 = vadd.f32 %v2081_v38, %v2080_v22  ;;  %v1694_v57 = vpop.permute.xlu1 %1693  ;;  %v8827_v22 = vld [vmem:[#allocation60_spill] sm:$0xff]  ;;  %v8828_v0 = vld [vmem:[#allocation59_spill] sm:$0xff] }
 0x510   : > { %v2119_v49 = vadd.f32 %v2118_v7, %v2117_v50  ;;  %v2263_v50 = vmul.f32 %v7159_v58, %v8827_v22  ;;  %v2488_v25 = vsel %vm1879_vm1, %v2262_v18, 0.0  ;;  %v1867_v7 = vmul.f32 %v5419_v10, %v1694_v57 }
 0x511   : > { %v2120_v15 = vsel %vm1879_vm1, %v1864_v62, 0.0  ;;  %v2083_v30 = vrot.slane %v2082_v53, 2  ;;  %v2264_v62 = vmul.f32 %v7159_v58, %v8828_v0  ;;  %v2268_v18 = vmul.f32 %v7159_v58, %v7056_v44 }
 0x512   : > { %2456 = vadd.xlane.f32.xlu0 %v2455_v60  ;;  %v2259_v60 = vmul.f32 %v7159_v58, %v6951_v19  ;;  %v2121_v63 = vadd.f32 %v2120_v15, %v2119_v49  ;;  %v2491_v49 = vsel %vm1879_vm1, %v2263_v50, 0.0  ;;  %v5420_v15 = vld [vmem:[%s8669_s1 + $0xa8] sm:$0xff]  ;;  %v2270_v10 = vmul.f32 %v7159_v58, %v7079_v54 }
 0x513   : > { %2459 = vadd.xlane.f32.xlu1 %v2458_v55  ;;  %v5417_v55 = vld [vmem:[%s8669_s1 + $0x90] sm:$0xff]  ;;  %v2084_v38 = vadd.f32 %v2083_v30, %v2082_v53  ;;  %v2494_v23 = vsel %vm1879_vm1, %v2264_v62, 0.0 }
 0x514   : > { %v1865_v27 = vmul.f32 %v5417_v55, %v1684_v31  ;;  %v2479_v34 = vsel %vm1879_vm1, %v2259_v60, 0.0  ;;  %v5421_v30 = vld [vmem:[%s8669_s1 + $0xb0] sm:$0xff] }
 0x515   : > { %v2085_v53 = vrot.slane %v2084_v38, 1 }
 0x516   : > { %2462 = vadd.xlane.f32.xlu0 %v2461_v9  ;;  %v1866_v9 = vmul.f32 %v5418_v33, %v1689_v29  ;;  %v8830_v29 = vld [vmem:[#allocation8_spill] sm:$0xff]  ;;  %v2267_v33 = vmul.f32 %v7159_v58, %v7039_v51 }
 0x517   : > { %2465 = vadd.xlane.f32.xlu1 %v2464_v6  ;;  %v2122_v6 = vsel %vm1879_vm1, %v1865_v27, 0.0  ;;  %v2266_v55 = vmul.f32 %v7159_v58, %v8830_v29  ;;  %v2126_v27 = vsel %vm1879_vm1, %v1867_v7, 0.0 }
 0x518   : > { %v2123_v35 = vadd.f32 %v2122_v6, %v2121_v63  ;;  %v1704_v63 = vpop.permute.xlu1 %1703  ;;  %v2503_v50 = vsel %vm1879_vm1, %v2267_v33, 0.0  ;;  %v2273_v33 = vmul.f32 %v7159_v58, %v7117_v13 }
 0x519   : > { %v1869_v57 = vmul.f32 %v5421_v30, %v1704_v63 }
 0x51a   : > { %2468 = vadd.xlane.f32.xlu0 %v2467_v20  ;;  %v2124_v20 = vsel %vm1879_vm1, %v1866_v9, 0.0 }
 0x51b   : > { %2471 = vadd.xlane.f32.xlu1 %v2470_v4  ;;  %v1699_v4 = vpop.permute.xlu0 %1698  ;;  %v2125_v31 = vadd.f32 %v2124_v20, %v2123_v35  ;;  %v2086_v35 = vadd.f32 %v2085_v53, %v2084_v38  ;;  %v2269_v20 = vmul.f32 %v7159_v58, %v7070_v56  ;;  %v2130_v7 = vsel %vm1879_vm1, %v1869_v57, 0.0 }
 0x51d   : > { %v2159_v38 = vadd.f32 %v6750_v24, %v2086_v35  ;;  %v5423_v24 = vld [vmem:[%s8669_s1 + $0xc0] sm:$0xff] }
 0x51e   : > { %2474 = vadd.xlane.f32.xlu0 %v2473_v59  ;;  %v8829_v59 = vld [vmem:[#allocation9_spill] sm:$0xff] }
 0x51f   : > { %2477 = vadd.xlane.f32.xlu1 %v2476_v32  ;;  %v2265_v60 = vmul.f32 %v7159_v58, %v8829_v59  ;;  %v1868_v32 = vmul.f32 %v5420_v15, %v1699_v4  ;;  %v1709_v6 = vpop.permute.xlu0 %1708  ;;  %v2506_v4 = vsel %vm1879_vm1, %v2268_v18, 0.0  ;;  %v2271_v15 = vmul.f32 %v7159_v58, %v7093_v42 }
 0x520   : > { %v2163_v63 = vmax.f32 %v2159_v38, 0.0 }
 0x521   : > { %v2497_v45 = vsel %vm1879_vm1, %v2265_v60, 0.0  ;;  %v2128_v9 = vsel %vm1879_vm1, %v1868_v32, 0.0  ;;  %v2509_v60 = vsel %vm1879_vm1, %v2269_v20, 0.0  ;;  %v2275_v20 = vmul.f32 %v7159_v58, %v7148_v16 }
 0x522   : > { %2480 = vadd.xlane.f32.xlu0 %v2479_v34  ;;  %v2127_v34 = vadd.f32 %v2126_v27, %v2125_v31  ;;  %v1714_v31 = vpop.permute.xlu1 %1713  ;;  %v7341_v57 = vrot.slane %v2163_v63, %v6763_v48 }
 0x523   : > { %2483 = vadd.xlane.f32.xlu1 %v2482_v26  ;;  %v2500_v26 = vsel %vm1879_vm1, %v2266_v55, 0.0  ;;  %v2272_v55 = vmul.f32 %v7159_v58, %v7106_v37  ;;  %v1719_v27 = vpop.permute.xlu0 %1718  ;;  %v1871_v53 = vmul.f32 %v5423_v24, %v1714_v31 }
 0x525   : > { %v2518_v18 = vsel %vm1879_vm1, %v2272_v55, 0.0  ;;  %v2134_v30 = vsel %vm1879_vm1, %v1871_v53, 0.0 }
 0x526   : > { %2486 = vadd.xlane.f32.xlu0 %v2485_v39  ;;  %v2129_v39 = vadd.f32 %v2128_v9, %v2127_v34  ;;  %v5424_v9 = vld [vmem:[%s8669_s1 + $0xc8] sm:$0xff]  ;;  %v1724_v35 = vpop.permute.xlu1 %1723 }
 0x527   : > { %2489 = vadd.xlane.f32.xlu1 %v2488_v25  ;;  %v5422_v25 = vld [vmem:[%s8669_s1 + $0xb8] sm:$0xff] }
 0x528   : > { %v1870_v62 = vmul.f32 %v5422_v25, %v1709_v6  ;;  %v2274_v6 = vmul.f32 %v7159_v58, %v7127_v3 }
 0x52a   : > { %2492 = vadd.xlane.f32.xlu0 %v2491_v49  ;;  %v2131_v49 = vadd.f32 %v2130_v7, %v2129_v39  ;;  %v2132_v32 = vsel %vm1879_vm1, %v1870_v62, 0.0  ;;  %v2524_v62 = vsel %vm1879_vm1, %v2274_v6, 0.0  ;;  %v5425_v7 = vld [vmem:[%s8669_s1 + $0xd0] sm:$0xff]  ;;  %v5428_v6 = vld [vmem:[%s8669_s1 + $0xe8] sm:$0xff] }
 0x52b   : > { %2495 = vadd.xlane.f32.xlu1 %v2494_v23  ;;  %v2512_v23 = vsel %vm1879_vm1, %v2270_v10, 0.0  ;;  %v1729_v10 = vpop.permute.xlu0 %1728  ;;  %v1873_v38 = vmul.f32 %v5425_v7, %v1724_v35  ;;  %v2282_v35 = vmul.f32 %v7341_v57, %v6831_v12  ;;  %v2284_v7 = vmul.f32 %v7341_v57, %v6857_v41  ;;  %v5430_v41 = vld [vmem:[%s8669_s1 + $0xf8] sm:$0xff] }
 0x52c   : > { %v2133_v34 = vadd.f32 %v2132_v32, %v2131_v49  ;;  %v2527_v49 = vsel %vm1879_vm1, %v2275_v20, 0.0 }
 0x52d   : > { %v2138_v55 = vsel %vm1879_vm1, %v1873_v38, 0.0  ;;  %v5429_v38 = vld [vmem:[%s8669_s1 + $0xf0] sm:$0xff] }
 0x52e   : > { %2498 = vadd.xlane.f32.xlu0 %v2497_v45  ;;  %v2515_v45 = vsel %vm1879_vm1, %v2271_v15, 0.0  ;;  %v2135_v39 = vadd.f32 %v2134_v30, %v2133_v34  ;;  %v5426_v15 = vld [vmem:[%s8669_s1 + $0xd8] sm:$0xff] }
 0x52f   : > { %2501 = vadd.xlane.f32.xlu1 %v2500_v26  ;;  %v1872_v26 = vmul.f32 %v5424_v9, %v1719_v27  ;;  %v1874_v32 = vmul.f32 %v5426_v15, %v1729_v10  ;;  %v1734_v27 = vpop.permute.xlu1 %1733  ;;  %v1739_v53 = vpop.permute.xlu0 %1738  ;;  %v2548_v10 = vsel %vm1879_vm1, %v2282_v35, 0.0  ;;  %v2285_v15 = vmul.f32 %v7341_v57, %v6876_v8 }
 0x530   : > { %v1876_v30 = vmul.f32 %v5428_v6, %v1739_v53  ;;  %v2292_v35 = vmul.f32 %v7341_v57, %v6956_v5 }
 0x531   : > { %v2136_v25 = vsel %vm1879_vm1, %v1872_v26, 0.0  ;;  %v2140_v34 = vsel %vm1879_vm1, %v1874_v32, 0.0  ;;  %v2557_v8 = vsel %vm1879_vm1, %v2285_v15, 0.0  ;;  %v2297_v15 = vmul.f32 %v7341_v57, %v8829_v59 }
 0x532   : > { %2504 = vadd.xlane.f32.xlu0 %v2503_v50  ;;  %v2521_v50 = vsel %vm1879_vm1, %v2273_v33, 0.0  ;;  %v2137_v31 = vadd.f32 %v2136_v25, %v2135_v39  ;;  %v2280_v33 = vmul.f32 %v7341_v57, %v6807_v28 }
 0x533   : > { %2507 = vadd.xlane.f32.xlu1 %v2506_v4  ;;  %v2276_v4 = vmul.f32 %v7159_v58, %v7153_v43  ;;  %v1749_v39 = vpop.permute.xlu0 %1748  ;;  %v1744_v20 = vpop.permute.xlu1 %1743 }
 0x534   : > { %v2139_v24 = vadd.f32 %v2138_v55, %v2137_v31  ;;  %v2542_v28 = vsel %vm1879_vm1, %v2280_v33, 0.0  ;;  %v1877_v31 = vmul.f32 %v5429_v38, %v1744_v20  ;;  %v1878_v32 = vmul.f32 %v5430_v41, %v1749_v39 }
 0x535   : > { %v2530_v58 = vsel %vm1879_vm1, %v2276_v4, 0.0  ;;  %v2144_v4 = vsel %vm1879_vm1, %v1876_v30, 0.0  ;;  %v2296_v38 = vmul.f32 %v7341_v57, %v8828_v0  ;;  %v2298_v41 = vmul.f32 %v7341_v57, %v8830_v29 }
 0x536   : > { %2510 = vadd.xlane.f32.xlu0 %v2509_v60  ;;  %v2277_v60 = vmul.f32 %v7341_v57, %v6785_v14  ;;  %v2279_v14 = vmul.f32 %v7341_v57, %v6802_v21  ;;  %v2141_v26 = vadd.f32 %v2140_v34, %v2139_v24  ;;  %v2281_v21 = vmul.f32 %v7341_v57, %v6826_v1 }
 0x537   : > { %2513 = vadd.xlane.f32.xlu1 %v2512_v23  ;;  %v2278_v23 = vmul.f32 %v7341_v57, %v6780_v46  ;;  %v5427_v46 = vld [vmem:[%s8669_s1 + $0xe0] sm:$0xff]  ;;  %v2283_v1 = vmul.f32 %v7341_v57, %v6852_v61  ;;  %v2596_v59 = vsel %vm1879_vm1, %v2298_v41, 0.0 }
 0x538   : > { %v2533_v63 = vsel %vm1879_vm1, %v2277_v60, 0.0  ;;  %v1875_v9 = vmul.f32 %v5427_v46, %v1734_v27  ;;  %v2146_v27 = vsel %vm1879_vm1, %v1877_v31, 0.0 }
 0x539   : > { %v2551_v61 = vsel %vm1879_vm1, %v2283_v1, 0.0 }
 0x53a   : > { %2516 = vadd.xlane.f32.xlu0 %v2515_v45  ;;  %v2536_v45 = vsel %vm1879_vm1, %v2278_v23, 0.0  ;;  %v2286_v23 = vmul.f32 %v7341_v57, %v6881_v52  ;;  %v2288_v52 = vmul.f32 %v7341_v57, %v6908_v11 }
 0x53b   : > { %2519 = vadd.xlane.f32.xlu1 %v2518_v18  ;;  %v2539_v18 = vsel %vm1879_vm1, %v2279_v14, 0.0  ;;  %v2148_v14 = vsel %vm1879_vm1, %v1878_v32, 0.0 }
 0x53c   : > { %v2560_v34 = vsel %vm1879_vm1, %v2286_v23, 0.0  ;;  %v2593_v23 = vsel %vm1879_vm1, %v2297_v15, 0.0 }
 0x53e   : > { %2522 = vadd.xlane.f32.xlu0 %v2521_v50  ;;  %v2142_v50 = vsel %vm1879_vm1, %v1875_v9, 0.0 }
 0x53f   : > { %2525 = vadd.xlane.f32.xlu1 %v2524_v62  ;;  %v2143_v25 = vadd.f32 %v2142_v50, %v2141_v26  ;;  %v2545_v62 = vsel %vm1879_vm1, %v2281_v21, 0.0  ;;  %v2289_v26 = vmul.f32 %v7341_v57, %v6927_v47 }
 0x541   : > { %v2145_v60 = vadd.f32 %v2144_v4, %v2143_v25  ;;  %v2569_v30 = vsel %vm1879_vm1, %v2289_v26, 0.0  ;;  %v2293_v25 = vmul.f32 %v7341_v57, %v6973_v17 }
 0x542   : > { %2528 = vadd.xlane.f32.xlu0 %v2527_v49 }
 0x543   : > { %2531 = vadd.xlane.f32.xlu1 %v2530_v58  ;;  %v2554_v58 = vsel %vm1879_vm1, %v2284_v7, 0.0  ;;  %v2147_v53 = vadd.f32 %v2146_v27, %v2145_v60  ;;  %v2295_v7 = vmul.f32 %v7341_v57, %v8827_v22  ;;  %v2590_v22 = vsel %vm1879_vm1, %v2296_v38, 0.0 }
 0x544   : > { %v2299_v27 = vmul.f32 %v7341_v57, %v7039_v51 }
 0x545   : > { %v2149_v46 = vadd.f32 %v2148_v14, %v2147_v53  ;;  %v2300_v53 = vmul.f32 %v7341_v57, %v7056_v44 }
 0x546   : > { %2534 = vadd.xlane.f32.xlu0 %v2533_v63  ;;  %v2287_v63 = vmul.f32 %v7341_v57, %v6903_v40  ;;  %v2566_v40 = vsel %vm1879_vm1, %v2288_v52, 0.0  ;;  %v2599_v14 = vsel %vm1879_vm1, %v2299_v27, 0.0  ;;  %v2302_v52 = vmul.f32 %v7341_v57, %v7079_v54 }
 0x547   : > { %2537 = vadd.xlane.f32.xlu1 %v2536_v45  ;;  %v2150_v6 = vrot.slane %v2149_v46, 4  ;;  %v2602_v51 = vsel %vm1879_vm1, %v2300_v53, 0.0  ;;  %v2304_v54 = vmul.f32 %v7341_v57, %v7106_v37  ;;  %v5435_v53 = vld [vmem:[%s8671_s3 + $0x18] sm:$0xff] }
 0x548   : > { %v2563_v9 = vsel %vm1879_vm1, %v2287_v63, 0.0 }
 0x549   : > { %v2151_v50 = vadd.f32 %v2150_v6, %v2149_v46 }
 0x54a   : > { %2540 = vadd.xlane.f32.xlu0 %v2539_v18  ;;  %v2290_v18 = vmul.f32 %v7341_v57, %v6932_v36 }
 0x54b   : > { %2543 = vadd.xlane.f32.xlu1 %v2542_v28  ;;  %v2291_v28 = vmul.f32 %v7341_v57, %v6951_v19  ;;  %v2578_v19 = vsel %vm1879_vm1, %v2292_v35, 0.0  ;;  %v2152_v4 = vrot.slane %v2151_v50, 2  ;;  %v2305_v35 = vmul.f32 %v7341_v57, %v7117_v13 }
 0x54c   : > { %v2572_v47 = vsel %vm1879_vm1, %v2290_v18, 0.0  ;;  %v2608_v18 = vsel %vm1879_vm1, %v2302_v52, 0.0  ;;  %v5436_v52 = vld [vmem:[%s8671_s3 + $0x20] sm:$0xff] }
 0x54d   : > { %v2575_v20 = vsel %vm1879_vm1, %v2291_v28, 0.0  ;;  %v2153_v60 = vadd.f32 %v2152_v4, %v2151_v50  ;;  %v2306_v50 = vmul.f32 %v7341_v57, %v7127_v3  ;;  %v2307_v4 = vmul.f32 %v7341_v57, %v7148_v16 }
 0x54e   : > { %2546 = vadd.xlane.f32.xlu0 %v2545_v62  ;;  %v2294_v62 = vmul.f32 %v7341_v57, %v8826_v2 }
 0x54f   : > { %2549 = vadd.xlane.f32.xlu1 %v2548_v10  ;;  %v7390_v12 = vpop.xlane.xlu0 %2345  ;;  %v2581_v10 = vsel %vm1879_vm1, %v2293_v25, 0.0  ;;  %v2620_v13 = vsel %vm1879_vm1, %v2306_v50, 0.0  ;;  %v2623_v38 = vsel %vm1879_vm1, %v2307_v4, 0.0  ;;  %v5439_v50 = vld [vmem:[%s8671_s3 + $0x38] sm:$0xff] }
 0x550   : > { %v7395_v49 = vpop.xlane.xlu1 %2342  ;;  %v2584_v17 = vsel %vm1879_vm1, %v2294_v62, 0.0  ;;  %v2617_v62 = vsel %vm1879_vm1, %v2305_v35, 0.0 }
 0x552   : > { %2552 = vadd.xlane.f32.xlu0 %v2551_v61  ;;  %v2587_v61 = vsel %vm1879_vm1, %v2295_v7, 0.0 }
 0x553   : > { %2555 = vadd.xlane.f32.xlu1 %v2554_v58  ;;  %v7406_v55 = vpop.xlane.xlu0 %2348  ;;  %v2154_v58 = vrot.slane %v2153_v60, 1 }
 0x554   : > { %v7409_v24 = vpop.xlane.xlu1 %2351 }
 0x555   : > { %v2155_v63 = vadd.f32 %v2154_v58, %v2153_v60 }
 0x556   : > { %2558 = vadd.xlane.f32.xlu0 %v2557_v8 }
 0x557   : > { %2561 = vadd.xlane.f32.xlu1 %v2560_v34  ;;  %v7418_v45 = vpop.xlane.xlu0 %2354  ;;  %v2301_v34 = vmul.f32 %v7341_v57, %v7070_v56  ;;  %v2303_v56 = vmul.f32 %v7341_v57, %v7093_v42  ;;  %v2614_v42 = vsel %vm1879_vm1, %v2304_v54, 0.0 }
 0x558   : > { %v7420_v33 = vpop.xlane.xlu1 %2357 }
 0x55a   : > { %2564 = vadd.xlane.f32.xlu0 %v2563_v9  ;;  %v5431_v9 = vld [vmem:[%s8670_s2] sm:$0x1] }
 0x55b   : > { %2567 = vadd.xlane.f32.xlu1 %v2566_v40  ;;  %v7428_v21 = vpop.xlane.xlu0 %2360  ;;  %v2160_v26 = vadd.f32 %v5431_v9, %v2155_v63  ;;  %v2605_v40 = vsel %vm1879_vm1, %v2301_v34, 0.0 }
 0x55c   : > { %v7430_v11 = vpop.xlane.xlu1 %2363 }
 0x55d   : > { %v2164_v28 = vmax.f32 %v2160_v26, 0.0 }
 0x55e   : > { %2570 = vadd.xlane.f32.xlu0 %v2569_v30 }
 0x55f   : > { %2573 = vadd.xlane.f32.xlu1 %v2572_v47  ;;  %v7438_v39 = vpop.xlane.xlu0 %2366  ;;  %v2611_v47 = vsel %vm1879_vm1, %v2303_v56, 0.0 }
 0x560   : > { %v7440_v36 = vpop.xlane.xlu1 %2369 }
 0x562   : > { %2576 = vadd.xlane.f32.xlu0 %v2575_v20 }
 0x563   : > { %2579 = vadd.xlane.f32.xlu1 %v2578_v19  ;;  %v7448_v1 = vpop.xlane.xlu0 %2372  ;;  %v7516_v19 = vrot.slane %v2164_v28, %v6763_v48  ;;  %v5432_v48 = vld [vmem:[%s8671_s3] sm:$0xff] }
 0x564   : > { %v7450_v5 = vpop.xlane.xlu1 %2375 }
 0x565   : > { %v2309_v60 = vmul.f32 %v5432_v48, %v7516_v19  ;;  %v2312_v63 = vmul.f32 %v5435_v53, %v7516_v19  ;;  %v2313_v9 = vmul.f32 %v5436_v52, %v7516_v19 }
 0x566   : > { %2582 = vadd.xlane.f32.xlu0 %v2581_v10  ;;  %v2308_v10 = vmul.f32 %v7341_v57, %v7153_v43  ;;  %v5433_v57 = vld [vmem:[%s8671_s3 + $0x8] sm:$0xff] }
 0x567   : > { %2585 = vadd.xlane.f32.xlu1 %v2584_v17  ;;  %v7458_v31 = vpop.xlane.xlu0 %2378  ;;  %v2310_v15 = vmul.f32 %v5433_v57, %v7516_v19  ;;  %v2629_v58 = vsel %vm1879_vm1, %v2309_v60, 0.0  ;;  %v2638_v26 = vsel %vm1879_vm1, %v2312_v63, 0.0  ;;  %v2641_v28 = vsel %vm1879_vm1, %v2313_v9, 0.0  ;;  %v5443_v63 = vld [vmem:[%s8671_s3 + $0x58] sm:$0xff] }
 0x568   : > { %v7460_v2 = vpop.xlane.xlu1 %2381 }
 0x56a   : > { %2588 = vadd.xlane.f32.xlu0 %v2587_v61  ;;  %v2626_v61 = vsel %vm1879_vm1, %v2308_v10, 0.0 }
 0x56b   : > { %2591 = vadd.xlane.f32.xlu1 %v2590_v22  ;;  %v7468_v32 = vpop.xlane.xlu0 %2384 }
 0x56c   : > { %v7470_v0 = vpop.xlane.xlu1 %2387 }
 0x56e   : > { %2594 = vadd.xlane.f32.xlu0 %v2593_v23  ;;  %v5434_v23 = vld [vmem:[%s8671_s3 + $0x10] sm:$0xff] }
 0x56f   : > { %2597 = vadd.xlane.f32.xlu1 %v2596_v59  ;;  %v7478_v8 = vpop.xlane.xlu0 %2390  ;;  %v2311_v27 = vmul.f32 %v5434_v23, %v7516_v19  ;;  %v2632_v59 = vsel %vm1879_vm1, %v2310_v15, 0.0 }
 0x570   : > { %v7480_v29 = vpop.xlane.xlu1 %2393 }
 0x572   : > { %2600 = vadd.xlane.f32.xlu0 %v2599_v14 }
 0x573   : > { %2603 = vadd.xlane.f32.xlu1 %v2602_v51  ;;  %v7488_v46 = vpop.xlane.xlu0 %2396  ;;  %v2635_v51 = vsel %vm1879_vm1, %v2311_v27, 0.0  ;;  %v5442_v27 = vld [vmem:[%s8671_s3 + $0x50] sm:$0xff] }
 0x574   : > { %v7490_v44 = vpop.xlane.xlu1 %2399 }
 0x576   : > { %2606 = vadd.xlane.f32.xlu0 %v2605_v40  ;;  %v5437_v40 = vld [vmem:[%s8671_s3 + $0x28] sm:$0xff] }
 0x577   : > { %2609 = vadd.xlane.f32.xlu1 %v2608_v18  ;;  %v7501_v6 = vpop.xlane.xlu0 %2402  ;;  %v2314_v56 = vmul.f32 %v5437_v40, %v7516_v19  ;;  %v5444_v40 = vld [vmem:[%s8671_s3 + $0x60] sm:$0xff] }
 0x578   : > { %v7503_v30 = vpop.xlane.xlu1 %2405 }
 0x57a   : > { %2612 = vadd.xlane.f32.xlu0 %v2611_v47  ;;  %v5438_v47 = vld [vmem:[%s8671_s3 + $0x30] sm:$0xff] }
 0x57b   : > { %2615 = vadd.xlane.f32.xlu1 %v2614_v42  ;;  %v7511_v20 = vpop.xlane.xlu0 %2408  ;;  %v2315_v35 = vmul.f32 %v5438_v47, %v7516_v19  ;;  %v2644_v42 = vsel %vm1879_vm1, %v2314_v56, 0.0  ;;  %v2321_v56 = vmul.f32 %v5444_v40, %v7516_v19  ;;  %v5445_v47 = vld [vmem:[%s8671_s3 + $0x68] sm:$0xff] }
 0x57c   : > { %8831 = vst [vmem:[#allocation11_spill] sm:$0xff] %v7511_v20  ;;  %v7513_v25 = vpop.xlane.xlu1 %2411 }
 0x57d   : > { %8832 = vst [vmem:[#allocation10_spill] sm:$0xff] %v7513_v25  ;;  %v2647_v10 = vsel %vm1879_vm1, %v2315_v35, 0.0  ;;  %v2322_v35 = vmul.f32 %v5445_v47, %v7516_v19  ;;  %v5450_v47 = vld [vmem:[%s8671_s3 + $0x90] sm:$0xff] }
 0x57e   : > { %2618 = vadd.xlane.f32.xlu0 %v2617_v62  ;;  %v2316_v62 = vmul.f32 %v5439_v50, %v7516_v19 }
 0x57f   : > { %2621 = vadd.xlane.f32.xlu1 %v2620_v13  ;;  %v7524_v7 = vpop.xlane.xlu0 %2414 }
 0x580   : > { %8833 = vst [vmem:[#allocation17_spill] sm:$0xff] %v7524_v7  ;;  %v7526_v17 = vpop.xlane.xlu1 %2417  ;;  %v2650_v60 = vsel %vm1879_vm1, %v2316_v62, 0.0  ;;  %v2665_v62 = vsel %vm1879_vm1, %v2321_v56, 0.0 }
 0x581   : > { %8834 = vst [vmem:[#allocation16_spill] sm:$0xff] %v7526_v17 }
 0x582   : > { %2624 = vadd.xlane.f32.xlu0 %v2623_v38  ;;  %v5440_v38 = vld [vmem:[%s8671_s3 + $0x40] sm:$0xff] }
 0x583   : > { %2627 = vadd.xlane.f32.xlu1 %v2626_v61  ;;  %v7538_v22 = vpop.xlane.xlu0 %2420  ;;  %v2317_v48 = vmul.f32 %v5440_v38, %v7516_v19  ;;  %v5441_v61 = vld [vmem:[%s8671_s3 + $0x48] sm:$0xff] }
 0x584   : > { %8835 = vst [vmem:[#allocation19_spill] sm:$0xff] %v7538_v22  ;;  %v7540_v41 = vpop.xlane.xlu1 %2423  ;;  %v2318_v57 = vmul.f32 %v5441_v61, %v7516_v19 }
 0x585   : > { %8836 = vst [vmem:[#allocation18_spill] sm:$0xff] %v7540_v41  ;;  %v2653_v23 = vsel %vm1879_vm1, %v2317_v48, 0.0  ;;  %v2668_v48 = vsel %vm1879_vm1, %v2322_v35, 0.0  ;;  %v2327_v35 = vmul.f32 %v5450_v47, %v7516_v19  ;;  %v5456_v41 = vld [vmem:[%s8671_s3 + $0xc0] sm:$0xff] }
 0x586   : > { %2630 = vadd.xlane.f32.xlu0 %v2629_v58  ;;  %v2656_v53 = vsel %vm1879_vm1, %v2318_v57, 0.0 }
 0x587   : > { %2633 = vadd.xlane.f32.xlu1 %v2632_v59  ;;  %v7552_v14 = vpop.xlane.xlu0 %2426  ;;  %v2319_v59 = vmul.f32 %v5442_v27, %v7516_v19 }
 0x588   : > { %8837 = vst [vmem:[#allocation25_spill] sm:$0xff] %v7552_v14  ;;  %v7554_v34 = vpop.xlane.xlu1 %2429 }
 0x589   : > { %8838 = vst [vmem:[#allocation24_spill] sm:$0xff] %v7554_v34  ;;  %v7715_v34 = vld [vmem:[%s8672_s4 + $0x18] sm:$0xff] }
 0x58a   : > { %2636 = vadd.xlane.f32.xlu0 %v2635_v51  ;;  %v2320_v51 = vmul.f32 %v5443_v63, %v7516_v19 }
 0x58b   : > { %2639 = vadd.xlane.f32.xlu1 %v2638_v26  ;;  %v7566_v18 = vpop.xlane.xlu0 %2432  ;;  %v2659_v26 = vsel %vm1879_vm1, %v2319_v59, 0.0  ;;  %v5448_v59 = vld [vmem:[%s8671_s3 + $0x80] sm:$0xff] }
 0x58c   : > { %8839 = vst [vmem:[#allocation27_spill] sm:$0xff] %v7566_v18  ;;  %v7568_v54 = vpop.xlane.xlu1 %2435 }
 0x58d   : > { %8840 = vst [vmem:[#allocation26_spill] sm:$0xff] %v7568_v54 }
 0x58e   : > { %2642 = vadd.xlane.f32.xlu0 %v2641_v28  ;;  %v2662_v28 = vsel %vm1879_vm1, %v2320_v51, 0.0  ;;  %v5449_v51 = vld [vmem:[%s8671_s3 + $0x88] sm:$0xff] }
 0x58f   : > { %2645 = vadd.xlane.f32.xlu1 %v2644_v42  ;;  %v7580_v4 = vpop.xlane.xlu0 %2438 }
 0x590   : > { %v7582_v13 = vpop.xlane.xlu1 %2441 }
 0x592   : > { %2648 = vadd.xlane.f32.xlu0 %v2647_v10  ;;  %v5446_v10 = vld [vmem:[%s8671_s3 + $0x70] sm:$0xff] }
 0x593   : > { %2651 = vadd.xlane.f32.xlu1 %v2650_v60  ;;  %v7594_v15 = vpop.xlane.xlu0 %2444  ;;  %v2323_v38 = vmul.f32 %v5446_v10, %v7516_v19  ;;  %v5447_v60 = vld [vmem:[%s8671_s3 + $0x78] sm:$0xff] }
 0x594   : > { %v7596_v58 = vpop.xlane.xlu1 %2447  ;;  %v2324_v61 = vmul.f32 %v5447_v60, %v7516_v19  ;;  %v5451_v10 = vld [vmem:[%s8671_s3 + $0x98] sm:$0xff] }
 0x595   : > { %v2671_v27 = vsel %vm1879_vm1, %v2323_v38, 0.0  ;;  %v2328_v38 = vmul.f32 %v5451_v10, %v7516_v19  ;;  %v5454_v10 = vld [vmem:[%s8671_s3 + $0xb0] sm:$0xff] }
 0x596   : > { %2654 = vadd.xlane.f32.xlu0 %v2653_v23  ;;  %v2674_v63 = vsel %vm1879_vm1, %v2324_v61, 0.0 }
 0x597   : > { %2657 = vadd.xlane.f32.xlu1 %v2656_v53  ;;  %v7608_v52 = vpop.xlane.xlu0 %2450  ;;  %v2325_v53 = vmul.f32 %v5448_v59, %v7516_v19  ;;  %v5452_v59 = vld [vmem:[%s8671_s3 + $0xa0] sm:$0xff] }
 0x598   : > { %v7610_v9 = vpop.xlane.xlu1 %2453 }
 0x59a   : > { %2660 = vadd.xlane.f32.xlu0 %v2659_v26  ;;  %v2326_v26 = vmul.f32 %v5449_v51, %v7516_v19  ;;  %v7683_v51 = vld [vmem:[%s8672_s4] sm:$0xff] }
 0x59b   : > { %2663 = vadd.xlane.f32.xlu1 %v2662_v28  ;;  %v7622_v42 = vpop.xlane.xlu0 %2456  ;;  %v2677_v28 = vsel %vm1879_vm1, %v2325_v53, 0.0  ;;  %v2329_v53 = vmul.f32 %v5452_v59, %v7516_v19 }
 0x59c   : > { %v7624_v50 = vpop.xlane.xlu1 %2459 }
 0x59d   : > { %v2689_v59 = vsel %vm1879_vm1, %v2329_v53, 0.0 }
 0x59e   : > { %2666 = vadd.xlane.f32.xlu0 %v2665_v62  ;;  %v2680_v62 = vsel %vm1879_vm1, %v2326_v26, 0.0  ;;  %v2686_v26 = vsel %vm1879_vm1, %v2328_v38, 0.0  ;;  %v2331_v38 = vmul.f32 %v5454_v10, %v7516_v19 }
 0x59f   : > { %2669 = vadd.xlane.f32.xlu1 %v2668_v48  ;;  %v7636_v57 = vpop.xlane.xlu0 %2462  ;;  %v7667_v48 = vld [vmem:[%s8672_s4 + $0x8] sm:$0xff] }
 0x5a0   : > { %v7638_v23 = vpop.xlane.xlu1 %2465  ;;  %v2695_v14 = vsel %vm1879_vm1, %v2331_v38, 0.0  ;;  %v5457_v38 = vld [vmem:[%s8671_s3 + $0xc8] sm:$0xff] }
 0x5a2   : > { %2672 = vadd.xlane.f32.xlu0 %v2671_v27  ;;  %v2683_v27 = vsel %vm1879_vm1, %v2327_v35, 0.0  ;;  %v7693_v35 = vld [vmem:[%s8672_s4 + $0x10] sm:$0xff] }
 0x5a3   : > { %2675 = vadd.xlane.f32.xlu1 %v2674_v63  ;;  %v7650_v40 = vpop.xlane.xlu0 %2468  ;;  %v2758_v63 = vadd.f32 %v7667_v48, %v7390_v12  ;;  %v2759_v18 = vadd.f32 %v7693_v35, %v7406_v55  ;;  %v2791_v22 = vadd.f32 %v7693_v35, %v7594_v15  ;;  %v2338_v15 = vmul.f32 %v7516_v19, %v7127_v3 }
 0x5a4   : > { %v7652_v56 = vpop.xlane.xlu1 %2471 }
 0x5a5   : > { %v4696_v54 = vmul.f32 -1.442695, %v2758_v63  ;;  %v2760_v63 = vadd.f32 %v7715_v34, %v7409_v24  ;;  %v2334_v24 = vmul.f32 %v5457_v38, %v7516_v19 }
 0x5a6   : > { %2678 = vadd.xlane.f32.xlu0 %v2677_v28  ;;  %v5453_v28 = vld [vmem:[%s8671_s3 + $0xa8] sm:$0xff] }
 0x5a7   : > { %2681 = vadd.xlane.f32.xlu1 %v2680_v62  ;;  %v7669_v60 = vpop.xlane.xlu0 %2474  ;;  %v2330_v47 = vmul.f32 %v5453_v28, %v7516_v19  ;;  %v5455_v28 = vld [vmem:[%s8671_s3 + $0xb8] sm:$0xff]  ;;  %4887 = vpow2.f32 %v4696_v54  ;;  %v4698_v54 = vmul.f32 -1.442695, %v2760_v63  ;;  %v2704_v17 = vsel %vm1879_vm1, %v2334_v24, 0.0 }
 0x5a8   : > { %v7671_v61 = vpop.xlane.xlu1 %2477 }
 0x5aa   : > { %2684 = vadd.xlane.f32.xlu0 %v2683_v27  ;;  %v2757_v27 = vadd.f32 %v7683_v51, %v7395_v49  ;;  %v2692_v49 = vsel %vm1879_vm1, %v2330_v47, 0.0  ;;  %v4697_v47 = vmul.f32 -1.442695, %v2759_v18 }
 0x5ab   : > { %2687 = vadd.xlane.f32.xlu1 %v2686_v26  ;;  %v7695_v12 = vpop.xlane.xlu0 %2480  ;;  %v2332_v26 = vmul.f32 %v5455_v28, %v7516_v19 }
 0x5ac   : > { %v7697_v62 = vpop.xlane.xlu1 %2483  ;;  %v4695_v28 = vmul.f32 -1.442695, %v2757_v27 }
 0x5ad   : > { %v2698_v55 = vsel %vm1879_vm1, %v2332_v26, 0.0 }
 0x5ae   : > { %2690 = vadd.xlane.f32.xlu0 %v2689_v59  ;;  %v2333_v59 = vmul.f32 %v5456_v41, %v7516_v19  ;;  %v5458_v41 = vld [vmem:[%s8671_s3 + $0xd0] sm:$0xff]  ;;  %4889 = vpow2.f32 %v4695_v28 }
 0x5af   : > { %2693 = vadd.xlane.f32.xlu1 %v2692_v49  ;;  %v7718_v53 = vpop.xlane.xlu0 %2486  ;;  %v2789_v49 = vadd.f32 %v7683_v51, %v7580_v4  ;;  %v2335_v18 = vmul.f32 %v5458_v41, %v7516_v19  ;;  %v2790_v4 = vadd.f32 %v7667_v48, %v7582_v13  ;;  %4891 = vpow2.f32 %v4697_v47 }
 0x5b0   : > { %v7720_v10 = vpop.xlane.xlu1 %2489  ;;  %4893 = vpow2.f32 %v4698_v54 }
 0x5b1   : > { %8841 = vst [vmem:[#allocation33_spill] sm:$0xff] %v7720_v10  ;;  %v4727_v38 = vmul.f32 -1.442695, %v2789_v49  ;;  %v4728_v28 = vmul.f32 -1.442695, %v2790_v4  ;;  %v2707_v63 = vsel %vm1879_vm1, %v2335_v18, 0.0  ;;  %v2339_v18 = vmul.f32 %v7516_v19, %v7148_v16 }
 0x5b2   : > { %2696 = vadd.xlane.f32.xlu0 %v2695_v14  ;;  %v2336_v14 = vmul.f32 %v7516_v19, %v7106_v37  ;;  %v5459_v37 = vld [vmem:[%s8671_s3 + $0xe0] sm:$0xff] }
 0x5b3   : > { %2699 = vadd.xlane.f32.xlu1 %v2698_v55  ;;  %v7736_v27 = vpop.xlane.xlu0 %2492  ;;  %v2701_v55 = vsel %vm1879_vm1, %v2333_v59, 0.0  ;;  %v2337_v13 = vmul.f32 %v5459_v37, %v7516_v19  ;;  %4895 = vpow2.f32 %v4727_v38  ;;  %v4729_v59 = vmul.f32 -1.442695, %v2791_v22 }
 0x5b4   : > { %8842 = vst [vmem:[#allocation32_spill] sm:$0xff] %v7736_v27  ;;  %v7738_v26 = vpop.xlane.xlu1 %2495  ;;  %v2710_v47 = vsel %vm1879_vm1, %v2336_v14, 0.0  ;;  %4897 = vpow2.f32 %v4728_v28  ;;  %v2716_v22 = vsel %vm1879_vm1, %v2338_v15, 0.0  ;;  %v4888_v14 = vpop.eup %4887  ;;  %v2719_v38 = vsel %vm1879_vm1, %v2339_v18, 0.0 }
 0x5b5   : > { %8843 = vst [vmem:[#allocation35_spill] sm:$0xff] %v7738_v26  ;;  %v2713_v54 = vsel %vm1879_vm1, %v2337_v13, 0.0  ;;  %4899 = vpow2.f32 %v4729_v59  ;;  %v3270_v13 = vadd.f32 1.0, %v4888_v14 }
 0x5b6   : > { %2702 = vadd.xlane.f32.xlu0 %v2701_v55 }
 0x5b7   : > { %2705 = vadd.xlane.f32.xlu1 %v2704_v17  ;;  %v7752_v41 = vpop.xlane.xlu0 %2498  ;;  %v2792_v17 = vadd.f32 %v7715_v34, %v7596_v58  ;;  %v2340_v58 = vmul.f32 %v7516_v19, %v7153_v43 }
 0x5b8   : > { %8844 = vst [vmem:[#allocation34_spill] sm:$0xff] %v7752_v41  ;;  %v7754_v7 = vpop.xlane.xlu1 %2501 }
 0x5b9   : > { %8845 = vst [vmem:[#allocation41_spill] sm:$0xff] %v7754_v7  ;;  %v4730_v3 = vmul.f32 -1.442695, %v2792_v17  ;;  %v2722_v16 = vsel %vm1879_vm1, %v2340_v58, 0.0 }
 0x5ba   : > { %2708 = vadd.xlane.f32.xlu0 %v2707_v63 }
 0x5bb   : > { %2711 = vadd.xlane.f32.xlu1 %v2710_v47  ;;  %v7766_v49 = vpop.xlane.xlu0 %2504  ;;  %v4890_v37 = vpop.eup %4889  ;;  %4901 = vpow2.f32 %v4730_v3 }
 0x5bc   : > { %8846 = vst [vmem:[#allocation40_spill] sm:$0xff] %v7766_v49  ;;  %v7768_v24 = vpop.xlane.xlu1 %2507  ;;  %v4892_v28 = vpop.eup %4891  ;;  %v3269_v43 = vadd.f32 1.0, %v4890_v37  ;;  %4903 = vrcp.f32 %v3270_v13 }
 0x5bd   : > { %8847 = vst [vmem:[#allocation43_spill] sm:$0xff] %v7768_v24  ;;  %v4894_v19 = vpop.eup %4893  ;;  %v3271_v59 = vadd.f32 1.0, %v4892_v28 }
 0x5be   : > { %2714 = vadd.xlane.f32.xlu0 %v2713_v54  ;;  %4905 = vrcp.f32 %v3269_v43  ;;  %v3272_v18 = vadd.f32 1.0, %v4894_v19 }
 0x5bf   : > { %2717 = vadd.xlane.f32.xlu1 %v2716_v22  ;;  %v7776_v4 = vpop.xlane.xlu0 %2510  ;;  %4907 = vrcp.f32 %v3271_v59 }
 0x5c0   : > { %8848 = vst [vmem:[#allocation42_spill] sm:$0xff] %v7776_v4  ;;  %v7778_v55 = vpop.xlane.xlu1 %2513  ;;  %v4896_v17 = vpop.eup %4895  ;;  %4909 = vrcp.f32 %v3272_v18 }
 0x5c1   : > { %8849 = vst [vmem:[#allocation50_spill] sm:$0xff] %v7778_v55  ;;  %v4898_v3 = vpop.eup %4897  ;;  %v3301_v22 = vadd.f32 1.0, %v4896_v17 }
 0x5c2   : > { %2720 = vadd.xlane.f32.xlu0 %v2719_v38  ;;  %v4900_v58 = vpop.eup %4899  ;;  %v3302_v37 = vadd.f32 1.0, %v4898_v3 }
 0x5c3   : > { %2723 = vadd.xlane.f32.xlu1 %v2722_v16  ;;  %v7782_v63 = vpop.xlane.xlu0 %2516  ;;  %4911 = vrcp.f32 %v3301_v22  ;;  %v3303_v13 = vadd.f32 1.0, %v4900_v58 }
 0x5c4   : > { %8850 = vst [vmem:[#allocation49_spill] sm:$0xff] %v7782_v63  ;;  %v7784_v15 = vpop.xlane.xlu1 %2519  ;;  %4913 = vrcp.f32 %v3302_v37 }
 0x5c5   : > { %8851 = vst [vmem:[#allocation52_spill] sm:$0xff] %v7784_v15  ;;  %4915 = vrcp.f32 %v3303_v13 }
 0x5c7   : > { %v7786_v47 = vpop.xlane.xlu0 %2522 }
 0x5c8   : > { %8852 = vst [vmem:[#allocation51_spill] sm:$0xff] %v7786_v47  ;;  %v7788_v54 = vpop.xlane.xlu1 %2525  ;;  %v4902_v16 = vpop.eup %4901 }
 0x5c9   : > { %8853 = vst [vmem:[#allocation62_spill] sm:$0xff] %v7788_v54  ;;  %v3304_v19 = vadd.f32 1.0, %v4902_v16  ;;  %v4904_v17 = vpop.eup %4903 }
 0x5cb   : > { %v7790_v14 = vpop.xlane.xlu0 %2528  ;;  %v4906_v58 = vpop.eup %4905 }
 0x5cc   : > { %8854 = vst [vmem:[#allocation61_spill] sm:$0xff] %v7790_v14  ;;  %v7792_v38 = vpop.xlane.xlu1 %2531  ;;  %v4908_v37 = vpop.eup %4907 }
 0x5cd   : > { %8855 = vst [vmem:[#allocation64_spill] sm:$0xff] %v7792_v38  ;;  %v4910_v13 = vpop.eup %4909 }
 0x5cf   : > { %v2535_v28 = vpop.xlane.xlu0 %2534 }
 0x5d0   : > { %v2821_v47 = vadd.f32 %v7683_v51, %v2535_v28  ;;  %v2538_v15 = vpop.xlane.xlu1 %2537 }
 0x5d1   : > { %v2822_v43 = vadd.f32 %v7667_v48, %v2538_v15 }
 0x5d2   : > { %v4759_v59 = vmul.f32 -1.442695, %v2821_v47 }
 0x5d3   : > { %v4760_v54 = vmul.f32 -1.442695, %v2822_v43  ;;  %v2541_v14 = vpop.xlane.xlu0 %2540 }
 0x5d4   : > { %4917 = vpow2.f32 %v4759_v59  ;;  %v2823_v18 = vadd.f32 %v7693_v35, %v2541_v14  ;;  %v2544_v3 = vpop.xlane.xlu1 %2543  ;;  %3660 = vperm.xlu1 %4886, %v4904_v17   ;;  %v4912_v14 = vpop.eup %4911 }
 0x5d5   : > { %4919 = vpow2.f32 %v4760_v54  ;;  %v2824_v22 = vadd.f32 %v7715_v34, %v2544_v3  ;;  %v4914_v43 = vpop.eup %4913 }
 0x5d6   : > { %4921 = vrcp.f32 %v3304_v19  ;;  %v4761_v28 = vmul.f32 -1.442695, %v2823_v18  ;;  %v4916_v19 = vpop.eup %4915 }
 0x5d7   : > { %v4762_v38 = vmul.f32 -1.442695, %v2824_v22  ;;  %v7798_v15 = vpop.xlane.xlu0 %2546 }
 0x5d8   : > { %4923 = vpow2.f32 %v4761_v28  ;;  %v7800_v47 = vpop.xlane.xlu1 %2549  ;;  %3665 = vperm.xlu1 %4886, %v4908_v37   ;;  %3655 = vperm.xlu0 %4885, %v4906_v58  }
 0x5d9   : > { %4925 = vpow2.f32 %v4762_v38 }
 0x5db   : > { %v7802_v16 = vpop.xlane.xlu0 %2552 }
 0x5dc   : > { %v7804_v54 = vpop.xlane.xlu1 %2555  ;;  %3675 = vperm.xlu1 %4886, %v4912_v14   ;;  %3670 = vperm.xlu0 %4885, %v4910_v13  }
 0x5df   : > { %v7806_v59 = vpop.xlane.xlu0 %2558 }
 0x5e0   : > { %v7808_v17 = vpop.xlane.xlu1 %2561  ;;  %3685 = vperm.xlu1 %4886, %v4916_v19   ;;  %3680 = vperm.xlu0 %4885, %v4914_v43  }
 0x5e1   : > { %v4918_v18 = vpop.eup %4917 }
 0x5e2   : > { %v4920_v3 = vpop.eup %4919  ;;  %v3333_v22 = vadd.f32 1.0, %v4918_v18 }
 0x5e3   : > { %v4922_v38 = vpop.eup %4921  ;;  %v3334_v58 = vadd.f32 1.0, %v4920_v3  ;;  %v7810_v28 = vpop.xlane.xlu0 %2564 }
 0x5e4   : > { %4927 = vrcp.f32 %v3333_v22  ;;  %v7812_v37 = vpop.xlane.xlu1 %2567  ;;  %3690 = vperm.xlu0 %4885, %v4922_v38  }
 0x5e5   : > { %v4924_v13 = vpop.eup %4923  ;;  %4929 = vrcp.f32 %v3334_v58 }
 0x5e6   : > { %v4926_v14 = vpop.eup %4925  ;;  %v3335_v63 = vadd.f32 1.0, %v4924_v13 }
 0x5e7   : > { %v3336_v55 = vadd.f32 1.0, %v4926_v14  ;;  %v7814_v4 = vpop.xlane.xlu0 %2570 }
 0x5e8   : > { %4931 = vrcp.f32 %v3335_v63  ;;  %v7816_v43 = vpop.xlane.xlu1 %2573 }
 0x5e9   : > { %4933 = vrcp.f32 %v3336_v55 }
 0x5eb   : > { %v7818_v19 = vpop.xlane.xlu0 %2576 }
 0x5ec   : > { %v7820_v18 = vpop.xlane.xlu1 %2579 }
 0x5ef   : > { %v7822_v3 = vpop.xlane.xlu0 %2582 }
 0x5f0   : > { %8856 = vst [vmem:[#allocation63_spill] sm:$0xff] %v7822_v3  ;;  %v7824_v22 = vpop.xlane.xlu1 %2585 }
 0x5f1   : > { %8857 = vst [vmem:[#allocation13_spill] sm:$0xff] %v7824_v22  ;;  %v4928_v38 = vpop.eup %4927 }
 0x5f2   : > { %v4930_v24 = vpop.eup %4929  ;;  %3695 = vperm.xlu1 %4886, %v4928_v38  }
 0x5f3   : > { %3700 = vperm.xlu0 %4885, %v4930_v24   ;;  %v7826_v58 = vpop.xlane.xlu0 %2588 }
 0x5f4   : > { %8858 = vst [vmem:[#allocation12_spill] sm:$0xff] %v7826_v58  ;;  %v7828_v13 = vpop.xlane.xlu1 %2591 }
 0x5f5   : > { %8859 = vst [vmem:[#allocation15_spill] sm:$0xff] %v7828_v13  ;;  %v4932_v63 = vpop.eup %4931 }
 0x5f6   : > { %v4934_v14 = vpop.eup %4933  ;;  %3705 = vperm.xlu1 %4886, %v4932_v63  }
 0x5f7   : > { %3710 = vperm.xlu0 %4885, %v4934_v14   ;;  %v7830_v55 = vpop.xlane.xlu0 %2594  ;;  %v7853_v14 = vld [vmem:[%s8672_s4 + $0x20] sm:$0xff] }
 0x5f8   : > { %8860 = vst [vmem:[#allocation14_spill] sm:$0xff] %v7830_v55  ;;  %v7832_v49 = vpop.xlane.xlu1 %2597 }
 0x5f9   : > { %8861 = vst [vmem:[#allocation21_spill] sm:$0xff] %v7832_v49 }
 0x5fb   : > { %v7834_v7 = vpop.xlane.xlu0 %2600 }
 0x5fc   : > { %8862 = vst [vmem:[#allocation20_spill] sm:$0xff] %v7834_v7  ;;  %v7836_v41 = vpop.xlane.xlu1 %2603 }
 0x5fd   : > { %8863 = vst [vmem:[#allocation23_spill] sm:$0xff] %v7836_v41 }
 0x5ff   : > { %v7838_v25 = vpop.xlane.xlu0 %2606 }
 0x600   : > { %8864 = vst [vmem:[#allocation22_spill] sm:$0xff] %v7838_v25  ;;  %v7840_v38 = vpop.xlane.xlu1 %2609  ;;  %v7860_v25 = vld [vmem:[%s8672_s4 + $0x28] sm:$0xff] }
 0x601   : > { %8865 = vst [vmem:[#allocation29_spill] sm:$0xff] %v7840_v38 }
 0x603   : > { %v7842_v24 = vpop.xlane.xlu0 %2612 }
 0x604   : > { %8866 = vst [vmem:[#allocation28_spill] sm:$0xff] %v7842_v24  ;;  %v7844_v20 = vpop.xlane.xlu1 %2615 }
 0x605   : > { %8867 = vst [vmem:[#allocation31_spill] sm:$0xff] %v7844_v20  ;;  %v2761_v20 = vadd.f32 %v7853_v14, %v7418_v45 }
 0x607   : > { %v7846_v13 = vpop.xlane.xlu0 %2618  ;;  %v4699_v45 = vmul.f32 -1.442695, %v2761_v20 }
 0x608   : > { %8868 = vst [vmem:[#allocation30_spill] sm:$0xff] %v7846_v13  ;;  %v7848_v63 = vpop.xlane.xlu1 %2621  ;;  %v7871_v13 = vld [vmem:[%s8672_s4 + $0x30] sm:$0xff] }
 0x609   : > { %8869 = vst [vmem:[#allocation37_spill] sm:$0xff] %v7848_v63  ;;  %v2762_v63 = vadd.f32 %v7860_v25, %v7420_v33  ;;  %v2763_v33 = vadd.f32 %v7871_v13, %v7428_v21 }
 0x60b   : > { %v7855_v7 = vpop.xlane.xlu0 %2624  ;;  %v4700_v58 = vmul.f32 -1.442695, %v2762_v63  ;;  %v4701_v21 = vmul.f32 -1.442695, %v2763_v33 }
 0x60c   : > { %8870 = vst [vmem:[#allocation36_spill] sm:$0xff] %v7855_v7  ;;  %v7862_v38 = vpop.xlane.xlu1 %2627  ;;  %v7876_v7 = vld [vmem:[%s8672_s4 + $0x38] sm:$0xff] }
 0x60d   : > { %8871 = vst [vmem:[#allocation39_spill] sm:$0xff] %v7862_v38  ;;  %v2764_v22 = vadd.f32 %v7876_v7, %v7430_v11  ;;  %v7894_v11 = vld [vmem:[%s8672_s4 + $0x48] sm:$0xff] }
 0x60f   : > { %v2631_v24 = vpop.xlane.xlu0 %2630 }
 0x610   : > { %v2853_v41 = vadd.f32 %v7683_v51, %v2631_v24  ;;  %v2634_v38 = vpop.xlane.xlu1 %2633  ;;  %v7888_v51 = vld [vmem:[%s8672_s4 + $0x40] sm:$0xff] }
 0x611   : > { %v2854_v49 = vadd.f32 %v7667_v48, %v2634_v38  ;;  %v2793_v48 = vadd.f32 %v7853_v14, %v7608_v52  ;;  %v2795_v52 = vadd.f32 %v7871_v13, %v7622_v42  ;;  %v2826_v38 = vadd.f32 %v7860_v25, %v7800_v47 }
 0x612   : > { %v4791_v55 = vmul.f32 -1.442695, %v2853_v41  ;;  %v2794_v41 = vadd.f32 %v7860_v25, %v7610_v9  ;;  %v2828_v47 = vadd.f32 %v7876_v7, %v7804_v54 }
 0x613   : > { %v4792_v3 = vmul.f32 -1.442695, %v2854_v49  ;;  %v2637_v26 = vpop.xlane.xlu0 %2636  ;;  %v4764_v33 = vmul.f32 -1.442695, %v2826_v38 }
 0x614   : > { %4935 = vpow2.f32 %v4791_v55  ;;  %v2855_v27 = vadd.f32 %v7693_v35, %v2637_v26  ;;  %v2640_v10 = vpop.xlane.xlu1 %2639  ;;  %v4702_v26 = vmul.f32 -1.442695, %v2764_v22  ;;  %v2796_v22 = vadd.f32 %v7876_v7, %v7624_v50 }
 0x615   : > { %4937 = vpow2.f32 %v4792_v3  ;;  %v2856_v20 = vadd.f32 %v7715_v34, %v2640_v10  ;;  %v2765_v34 = vadd.f32 %v7888_v51, %v7438_v39  ;;  %v2766_v10 = vadd.f32 %v7894_v11, %v7440_v36 }
 0x616   : > { %4939 = vpow2.f32 %v4699_v45  ;;  %v4793_v35 = vmul.f32 -1.442695, %v2855_v27  ;;  %v4731_v3 = vmul.f32 -1.442695, %v2793_v48  ;;  %v4732_v27 = vmul.f32 -1.442695, %v2794_v41 }
 0x617   : > { %4941 = vpow2.f32 %v4700_v58  ;;  %v4794_v49 = vmul.f32 -1.442695, %v2856_v20  ;;  %v4703_v9 = vmul.f32 -1.442695, %v2765_v34  ;;  %v4704_v58 = vmul.f32 -1.442695, %v2766_v10 }
 0x618   : > { %4943 = vpow2.f32 %v4793_v35  ;;  %v4733_v55 = vmul.f32 -1.442695, %v2795_v52  ;;  %v2825_v39 = vadd.f32 %v7853_v14, %v7798_v15  ;;  %v4734_v36 = vmul.f32 -1.442695, %v2796_v22  ;;  %v2646_v35 = vpop.xlane.xlu1 %2645 }
 0x619   : > { %4945 = vpow2.f32 %v4794_v49  ;;  %v2827_v15 = vadd.f32 %v7871_v13, %v7802_v16 }
 0x61a   : > { %4947 = vpow2.f32 %v4701_v21  ;;  %v4763_v63 = vmul.f32 -1.442695, %v2825_v39  ;;  %v2643_v21 = vpop.xlane.xlu0 %2642 }
 0x61b   : > { %4949 = vpow2.f32 %v4702_v26  ;;  %v4765_v22 = vmul.f32 -1.442695, %v2827_v15  ;;  %v2857_v16 = vadd.f32 %v7853_v14, %v2643_v21  ;;  %v7926_v14 = vld [vmem:[%s8672_s4 + $0x58] sm:$0xff] }
 0x61c   : > { %4951 = vpow2.f32 %v4731_v3  ;;  %v2652_v39 = vpop.xlane.xlu1 %2651 }
 0x61d   : > { %4953 = vpow2.f32 %v4732_v27 }
 0x61e   : > { %4955 = vpow2.f32 %v4703_v9  ;;  %v4766_v9 = vmul.f32 -1.442695, %v2828_v47 }
 0x61f   : > { %4957 = vpow2.f32 %v4704_v58  ;;  %v2858_v58 = vadd.f32 %v7860_v25, %v2646_v35  ;;  %v4795_v25 = vmul.f32 -1.442695, %v2857_v16  ;;  %v2768_v35 = vadd.f32 %v7926_v14, %v7450_v5 }
 0x620   : > { %4959 = vpow2.f32 %v4733_v55  ;;  %v2649_v55 = vpop.xlane.xlu0 %2648 }
 0x621   : > { %v4936_v24 = vpop.eup %4935  ;;  %4961 = vpow2.f32 %v4734_v36 }
 0x622   : > { %v4938_v42 = vpop.eup %4937  ;;  %v3365_v45 = vadd.f32 1.0, %v4936_v24  ;;  %v7921_v24 = vld [vmem:[%s8672_s4 + $0x50] sm:$0xff] }
 0x623   : > { %v4940_v50 = vpop.eup %4939  ;;  %v3366_v20 = vadd.f32 1.0, %v4938_v42  ;;  %v2767_v21 = vadd.f32 %v7921_v24, %v7448_v1 }
 0x624   : > { %v4942_v48 = vpop.eup %4941  ;;  %4963 = vrcp.f32 %v3365_v45  ;;  %v3273_v49 = vadd.f32 1.0, %v4940_v50  ;;  %v4796_v50 = vmul.f32 -1.442695, %v2858_v58 }
 0x625   : > { %v4944_v26 = vpop.eup %4943  ;;  %4965 = vrcp.f32 %v3366_v20  ;;  %v3274_v3 = vadd.f32 1.0, %v4942_v48 }
 0x626   : > { %v4946_v41 = vpop.eup %4945  ;;  %4967 = vpow2.f32 %v4763_v63  ;;  %v3367_v34 = vadd.f32 1.0, %v4944_v26  ;;  %v2859_v63 = vadd.f32 %v7871_v13, %v2649_v55  ;;  %v7941_v13 = vld [vmem:[%s8672_s4 + $0x60] sm:$0xff] }
 0x627   : > { %v4948_v10 = vpop.eup %4947  ;;  %4969 = vpow2.f32 %v4764_v33  ;;  %v3368_v52 = vadd.f32 1.0, %v4946_v41  ;;  %v2860_v33 = vadd.f32 %v7876_v7, %v2652_v39  ;;  %v7946_v7 = vld [vmem:[%s8672_s4 + $0x68] sm:$0xff]  ;;  %v2769_v5 = vadd.f32 %v7941_v13, %v7458_v31 }
 0x628   : > { %v4950_v27 = vpop.eup %4949  ;;  %4971 = vrcp.f32 %v3367_v34  ;;  %v3275_v54 = vadd.f32 1.0, %v4948_v10  ;;  %v4797_v1 = vmul.f32 -1.442695, %v2859_v63  ;;  %v4705_v10 = vmul.f32 -1.442695, %v2767_v21 }
 0x629   : > { %4973 = vrcp.f32 %v3368_v52  ;;  %v4952_v36 = vpop.eup %4951  ;;  %v3276_v38 = vadd.f32 1.0, %v4950_v27  ;;  %v4706_v52 = vmul.f32 -1.442695, %v2768_v35  ;;  %v2770_v27 = vadd.f32 %v7946_v7, %v7460_v2 }
 0x62a   : > { %4975 = vrcp.f32 %v3273_v49  ;;  %v4954_v42 = vpop.eup %4953  ;;  %v3305_v48 = vadd.f32 1.0, %v4952_v36  ;;  %v4798_v49 = vmul.f32 -1.442695, %v2860_v33  ;;  %v2797_v31 = vadd.f32 %v7888_v51, %v7636_v57 }
 0x62b   : > { %4977 = vrcp.f32 %v3274_v3  ;;  %v7929_v45 = vpop.eup %4955  ;;  %v3306_v26 = vadd.f32 1.0, %v4954_v42  ;;  %v4708_v36 = vmul.f32 -1.442695, %v2770_v27  ;;  %v2798_v2 = vadd.f32 %v7894_v11, %v7638_v23 }
 0x62c   : > { %4979 = vpow2.f32 %v4765_v22  ;;  %v7932_v20 = vpop.eup %4957  ;;  %v4735_v33 = vmul.f32 -1.442695, %v2797_v31  ;;  %v2799_v57 = vadd.f32 %v7921_v24, %v7650_v40  ;;  %v2800_v23 = vadd.f32 %v7926_v14, %v7652_v56 }
 0x62d   : > { %4981 = vpow2.f32 %v4766_v9  ;;  %v4960_v15 = vpop.eup %4959  ;;  %v2829_v40 = vadd.f32 %v7888_v51, %v7806_v59  ;;  %v2830_v56 = vadd.f32 %v7894_v11, %v7808_v17  ;;  %v2831_v17 = vadd.f32 %v7921_v24, %v7810_v28 }
 0x62e   : > { %4983 = vrcp.f32 %v3275_v54  ;;  %v4962_v47 = vpop.eup %4961  ;;  %v3307_v16 = vadd.f32 1.0, %v4960_v15  ;;  %v4707_v54 = vmul.f32 -1.442695, %v2769_v5 }
 0x62f   : > { %4985 = vrcp.f32 %v3276_v38  ;;  %v3308_v58 = vadd.f32 1.0, %v4962_v47  ;;  %v4768_v59 = vmul.f32 -1.442695, %v2830_v56 }
 0x630   : > { %4987 = vpow2.f32 %v4795_v25 }
 0x631   : > { %v4964_v41 = vpop.eup %4963  ;;  %4989 = vpow2.f32 %v4796_v50 }
 0x632   : > { %v4966_v34 = vpop.eup %4965  ;;  %4991 = vrcp.f32 %v3305_v48  ;;  %3715 = vperm.xlu1 %4886, %v4964_v41   ;;  %v4736_v48 = vmul.f32 -1.442695, %v2798_v2  ;;  %v4737_v41 = vmul.f32 -1.442695, %v2799_v57 }
 0x633   : > { %v4968_v3 = vpop.eup %4967  ;;  %4993 = vrcp.f32 %v3306_v26  ;;  %3720 = vperm.xlu0 %4885, %v4966_v34   ;;  %v4738_v34 = vmul.f32 -1.442695, %v2800_v23 }
 0x634   : > { %v4970_v22 = vpop.eup %4969  ;;  %4995 = vpow2.f32 %v4797_v1  ;;  %v3337_v42 = vadd.f32 1.0, %v4968_v3 }
 0x635   : > { %v4972_v9 = vpop.eup %4971  ;;  %4997 = vpow2.f32 %v4798_v49  ;;  %v3338_v63 = vadd.f32 1.0, %v4970_v22  ;;  %v4767_v22 = vmul.f32 -1.442695, %v2829_v40 }
 0x636   : > { %v4974_v55 = vpop.eup %4973  ;;  %4999 = vpow2.f32 %v4705_v10  ;;  %3725 = vperm.xlu1 %4886, %v4972_v9   ;;  %v2655_v9 = vpop.xlane.xlu0 %2654 }
 0x637   : > { %v4976_v39 = vpop.eup %4975  ;;  %5001 = vpow2.f32 %v4706_v52  ;;  %3730 = vperm.xlu0 %4885, %v4974_v55  }
 0x638   : > { %v4978_v38 = vpop.eup %4977  ;;  %5003 = vrcp.f32 %v3307_v16 }
 0x639   : > { %v4980_v25 = vpop.eup %4979  ;;  %5005 = vrcp.f32 %v3308_v58 }
 0x63a   : > { %v4982_v50 = vpop.eup %4981  ;;  %5007 = vpow2.f32 %v4707_v54  ;;  %3751 = vperm.xlu1 %4886, %v4976_v39   ;;  %v3339_v35 = vadd.f32 1.0, %v4980_v25  ;;  %v2658_v54 = vpop.xlane.xlu1 %2657  ;;  %v2832_v39 = vadd.f32 %v7926_v14, %v7812_v37  ;;  %v3278_v25 = vadd.f32 1.0, %v7932_v20 }
 0x63b   : > { %v4984_v21 = vpop.eup %4983  ;;  %5009 = vpow2.f32 %v4708_v36  ;;  %3756 = vperm.xlu0 %4885, %v4978_v38   ;;  %v3340_v47 = vadd.f32 1.0, %v4982_v50  ;;  %v3277_v38 = vadd.f32 1.0, %v7929_v45  ;;  %v2861_v50 = vadd.f32 %v7888_v51, %v2655_v9  ;;  %v2661_v45 = vpop.xlane.xlu0 %2660 }
 0x63c   : > { %v4986_v15 = vpop.eup %4985  ;;  %5011 = vrcp.f32 %v3337_v42  ;;  %v2862_v57 = vadd.f32 %v7894_v11, %v2658_v54  ;;  %v7984_v11 = vld [vmem:[%s8672_s4 + $0x78] sm:$0xff] }
 0x63d   : > { %v4988_v26 = vpop.eup %4987  ;;  %5013 = vrcp.f32 %v3338_v63  ;;  %v4769_v63 = vmul.f32 -1.442695, %v2831_v17 }
 0x63e   : > { %v4990_v1 = vpop.eup %4989  ;;  %5015 = vpow2.f32 %v4735_v33  ;;  %3761 = vperm.xlu1 %4886, %v4984_v21   ;;  %v3369_v5 = vadd.f32 1.0, %v4988_v26  ;;  %v4770_v33 = vmul.f32 -1.442695, %v2832_v39  ;;  %v2664_v23 = vpop.xlane.xlu1 %2663  ;;  %v4799_v26 = vmul.f32 -1.442695, %v2861_v50 }
 0x63f   : > { %v4992_v49 = vpop.eup %4991  ;;  %5017 = vpow2.f32 %v4736_v48  ;;  %3766 = vperm.xlu0 %4885, %v4986_v15   ;;  %v3370_v52 = vadd.f32 1.0, %v4990_v1  ;;  %v2864_v40 = vadd.f32 %v7926_v14, %v2664_v23  ;;  %v8008_v39 = vpop.xlane.xlu0 %2666  ;;  %v2802_v50 = vadd.f32 %v7946_v7, %v7671_v61 }
 0x640   : > { %v4994_v10 = vpop.eup %4993  ;;  %5019 = vrcp.f32 %v3339_v35  ;;  %v7979_v35 = vld [vmem:[%s8672_s4 + $0x70] sm:$0xff] }
 0x641   : > { %v4996_v3 = vpop.eup %4995  ;;  %5021 = vrcp.f32 %v3340_v47  ;;  %v2863_v47 = vadd.f32 %v7921_v24, %v2661_v45  ;;  %v7995_v24 = vld [vmem:[%s8672_s4 + $0x80] sm:$0xff]  ;;  %v4740_v61 = vmul.f32 -1.442695, %v2802_v50 }
 0x642   : > { %v4998_v27 = vpop.eup %4997  ;;  %5023 = vpow2.f32 %v4737_v41  ;;  %3771 = vperm.xlu1 %4886, %v4992_v49   ;;  %v3371_v55 = vadd.f32 1.0, %v4996_v3  ;;  %v4800_v41 = vmul.f32 -1.442695, %v2862_v57  ;;  %v2773_v9 = vadd.f32 %v7995_v24, %v7478_v8 }
 0x643   : > { %v5000_v16 = vpop.eup %4999  ;;  %5025 = vpow2.f32 %v4738_v34  ;;  %3776 = vperm.xlu0 %4885, %v4994_v10   ;;  %v3372_v36 = vadd.f32 1.0, %v4998_v27  ;;  %v2771_v34 = vadd.f32 %v7979_v35, %v7468_v32  ;;  %v4801_v32 = vmul.f32 -1.442695, %v2863_v47 }
 0x644   : > { %v5002_v58 = vpop.eup %5001  ;;  %5027 = vrcp.f32 %v3369_v5  ;;  %v3279_v48 = vadd.f32 1.0, %v5000_v16  ;;  %v2772_v5 = vadd.f32 %v7984_v11, %v7470_v0  ;;  %v8002_v16 = vpop.xlane.xlu1 %2669  ;;  %v4711_v8 = vmul.f32 -1.442695, %v2773_v9 }
 0x645   : > { %v5004_v31 = vpop.eup %5003  ;;  %5029 = vrcp.f32 %v3370_v52  ;;  %v3280_v15 = vadd.f32 1.0, %v5002_v58  ;;  %v8000_v52 = vld [vmem:[%s8672_s4 + $0x88] sm:$0xff] }
 0x646   : > { %v5006_v2 = vpop.eup %5005  ;;  %5031 = vpow2.f32 %v4767_v22  ;;  %3781 = vperm.xlu1 %4886, %v5004_v31   ;;  %v4802_v22 = vmul.f32 -1.442695, %v2864_v40  ;;  %v4710_v17 = vmul.f32 -1.442695, %v2772_v5 }
 0x647   : > { %v7969_v42 = vpop.eup %5007  ;;  %5033 = vpow2.f32 %v4768_v59  ;;  %3786 = vperm.xlu0 %4885, %v5006_v2   ;;  %v4709_v59 = vmul.f32 -1.442695, %v2771_v34  ;;  %v2833_v34 = vadd.f32 %v7941_v13, %v7814_v4 }
 0x648   : > { %v7972_v28 = vpop.eup %5009  ;;  %5035 = vrcp.f32 %v3371_v55  ;;  %v2774_v55 = vadd.f32 %v8000_v52, %v7480_v29 }
 0x649   : > { %v5012_v37 = vpop.eup %5011  ;;  %5037 = vrcp.f32 %v3372_v36 }
 0x64a   : > { %v5014_v21 = vpop.eup %5013  ;;  %5039 = vrcp.f32 %v3277_v38  ;;  %3791 = vperm.xlu1 %4886, %v5012_v37   ;;  %v4712_v29 = vmul.f32 -1.442695, %v2774_v55  ;;  %v8014_v37 = vpop.xlane.xlu1 %2675 }
 0x64b   : > { %v5016_v20 = vpop.eup %5015  ;;  %5041 = vrcp.f32 %v3278_v25  ;;  %3796 = vperm.xlu0 %4885, %v5014_v21   ;;  %v2801_v25 = vadd.f32 %v7941_v13, %v7669_v60  ;;  %v2803_v60 = vadd.f32 %v7979_v35, %v7695_v12 }
 0x64c   : > { %v5018_v51 = vpop.eup %5017  ;;  %5043 = vpow2.f32 %v4769_v63  ;;  %v3309_v56 = vadd.f32 1.0, %v5016_v20  ;;  %v8018_v20 = vpop.xlane.xlu0 %2672 }
 0x64d   : > { %v5020_v1 = vpop.eup %5019  ;;  %5045 = vpow2.f32 %v4770_v33  ;;  %v3310_v3 = vadd.f32 1.0, %v5018_v51  ;;  %v4739_v23 = vmul.f32 -1.442695, %v2801_v25  ;;  %v2804_v51 = vadd.f32 %v7984_v11, %v7697_v62 }
 0x64e   : > { %v5022_v49 = vpop.eup %5021  ;;  %5047 = vrcp.f32 %v3279_v48  ;;  %3801 = vperm.xlu1 %4886, %v5020_v1   ;;  %v8022_v40 = vpop.xlane.xlu1 %2681  ;;  %v4741_v12 = vmul.f32 -1.442695, %v2803_v60  ;;  %v2834_v62 = vadd.f32 %v7946_v7, %v7816_v43  ;;  %v3282_v25 = vadd.f32 1.0, %v7972_v28 }
 0x64f   : > { %v5024_v10 = vpop.eup %5023  ;;  %5049 = vrcp.f32 %v3280_v15  ;;  %3806 = vperm.xlu0 %4885, %v5022_v49  }
 0x650   : > { %v5026_v14 = vpop.eup %5025  ;;  %5051 = vpow2.f32 %v4799_v26  ;;  %v3311_v31 = vadd.f32 1.0, %v5024_v10  ;;  %v4742_v10 = vmul.f32 -1.442695, %v2804_v51 }
 0x651   : > { %v5028_v27 = vpop.eup %5027  ;;  %5053 = vpow2.f32 %v4800_v41  ;;  %v3312_v2 = vadd.f32 1.0, %v5026_v14  ;;  %v8028_v14 = vpop.xlane.xlu0 %2678 }
 0x652   : > { %v5030_v0 = vpop.eup %5029  ;;  %5055 = vrcp.f32 %v3309_v56  ;;  %3811 = vperm.xlu1 %4886, %v5028_v27   ;;  %v8030_v9 = vpop.xlane.xlu1 %2687 }
 0x653   : > { %v5032_v58 = vpop.eup %5031  ;;  %5057 = vrcp.f32 %v3310_v3  ;;  %3816 = vperm.xlu0 %4885, %v5030_v0   ;;  %v4771_v0 = vmul.f32 -1.442695, %v2833_v34 }
 0x654   : > { %v5034_v54 = vpop.eup %5033  ;;  %5059 = vpow2.f32 %v4801_v32  ;;  %v3341_v57 = vadd.f32 1.0, %v5032_v58  ;;  %v2835_v58 = vadd.f32 %v7979_v35, %v7818_v19 }
 0x655   : > { %v5036_v36 = vpop.eup %5035  ;;  %5061 = vpow2.f32 %v4802_v22  ;;  %v3342_v21 = vadd.f32 1.0, %v5034_v54  ;;  %v2836_v54 = vadd.f32 %v7984_v11, %v7820_v18  ;;  %v2865_v18 = vadd.f32 %v7941_v13, %v8008_v39 }
 0x656   : > { %v5038_v38 = vpop.eup %5037  ;;  %5063 = vpow2.f32 %v4709_v59  ;;  %3821 = vperm.xlu1 %4886, %v5036_v36   ;;  %v4772_v59 = vmul.f32 -1.442695, %v2834_v62  ;;  %v2867_v39 = vadd.f32 %v7979_v35, %v8018_v20  ;;  %v8073_v20 = vld [vmem:[%s8672_s4 + $0xa0] sm:$0xff] }
 0x657   : > { %v5040_v63 = vpop.eup %5039  ;;  %5065 = vpow2.f32 %v4710_v17  ;;  %3826 = vperm.xlu0 %4885, %v5038_v38   ;;  %v8037_v38 = vpop.xlane.xlu0 %2684  ;;  %v4774_v50 = vmul.f32 -1.442695, %v2836_v54 }
 0x658   : > { %v5042_v33 = vpop.eup %5041  ;;  %5067 = vrcp.f32 %v3311_v31 }
 0x659   : > { %v5044_v45 = vpop.eup %5043  ;;  %5069 = vrcp.f32 %v3312_v2  ;;  %v3281_v2 = vadd.f32 1.0, %v7969_v42  ;;  %v2866_v42 = vadd.f32 %v7946_v7, %v8002_v16  ;;  %v8058_v7 = vld [vmem:[%s8672_s4 + $0x98] sm:$0xff]  ;;  %v4803_v16 = vmul.f32 -1.442695, %v2865_v18 }
 0x65a   : > { %v5046_v48 = vpop.eup %5045  ;;  %5071 = vpow2.f32 %v4711_v8  ;;  %3895 = vperm.xlu1 %4886, %v5040_v63   ;;  %v3343_v47 = vadd.f32 1.0, %v5044_v45  ;;  %v4773_v63 = vmul.f32 -1.442695, %v2835_v58  ;;  %v2776_v35 = vadd.f32 %v8058_v7, %v7490_v44 }
 0x65b   : > { %v5048_v15 = vpop.eup %5047  ;;  %5073 = vpow2.f32 %v4712_v29  ;;  %3900 = vperm.xlu0 %4885, %v5042_v33   ;;  %v3344_v41 = vadd.f32 1.0, %v5046_v48  ;;  %v8048_v33 = vpop.xlane.xlu1 %2693  ;;  %v8053_v48 = vld [vmem:[%s8672_s4 + $0x90] sm:$0xff]  ;;  %v2805_v58 = vadd.f32 %v7995_v24, %v7718_v53  ;;  %v8873_v53 = vld [vmem:[#allocation32_spill] sm:$0xff] }
 0x65c   : > { %v5050_v26 = vpop.eup %5049  ;;  %5075 = vrcp.f32 %v3341_v57 }
 0x65d   : > { %v5052_v1 = vpop.eup %5051  ;;  %5077 = vrcp.f32 %v3342_v21 }
 0x65e   : > { %v5054_v49 = vpop.eup %5053  ;;  %5079 = vpow2.f32 %v4739_v23  ;;  %3905 = vperm.xlu1 %4886, %v5048_v15   ;;  %v3373_v3 = vadd.f32 1.0, %v5052_v1  ;;  %v8062_v23 = vpop.xlane.xlu0 %2690  ;;  %v4804_v15 = vmul.f32 -1.442695, %v2866_v42 }
 0x65f   : > { %v5056_v56 = vpop.eup %5055  ;;  %5081 = vpow2.f32 %v4740_v61  ;;  %3910 = vperm.xlu0 %4885, %v5050_v26   ;;  %v3374_v27 = vadd.f32 1.0, %v5054_v49  ;;  %v2868_v61 = vadd.f32 %v7984_v11, %v8014_v37  ;;  %v2775_v26 = vadd.f32 %v8053_v48, %v7488_v46  ;;  %v8075_v49 = vpop.xlane.xlu1 %2699  ;;  %v8080_v46 = vld [vmem:[%s8672_s4 + $0xa8] sm:$0xff] }
 0x660   : > { %v5058_v5 = vpop.eup %5057  ;;  %5083 = vrcp.f32 %v3343_v47  ;;  %v4805_v37 = vmul.f32 -1.442695, %v2867_v39 }
 0x661   : > { %v5060_v32 = vpop.eup %5059  ;;  %5085 = vrcp.f32 %v3344_v41  ;;  %v4806_v44 = vmul.f32 -1.442695, %v2868_v61 }
 0x662   : > { %v5062_v22 = vpop.eup %5061  ;;  %5087 = vpow2.f32 %v4741_v12  ;;  %3915 = vperm.xlu1 %4886, %v5056_v56   ;;  %v3375_v17 = vadd.f32 1.0, %v5060_v32  ;;  %v4713_v56 = vmul.f32 -1.442695, %v2775_v26  ;;  %v8084_v62 = vpop.xlane.xlu0 %2696  ;;  %v2778_v32 = vadd.f32 %v8080_v46, %v7503_v30 }
 0x663   : > { %v5064_v4 = vpop.eup %5063  ;;  %5089 = vpow2.f32 %v4742_v10  ;;  %3920 = vperm.xlu0 %4885, %v5058_v5   ;;  %v3376_v31 = vadd.f32 1.0, %v5062_v22  ;;  %v2777_v10 = vadd.f32 %v8073_v20, %v7501_v6 }
 0x664   : > { %v5066_v43 = vpop.eup %5065  ;;  %5091 = vrcp.f32 %v3373_v3  ;;  %v3283_v28 = vadd.f32 1.0, %v5064_v4  ;;  %v4714_v3 = vmul.f32 -1.442695, %v2776_v35  ;;  %v4716_v30 = vmul.f32 -1.442695, %v2778_v32 }
 0x665   : > { %v5068_v55 = vpop.eup %5067  ;;  %5093 = vrcp.f32 %v3374_v27  ;;  %v3284_v21 = vadd.f32 1.0, %v5066_v43  ;;  %v4715_v43 = vmul.f32 -1.442695, %v2777_v10 }
 0x666   : > { %v5070_v36 = vpop.eup %5069  ;;  %5095 = vpow2.f32 %v4771_v0  ;;  %3925 = vperm.xlu1 %4886, %v5068_v55   ;;  %v8872_v55 = vld [vmem:[#allocation33_spill] sm:$0xff] }
 0x667   : > { %v8039_v8 = vpop.eup %5071  ;;  %5097 = vpow2.f32 %v4772_v59  ;;  %3930 = vperm.xlu0 %4885, %v5070_v36   ;;  %v8088_v59 = vpop.xlane.xlu1 %2705  ;;  %v2806_v54 = vadd.f32 %v8000_v52, %v8872_v55 }
 0x668   : > { %v8042_v19 = vpop.eup %5073  ;;  %5099 = vrcp.f32 %v3375_v17 }
 0x669   : > { %v5076_v29 = vpop.eup %5075  ;;  %5101 = vrcp.f32 %v3376_v31 }
 0x66a   : > { %v5078_v57 = vpop.eup %5077  ;;  %5103 = vrcp.f32 %v3281_v2  ;;  %3935 = vperm.xlu1 %4886, %v5076_v29   ;;  %v8094_v2 = vpop.xlane.xlu0 %2702  ;;  %v4743_v29 = vmul.f32 -1.442695, %v2805_v58  ;;  %v8878_v58 = vld [vmem:[#allocation15_spill] sm:$0xff] }
 0x66b   : > { %v5080_v45 = vpop.eup %5079  ;;  %5105 = vrcp.f32 %v3282_v25  ;;  %3940 = vperm.xlu0 %4885, %v5078_v57   ;;  %v4744_v57 = vmul.f32 -1.442695, %v2806_v54  ;;  %v3285_v54 = vadd.f32 1.0, %v8039_v8  ;;  %v2870_v8 = vadd.f32 %v8000_v52, %v8022_v40 }
 0x66c   : > { %v5082_v13 = vpop.eup %5081  ;;  %5107 = vpow2.f32 %v4773_v63  ;;  %v3313_v47 = vadd.f32 1.0, %v5080_v45 }
 0x66d   : > { %v5084_v60 = vpop.eup %5083  ;;  %5109 = vpow2.f32 %v4774_v50  ;;  %v3314_v41 = vadd.f32 1.0, %v5082_v13  ;;  %v2807_v50 = vadd.f32 %v8053_v48, %v8873_v53 }
 0x66e   : > { %v5086_v51 = vpop.eup %5085  ;;  %5111 = vrcp.f32 %v3283_v28  ;;  %3945 = vperm.xlu1 %4886, %v5084_v60   ;;  %v8874_v28 = vld [vmem:[#allocation35_spill] sm:$0xff] }
 0x66f   : > { %v5088_v1 = vpop.eup %5087  ;;  %5113 = vrcp.f32 %v3284_v21  ;;  %3950 = vperm.xlu0 %4885, %v5086_v51   ;;  %v2808_v45 = vadd.f32 %v8058_v7, %v8874_v28  ;;  %v8100_v21 = vpop.xlane.xlu1 %2711  ;;  %v4745_v61 = vmul.f32 -1.442695, %v2807_v50  ;;  %v8875_v51 = vld [vmem:[#allocation63_spill] sm:$0xff] }
 0x670   : > { %v5090_v11 = vpop.eup %5089  ;;  %5115 = vpow2.f32 %v4803_v16  ;;  %v3315_v22 = vadd.f32 1.0, %v5088_v1  ;;  %v2837_v26 = vadd.f32 %v7995_v24, %v8875_v51  ;;  %v8879_v51 = vld [vmem:[#allocation11_spill] sm:$0xff] }
 0x671   : > { %v5092_v12 = vpop.eup %5091  ;;  %5117 = vpow2.f32 %v4804_v15  ;;  %v3316_v4 = vadd.f32 1.0, %v5090_v11  ;;  %v4746_v35 = vmul.f32 -1.442695, %v2808_v45 }
 0x672   : > { %v5094_v34 = vpop.eup %5093  ;;  %5119 = vrcp.f32 %v3313_v47  ;;  %3955 = vperm.xlu1 %4886, %v5092_v12   ;;  %v8104_v47 = vpop.xlane.xlu0 %2708 }
 0x673   : > { %v5096_v5 = vpop.eup %5095  ;;  %5121 = vrcp.f32 %v3314_v41  ;;  %3960 = vperm.xlu0 %4885, %v5094_v34   ;;  %v8876_v41 = vld [vmem:[#allocation13_spill] sm:$0xff] }
 0x674   : > { %v5098_v27 = vpop.eup %5097  ;;  %5123 = vpow2.f32 %v4805_v37  ;;  %v3345_v36 = vadd.f32 1.0, %v5096_v5  ;;  %v2838_v11 = vadd.f32 %v8000_v52, %v8876_v41  ;;  %v4775_v5 = vmul.f32 -1.442695, %v2837_v26  ;;  %v8138_v52 = vld [vmem:[%s8672_s4 + $0xb8] sm:$0xff] }
 0x675   : > { %v5100_v0 = vpop.eup %5099  ;;  %5125 = vpow2.f32 %v4806_v44  ;;  %v3346_v63 = vadd.f32 1.0, %v5098_v27 }
 0x676   : > { %v5102_v6 = vpop.eup %5101  ;;  %5127 = vpow2.f32 %v4713_v56  ;;  %3965 = vperm.xlu1 %4886, %v5100_v0   ;;  %v8108_v56 = vpop.xlane.xlu1 %2717  ;;  %v4776_v32 = vmul.f32 -1.442695, %v2838_v11 }
 0x677   : > { %v5104_v17 = vpop.eup %5103  ;;  %5129 = vpow2.f32 %v4714_v3  ;;  %3970 = vperm.xlu0 %4885, %v5102_v6   ;;  %v8112_v6 = vpop.xlane.xlu0 %2714 }
 0x678   : > { %v5106_v31 = vpop.eup %5105  ;;  %5131 = vrcp.f32 %v3315_v22  ;;  %v8877_v22 = vld [vmem:[#allocation12_spill] sm:$0xff] }
 0x679   : > { %v5108_v25 = vpop.eup %5107  ;;  %5133 = vrcp.f32 %v3316_v4  ;;  %v2839_v0 = vadd.f32 %v8053_v48, %v8877_v22 }
 0x67a   : > { %v5110_v18 = vpop.eup %5109  ;;  %5135 = vpow2.f32 %v4715_v43  ;;  %3991 = vperm.xlu1 %4886, %v5104_v17   ;;  %v3347_v16 = vadd.f32 1.0, %v5108_v25  ;;  %v2840_v17 = vadd.f32 %v8058_v7, %v8878_v58  ;;  %v8120_v25 = vpop.xlane.xlu1 %2723 }
 0x67b   : > { %v5112_v42 = vpop.eup %5111  ;;  %5137 = vpow2.f32 %v4716_v30  ;;  %3996 = vperm.xlu0 %4885, %v5106_v31   ;;  %v3348_v60 = vadd.f32 1.0, %v5110_v18  ;;  %v4777_v18 = vmul.f32 -1.442695, %v2839_v0  ;;  %v8882_v0 = vld [vmem:[#allocation16_spill] sm:$0xff] }
 0x67c   : > { %v5114_v13 = vpop.eup %5113  ;;  %5139 = vrcp.f32 %v3345_v36  ;;  %v3286_v36 = vadd.f32 1.0, %v8042_v19  ;;  %v4778_v50 = vmul.f32 -1.442695, %v2840_v17 }
 0x67d   : > { %v5116_v39 = vpop.eup %5115  ;;  %5141 = vrcp.f32 %v3346_v63 }
 0x67e   : > { %v5118_v15 = vpop.eup %5117  ;;  %5143 = vpow2.f32 %v4743_v29  ;;  %4001 = vperm.xlu1 %4886, %v5112_v42   ;;  %v3377_v12 = vadd.f32 1.0, %v5116_v39  ;;  %v2869_v29 = vadd.f32 %v7995_v24, %v8028_v14  ;;  %v2871_v14 = vadd.f32 %v8053_v48, %v8037_v38  ;;  %v8880_v38 = vld [vmem:[#allocation10_spill] sm:$0xff] }
 0x67f   : > { %v5120_v1 = vpop.eup %5119  ;;  %5145 = vpow2.f32 %v4744_v57  ;;  %4006 = vperm.xlu0 %4885, %v5114_v13   ;;  %v3378_v34 = vadd.f32 1.0, %v5118_v15  ;;  %v8128_v57 = vpop.xlane.xlu0 %2720  ;;  %v8133_v13 = vld [vmem:[%s8672_s4 + $0xb0] sm:$0xff]  ;;  %v4808_v39 = vmul.f32 -1.442695, %v2870_v8  ;;  %v2780_v48 = vadd.f32 %v8138_v52, %v8880_v38 }
 0x680   : > { %v5122_v37 = vpop.eup %5121  ;;  %5147 = vrcp.f32 %v3347_v16  ;;  %v4807_v40 = vmul.f32 -1.442695, %v2869_v29  ;;  %v8144_v15 = vpop.permute.xlu1 %3660  ;;  %v2779_v26 = vadd.f32 %v8133_v13, %v8879_v51  ;;  %v8883_v29 = vld [vmem:[#allocation34_spill] sm:$0xff] }
 0x681   : > { %v5124_v44 = vpop.eup %5123  ;;  %5149 = vrcp.f32 %v3348_v60  ;;  %v2872_v60 = vadd.f32 %v8058_v7, %v8030_v9  ;;  %v8155_v9 = vld [vmem:[%s8672_s4 + $0xc0] sm:$0xff]  ;;  %v4718_v22 = vmul.f32 -1.442695, %v2780_v48 }
 0x682   : > { %v5126_v10 = vpop.eup %5125  ;;  %5151 = vpow2.f32 %v4745_v61  ;;  %4011 = vperm.xlu1 %4886, %v5120_v1   ;;  %v3379_v4 = vadd.f32 1.0, %v5124_v44 }
 0x683   : > { %v5128_v3 = vpop.eup %5127  ;;  %5153 = vpow2.f32 %v4746_v35  ;;  %4016 = vperm.xlu0 %4885, %v5122_v37   ;;  %v3380_v30 = vadd.f32 1.0, %v5126_v10  ;;  %v8148_v35 = vpop.permute.xlu0 %3655  ;;  %v8160_v37 = vld [vmem:[%s8672_s4 + $0xc8] sm:$0xff] }
 0x684   : > { %v5130_v27 = vpop.eup %5129  ;;  %5155 = vrcp.f32 %v3377_v12  ;;  %v3287_v19 = vadd.f32 1.0, %v5128_v3  ;;  %v4809_v12 = vmul.f32 -1.442695, %v2871_v14  ;;  %v8881_v3 = vld [vmem:[#allocation17_spill] sm:$0xff] }
 0x685   : > { %v5132_v43 = vpop.eup %5131  ;;  %5157 = vrcp.f32 %v3378_v34  ;;  %v3288_v45 = vadd.f32 1.0, %v5130_v27  ;;  %v4810_v34 = vmul.f32 -1.442695, %v2872_v60  ;;  %v8885_v60 = vld [vmem:[#allocation40_spill] sm:$0xff] }
 0x686   : > { %v5134_v55 = vpop.eup %5133  ;;  %5159 = vpow2.f32 %v4775_v5  ;;  %4021 = vperm.xlu1 %4886, %v5132_v43   ;;  %v4717_v5 = vmul.f32 -1.442695, %v2779_v26  ;;  %v8166_v43 = vpop.permute.xlu1 %3665 }
 0x687   : > { %v8117_v31 = vpop.eup %5135  ;;  %5161 = vpow2.f32 %v4776_v32  ;;  %4026 = vperm.xlu0 %4885, %v5134_v55   ;;  %v2781_v32 = vadd.f32 %v8155_v9, %v8881_v3 }
 0x688   : > { %v8122_v63 = vpop.eup %5137  ;;  %5163 = vrcp.f32 %v3379_v4  ;;  %v2782_v4 = vadd.f32 %v8160_v37, %v8882_v0 }
 0x689   : > { %v5140_v53 = vpop.eup %5139  ;;  %5165 = vrcp.f32 %v3380_v30  ;;  %v8168_v30 = vpop.permute.xlu0 %3670 }
 0x68a   : > { %v5142_v42 = vpop.eup %5141  ;;  %5167 = vrcp.f32 %v3285_v54  ;;  %4031 = vperm.xlu1 %4886, %v5140_v53   ;;  %v2809_v53 = vadd.f32 %v8073_v20, %v8883_v29  ;;  %v4720_v8 = vmul.f32 -1.442695, %v2782_v4  ;;  %v8174_v14 = vpop.permute.xlu1 %3675 }
 0x68b   : > { %v5144_v28 = vpop.eup %5143  ;;  %5169 = vrcp.f32 %v3286_v36  ;;  %4036 = vperm.xlu0 %4885, %v5142_v42   ;;  %v8884_v42 = vld [vmem:[#allocation41_spill] sm:$0xff] }
 0x68c   : > { %v5146_v24 = vpop.eup %5145  ;;  %5171 = vpow2.f32 %v4777_v18  ;;  %v3317_v1 = vadd.f32 1.0, %v5144_v28  ;;  %v4719_v18 = vmul.f32 -1.442695, %v2781_v32 }
 0x68d   : > { %v5148_v16 = vpop.eup %5147  ;;  %5173 = vpow2.f32 %v4778_v50  ;;  %v3318_v7 = vadd.f32 1.0, %v5146_v24  ;;  %v8178_v51 = vpop.permute.xlu0 %3680 }
 0x68e   : > { %v5150_v61 = vpop.eup %5149  ;;  %5175 = vrcp.f32 %v3287_v19  ;;  %4041 = vperm.xlu1 %4886, %v5148_v16   ;;  %v2810_v19 = vadd.f32 %v8080_v46, %v8884_v42  ;;  %v8186_v0 = vpop.permute.xlu1 %3685  ;;  %v8889_v42 = vld [vmem:[#allocation20_spill] sm:$0xff] }
 0x68f   : > { %v5152_v41 = vpop.eup %5151  ;;  %5177 = vrcp.f32 %v3288_v45  ;;  %4046 = vperm.xlu0 %4885, %v5150_v61   ;;  %v2811_v61 = vadd.f32 %v8133_v13, %v8885_v60 }
 0x690   : > { %v5154_v11 = vpop.eup %5153  ;;  %5179 = vpow2.f32 %v4807_v40  ;;  %v3319_v17 = vadd.f32 1.0, %v5152_v41  ;;  %v8886_v41 = vld [vmem:[#allocation43_spill] sm:$0xff] }
 0x691   : > { %v5156_v44 = vpop.eup %5155  ;;  %5181 = vpow2.f32 %v4808_v39  ;;  %v3320_v54 = vadd.f32 1.0, %v5154_v11  ;;  %v4747_v39 = vmul.f32 -1.442695, %v2809_v53  ;;  %v2812_v38 = vadd.f32 %v8138_v52, %v8886_v41 }
 0x692   : > { %v5158_v10 = vpop.eup %5157  ;;  %5183 = vrcp.f32 %v3317_v1  ;;  %4051 = vperm.xlu1 %4886, %v5156_v44   ;;  %v4748_v1 = vmul.f32 -1.442695, %v2810_v19  ;;  %v2843_v19 = vadd.f32 %v8133_v13, %v8889_v42 }
 0x693   : > { %v5160_v27 = vpop.eup %5159  ;;  %5185 = vrcp.f32 %v3318_v7  ;;  %4056 = vperm.xlu0 %4885, %v5158_v10   ;;  %v8887_v10 = vld [vmem:[#allocation14_spill] sm:$0xff]  ;;  %v4750_v32 = vmul.f32 -1.442695, %v2812_v38 }
 0x694   : > { %v5162_v58 = vpop.eup %5161  ;;  %5187 = vpow2.f32 %v4809_v12  ;;  %v3349_v45 = vadd.f32 1.0, %v5160_v27  ;;  %v8888_v27 = vld [vmem:[#allocation21_spill] sm:$0xff]  ;;  %v4781_v38 = vmul.f32 -1.442695, %v2843_v19  ;;  %v8892_v19 = vld [vmem:[#allocation18_spill] sm:$0xff] }
 0x695   : > { %v5164_v55 = vpop.eup %5163  ;;  %5189 = vpow2.f32 %v4810_v34  ;;  %v3350_v40 = vadd.f32 1.0, %v5162_v58  ;;  %v4749_v34 = vmul.f32 -1.442695, %v2811_v61  ;;  %v3289_v61 = vadd.f32 1.0, %v8117_v31 }
 0x696   : > { %v5166_v36 = vpop.eup %5165  ;;  %5191 = vpow2.f32 %v4717_v5  ;;  %4061 = vperm.xlu1 %4886, %v5164_v55   ;;  %v2841_v5 = vadd.f32 %v8073_v20, %v8887_v10  ;;  %v2874_v31 = vadd.f32 %v8080_v46, %v8048_v33 }
 0x697   : > { %v5168_v50 = vpop.eup %5167  ;;  %5193 = vpow2.f32 %v4718_v22  ;;  %4066 = vperm.xlu0 %4885, %v5166_v36   ;;  %v2842_v22 = vadd.f32 %v8080_v46, %v8888_v27  ;;  %v2876_v27 = vadd.f32 %v8138_v52, %v8075_v49 }
 0x698   : > { %v5170_v28 = vpop.eup %5169  ;;  %5195 = vrcp.f32 %v3319_v17  ;;  %v8188_v17 = vpop.permute.xlu0 %3690 }
 0x699   : > { %v5172_v24 = vpop.eup %5171  ;;  %5197 = vrcp.f32 %v3320_v54  ;;  %v4780_v53 = vmul.f32 -1.442695, %v2842_v22 }
 0x69a   : > { %v5174_v16 = vpop.eup %5173  ;;  %5199 = vpow2.f32 %v4719_v18  ;;  %4135 = vperm.xlu1 %4886, %v5168_v50   ;;  %v3351_v7 = vadd.f32 1.0, %v5172_v24  ;;  %v4779_v18 = vmul.f32 -1.442695, %v2841_v5  ;;  %v8190_v50 = vpop.permute.xlu1 %3695 }
 0x69b   : > { %v5176_v26 = vpop.eup %5175  ;;  %5201 = vpow2.f32 %v4720_v8  ;;  %4140 = vperm.xlu0 %4885, %v5170_v28   ;;  %v3352_v12 = vadd.f32 1.0, %v5174_v16 }
 0x69c   : > { %v5178_v48 = vpop.eup %5177  ;;  %5203 = vrcp.f32 %v3349_v45  ;;  %v8194_v45 = vpop.permute.xlu0 %3700 }
 0x69d   : > { %v5180_v11 = vpop.eup %5179  ;;  %5205 = vrcp.f32 %v3350_v40  ;;  %v8890_v40 = vld [vmem:[#allocation23_spill] sm:$0xff] }
 0x69e   : > { %v5182_v44 = vpop.eup %5181  ;;  %5207 = vpow2.f32 %v4747_v39  ;;  %4145 = vperm.xlu1 %4886, %v5176_v26   ;;  %v3381_v58 = vadd.f32 1.0, %v5180_v11  ;;  %v2844_v16 = vadd.f32 %v8138_v52, %v8890_v40 }
 0x69f   : > { %v5184_v3 = vpop.eup %5183  ;;  %5209 = vpow2.f32 %v4748_v1  ;;  %4150 = vperm.xlu0 %4885, %v5178_v48   ;;  %v3382_v54 = vadd.f32 1.0, %v5182_v44  ;;  %v3290_v1 = vadd.f32 1.0, %v8122_v63  ;;  %v2873_v48 = vadd.f32 %v8073_v20, %v8062_v23  ;;  %v8215_v23 = vld [vmem:[%s8672_s4 + $0xd0] sm:$0xff] }
 0x6a0   : > { %v5186_v4 = vpop.eup %5185  ;;  %5211 = vrcp.f32 %v3351_v7  ;;  %v4782_v11 = vmul.f32 -1.442695, %v2844_v16  ;;  %v2875_v20 = vadd.f32 %v8133_v13, %v8084_v62  ;;  %v8230_v62 = vld [vmem:[%s8672_s4 + $0xd8] sm:$0xff] }
 0x6a1   : > { %v5188_v55 = vpop.eup %5187  ;;  %5213 = vrcp.f32 %v3352_v12  ;;  %v8208_v12 = vpop.permute.xlu1 %3705  ;;  %v4811_v33 = vmul.f32 -1.442695, %v2873_v48 }
 0x6a2   : > { %v5190_v36 = vpop.eup %5189  ;;  %5215 = vpow2.f32 %v4749_v34  ;;  %4155 = vperm.xlu1 %4886, %v5184_v3   ;;  %v3383_v28 = vadd.f32 1.0, %v5188_v55  ;;  %v8210_v34 = vpop.permute.xlu0 %3710  ;;  %v4813_v52 = vmul.f32 -1.442695, %v2875_v20 }
 0x6a3   : > { %v5192_v29 = vpop.eup %5191  ;;  %5217 = vpow2.f32 %v4750_v32  ;;  %4160 = vperm.xlu0 %4885, %v5186_v4   ;;  %v3384_v39 = vadd.f32 1.0, %v5190_v36  ;;  %v4812_v32 = vmul.f32 -1.442695, %v2874_v31  ;;  %v8891_v36 = vld [vmem:[#allocation19_spill] sm:$0xff] }
 0x6a4   : > { %v5194_v8 = vpop.eup %5193  ;;  %5219 = vrcp.f32 %v3381_v58  ;;  %v3291_v63 = vadd.f32 1.0, %v5192_v29 }
 0x6a5   : > { %v5196_v24 = vpop.eup %5195  ;;  %5221 = vrcp.f32 %v3382_v54  ;;  %v3292_v5 = vadd.f32 1.0, %v5194_v8 }
 0x6a6   : > { %v5198_v60 = vpop.eup %5197  ;;  %5223 = vpow2.f32 %v4779_v18  ;;  %4165 = vperm.xlu1 %4886, %v5196_v24   ;;  %v2783_v18 = vadd.f32 %v8215_v23, %v8891_v36 }
 0x6a7   : > { %v8199_v26 = vpop.eup %5199  ;;  %5225 = vpow2.f32 %v4780_v53  ;;  %4170 = vperm.xlu0 %4885, %v5198_v60   ;;  %v4814_v53 = vmul.f32 -1.442695, %v2876_v27 }
 0x6a8   : > { %v8202_v41 = vpop.eup %5201  ;;  %5227 = vrcp.f32 %v3383_v28  ;;  %v2784_v28 = vadd.f32 %v8230_v62, %v8892_v19  ;;  %v4721_v16 = vmul.f32 -1.442695, %v2783_v18 }
 0x6a9   : > { %v5204_v7 = vpop.eup %5203  ;;  %5229 = vrcp.f32 %v3384_v39  ;;  %v8893_v39 = vld [vmem:[#allocation42_spill] sm:$0xff] }
 0x6aa   : > { %v5206_v44 = vpop.eup %5205  ;;  %5231 = vrcp.f32 %v3289_v61  ;;  %4175 = vperm.xlu1 %4886, %v5204_v7   ;;  %v2813_v60 = vadd.f32 %v8155_v9, %v8893_v39  ;;  %v4722_v31 = vmul.f32 -1.442695, %v2784_v28  ;;  %v8896_v39 = vld [vmem:[#allocation52_spill] sm:$0xff] }
 0x6ab   : > { %v5208_v10 = vpop.eup %5207  ;;  %5233 = vrcp.f32 %v3290_v1  ;;  %4180 = vperm.xlu0 %4885, %v5206_v44   ;;  %v8894_v44 = vld [vmem:[#allocation50_spill] sm:$0xff] }
 0x6ac   : > { %v5210_v3 = vpop.eup %5209  ;;  %5235 = vpow2.f32 %v4781_v38  ;;  %v3321_v58 = vadd.f32 1.0, %v5208_v10  ;;  %v5460_v10 = vld [vmem:[%s5711_s28] sm:$0xff] }
 0x6ad   : > { %v5212_v46 = vpop.eup %5211  ;;  %5237 = vpow2.f32 %v4782_v11  ;;  %v8221_v22 = vpop.permute.xlu1 %3715  ;;  %v3322_v13 = vadd.f32 1.0, %v5210_v3 }
 0x6ae   : > { %v5214_v4 = vpop.eup %5213  ;;  %5239 = vrcp.f32 %v3291_v63  ;;  %4185 = vperm.xlu1 %4886, %v5212_v46   ;;  %v8223_v55 = vpop.permute.xlu0 %3720  ;;  %v2814_v63 = vadd.f32 %v8160_v37, %v8894_v44  ;;  %v4751_v46 = vmul.f32 -1.442695, %v2813_v60  ;;  %v2816_v60 = vadd.f32 %v8230_v62, %v8896_v39 }
 0x6af   : > { %v5216_v54 = vpop.eup %5215  ;;  %5241 = vrcp.f32 %v3292_v5  ;;  %4190 = vperm.xlu0 %4885, %v5214_v4   ;;  %v3733_v5 = vmul.f32 %v5460_v10, %v8148_v35  ;;  %v8895_v35 = vld [vmem:[#allocation49_spill] sm:$0xff] }
 0x6b0   : > { %v5218_v49 = vpop.eup %5217  ;;  %5243 = vpow2.f32 %v4811_v33  ;;  %v3323_v1 = vadd.f32 1.0, %v5216_v54 }
 0x6b1   : > { %v5220_v29 = vpop.eup %5219  ;;  %5245 = vpow2.f32 %v4812_v32  ;;  %v8232_v8 = vpop.permute.xlu1 %3725  ;;  %v3324_v48 = vadd.f32 1.0, %v5218_v49  ;;  %v5461_v32 = vld [vmem:[%s5711_s28 + $0x20] sm:$0xff] }
 0x6b2   : > { %v5222_v42 = vpop.eup %5221  ;;  %5247 = vrcp.f32 %v3321_v58  ;;  %4195 = vperm.xlu1 %4886, %v5220_v29   ;;  %v8236_v24 = vpop.permute.xlu0 %3730  ;;  %v3734_v27 = vmul.f32 %v5461_v32, %v8144_v15 }
 0x6b3   : > { %v5224_v40 = vpop.eup %5223  ;;  %5249 = vrcp.f32 %v3322_v13  ;;  %4200 = vperm.xlu0 %4885, %v5222_v42   ;;  %v2815_v13 = vadd.f32 %v8215_v23, %v8895_v35  ;;  %v5462_v42 = vld [vmem:[%s5711_s28 + $0x40] sm:$0xff] }
 0x6b4   : > { %v5226_v61 = vpop.eup %5225  ;;  %5251 = vpow2.f32 %v4813_v52  ;;  %v3353_v54 = vadd.f32 1.0, %v5224_v40  ;;  %v3735_v19 = vmul.f32 %v5462_v42, %v8166_v43  ;;  %v5465_v35 = vld [vmem:[%s5711_s28 + $0xa0] sm:$0xff] }
 0x6b5   : > { %v5228_v38 = vpop.eup %5227  ;;  %5253 = vpow2.f32 %v4814_v53  ;;  %v3752_v7 = vpop.permute.xlu1 %3751  ;;  %v3354_v49 = vadd.f32 1.0, %v5226_v61  ;;  %v4752_v53 = vmul.f32 -1.442695, %v2814_v63  ;;  %v5463_v61 = vld [vmem:[%s5711_s28 + $0x60] sm:$0xff]  ;;  %v4753_v44 = vmul.f32 -1.442695, %v2815_v13 }
 0x6b6   : > { %v5230_v11 = vpop.eup %5229  ;;  %v3829_v3 = vmul.f32 %v5460_v10, %v3752_v7  ;;  %4205 = vperm.xlu1 %4886, %v5228_v38   ;;  %v3757_v33 = vpop.permute.xlu0 %3756  ;;  %5255 = vpow2.f32 %v4721_v16  ;;  %v3738_v13 = vmul.f32 %v5465_v35, %v8178_v51 }
 0x6b7   : > { %v5232_v20 = vpop.eup %5231  ;;  %v3830_v4 = vmul.f32 %v5461_v32, %v3757_v33  ;;  %4210 = vperm.xlu0 %4885, %v5230_v11   ;;  %5257 = vrcp.f32 %v3323_v1  ;;  %v3736_v1 = vmul.f32 %v5463_v61, %v8168_v30  ;;  %v8897_v33 = vld [vmem:[#allocation22_spill] sm:$0xff] }
 0x6b8   : > { %v5234_v58 = vpop.eup %5233  ;;  %v3845_v36 = vsel %vm262_vm0, %v3733_v5, %v3829_v3  ;;  %5259 = vrcp.f32 %v3324_v48  ;;  %v8273_v3 = vld [vmem:[%s8672_s4 + $0xe8] sm:$0xff] }
 0x6b9   : > { %v5236_v18 = vpop.eup %5235  ;;  %3861 = vst [vmem:[%s8251_s13] sm:$0xff] %v3845_v36  ;;  %v3846_v15 = vsel %vm262_vm0, %v3734_v27, %v3830_v4  ;;  %v3762_v52 = vpop.permute.xlu1 %3761  ;;  %5261 = vpow2.f32 %v4722_v31  ;;  %v8266_v31 = vld [vmem:[%s8672_s4 + $0xe0] sm:$0xff]  ;;  %v8898_v36 = vld [vmem:[#allocation29_spill] sm:$0xff] }
 0x6ba   : > { %v5238_v29 = vpop.eup %5237  ;;  %3862 = vst [vmem:[%s8251_s13 + $0x20] sm:$0xff] %v3846_v15  ;;  %v3831_v28 = vmul.f32 %v5462_v42, %v3762_v52  ;;  %4231 = vperm.xlu1 %4886, %v5232_v20   ;;  %v3767_v40 = vpop.permute.xlu0 %3766  ;;  %5263 = vpow2.f32 %v4751_v46  ;;  %v3355_v7 = vadd.f32 1.0, %v5236_v18  ;;  %v2845_v20 = vadd.f32 %v8155_v9, %v8897_v33  ;;  %v5464_v46 = vld [vmem:[%s5711_s28 + $0x80] sm:$0xff]  ;;  %v8899_v52 = vld [vmem:[#allocation25_spill] sm:$0xff] }
 0x6bb   : > { %v5240_v16 = vpop.eup %5239  ;;  %v3832_v38 = vmul.f32 %v5463_v61, %v3767_v40  ;;  %4236 = vperm.xlu0 %4885, %v5234_v58   ;;  %5265 = vrcp.f32 %v3353_v54  ;;  %v3356_v63 = vadd.f32 1.0, %v5238_v29  ;;  %v3737_v32 = vmul.f32 %v5464_v46, %v8174_v14  ;;  %v5466_v61 = vld [vmem:[%s5711_s28 + $0xc0] sm:$0xff] }
 0x6bc   : > { %v5242_v48 = vpop.eup %5241  ;;  %v3847_v43 = vsel %vm262_vm0, %v3735_v19, %v3831_v28  ;;  %5267 = vrcp.f32 %v3354_v49  ;;  %v4754_v54 = vmul.f32 -1.442695, %v2816_v60  ;;  %v2846_v18 = vadd.f32 %v8160_v37, %v8898_v36  ;;  %v8900_v19 = vld [vmem:[#allocation24_spill] sm:$0xff] }
 0x6bd   : > { %v5244_v11 = vpop.eup %5243  ;;  %3863 = vst [vmem:[%s8251_s13 + $0x40] sm:$0xff] %v3847_v43  ;;  %v3848_v30 = vsel %vm262_vm0, %v3736_v1, %v3832_v38  ;;  %v3772_v10 = vpop.permute.xlu1 %3771  ;;  %5269 = vpow2.f32 %v4752_v53  ;;  %v8286_v14 = vadd.f32 %v8266_v31, %v8899_v52  ;;  %v8291_v28 = vadd.f32 %v8273_v3, %v8900_v19  ;;  %v5467_v43 = vld [vmem:[%s5711_s28 + $0xe0] sm:$0xff] }
 0x6be   : > { %v5246_v5 = vpop.eup %5245  ;;  %3864 = vst [vmem:[%s8251_s13 + $0x60] sm:$0xff] %v3848_v30  ;;  %v3833_v27 = vmul.f32 %v5464_v46, %v3772_v10  ;;  %4241 = vperm.xlu1 %4886, %v5240_v16   ;;  %v3777_v4 = vpop.permute.xlu0 %3776  ;;  %5271 = vrcp.f32 %v3355_v7  ;;  %v3385_v29 = vadd.f32 1.0, %v5244_v11  ;;  %v4783_v60 = vmul.f32 -1.442695, %v2845_v20  ;;  %v8901_v10 = vld [vmem:[#allocation28_spill] sm:$0xff]  ;;  %v8902_v20 = vld [vmem:[#allocation31_spill] sm:$0xff] }
 0x6bf   : > { %v5248_v58 = vpop.eup %5247  ;;  %v3834_v49 = vmul.f32 %v5465_v35, %v3777_v4  ;;  %4246 = vperm.xlu0 %4885, %v5242_v48   ;;  %5273 = vrcp.f32 %v3356_v63  ;;  %v3386_v51 = vadd.f32 1.0, %v5246_v5  ;;  %v3739_v1 = vmul.f32 %v5466_v61, %v8186_v0 }
 0x6c0   : > { %v5250_v15 = vpop.eup %5249  ;;  %v3849_v53 = vsel %vm262_vm0, %v3737_v32, %v3833_v27  ;;  %5275 = vpow2.f32 %v4753_v44  ;;  %v4784_v7 = vmul.f32 -1.442695, %v2846_v18  ;;  %v3740_v11 = vmul.f32 %v5467_v43, %v8188_v17 }
 0x6c1   : > { %v5252_v42 = vpop.eup %5251  ;;  %3865 = vst [vmem:[%s8251_s13 + $0x80] sm:$0xff] %v3849_v53  ;;  %v3850_v40 = vsel %vm262_vm0, %v3738_v13, %v3834_v49  ;;  %v3782_v16 = vpop.permute.xlu1 %3781  ;;  %5277 = vpow2.f32 %v4754_v54  ;;  %v2847_v44 = vadd.f32 %v8215_v23, %v8901_v10  ;;  %v2848_v46 = vadd.f32 %v8230_v62, %v8902_v20  ;;  %v5468_v54 = vld [vmem:[%s5711_s28 + $0x100] sm:$0xff] }
 0x6c2   : > { %v5254_v39 = vpop.eup %5253  ;;  %3866 = vst [vmem:[%s8251_s13 + $0xa0] sm:$0xff] %v3850_v40  ;;  %v3835_v38 = vmul.f32 %v5466_v61, %v3782_v16  ;;  %4251 = vperm.xlu1 %4886, %v5248_v58   ;;  %v3787_v48 = vpop.permute.xlu0 %3786  ;;  %5279 = vrcp.f32 %v3385_v29  ;;  %v3387_v0 = vadd.f32 1.0, %v5252_v42  ;;  %v3293_v58 = vadd.f32 1.0, %v8199_v26 }
 0x6c3   : > { %v3836_v63 = vmul.f32 %v5467_v43, %v3787_v48  ;;  %4256 = vperm.xlu0 %4885, %v5250_v15   ;;  %v5256_v30 = vpop.eup %5255  ;;  %5281 = vrcp.f32 %v3386_v51  ;;  %v3388_v32 = vadd.f32 1.0, %v5254_v39  ;;  %v3741_v36 = vmul.f32 %v5468_v54, %v8190_v50  ;;  %v5469_v15 = vld [vmem:[%s5711_s28 + $0x120] sm:$0xff] }
 0x6c4   : > { %v3851_v5 = vsel %vm262_vm0, %v3739_v1, %v3835_v38  ;;  %v5258_v33 = vpop.eup %5257  ;;  %5283 = vpow2.f32 %v4783_v60  ;;  %v3294_v49 = vadd.f32 1.0, %v8202_v41  ;;  %v3742_v52 = vmul.f32 %v5469_v15, %v8194_v45  ;;  %v5470_v60 = vld [vmem:[%s5711_s28 + $0x140] sm:$0xff] }
 0x6c5   : > { %3867 = vst [vmem:[%s8251_s13 + $0xc0] sm:$0xff] %v3851_v5  ;;  %v3852_v17 = vsel %vm262_vm0, %v3740_v11, %v3836_v63  ;;  %v3792_v27 = vpop.permute.xlu1 %3791  ;;  %v5260_v4 = vpop.eup %5259  ;;  %5285 = vpow2.f32 %v4784_v7  ;;  %v4785_v53 = vmul.f32 -1.442695, %v2847_v44  ;;  %v2877_v50 = vadd.f32 %v8155_v9, %v8094_v2  ;;  %v5472_v5 = vld [vmem:[%s5711_s28 + $0x180] sm:$0xff] }
 0x6c6   : > { %3868 = vst [vmem:[%s8251_s13 + $0xe0] sm:$0xff] %v3852_v17  ;;  %v3837_v18 = vmul.f32 %v5468_v54, %v3792_v27  ;;  %4261 = vperm.xlu1 %4886, %v5258_v33   ;;  %v3797_v35 = vpop.permute.xlu0 %3796  ;;  %v5262_v13 = vpop.eup %5261  ;;  %5287 = vrcp.f32 %v3387_v0  ;;  %v4786_v51 = vmul.f32 -1.442695, %v2848_v46  ;;  %v2878_v41 = vadd.f32 %v8160_v37, %v8088_v59  ;;  %v5471_v59 = vld [vmem:[%s5711_s28 + $0x160] sm:$0xff] }
 0x6c7   : > { %v3838_v29 = vmul.f32 %v5469_v15, %v3797_v35  ;;  %4266 = vperm.xlu0 %4885, %v5260_v4   ;;  %v5264_v26 = vpop.eup %5263  ;;  %5289 = vrcp.f32 %v3388_v32  ;;  %v3295_v39 = vadd.f32 1.0, %v5256_v30  ;;  %v3743_v61 = vmul.f32 %v5470_v60, %v8208_v12  ;;  %v5473_v46 = vld [vmem:[%s5711_s28 + $0x1a0] sm:$0xff]  ;;  %v8347_v4 = vld [vmem:[%s8672_s4 + $0xf8] sm:$0xff] }
 0x6c8   : > { %v3853_v42 = vsel %vm262_vm0, %v3741_v36, %v3837_v18  ;;  %v5266_v19 = vpop.eup %5265  ;;  %5291 = vrcp.f32 %v3293_v58  ;;  %v3296_v38 = vadd.f32 1.0, %v5262_v13  ;;  %v3744_v37 = vmul.f32 %v5471_v59, %v8210_v34 }
 0x6c9   : > { %3869 = vst [vmem:[%s8251_s13 + $0x100] sm:$0xff] %v3853_v42  ;;  %v3854_v45 = vsel %vm262_vm0, %v3742_v52, %v3838_v29  ;;  %v3802_v40 = vpop.permute.xlu1 %3801  ;;  %v5268_v16 = vpop.eup %5267  ;;  %5293 = vrcp.f32 %v3294_v49  ;;  %v4815_v7 = vmul.f32 -1.442695, %v2877_v50  ;;  %v2879_v12 = vadd.f32 %v8215_v23, %v8104_v47  ;;  %v8903_v49 = vld [vmem:[#allocation27_spill] sm:$0xff]  ;;  %v5474_v52 = vld [vmem:[%s5711_s28 + $0x1c0] sm:$0xff]  ;;  %v8904_v50 = vld [vmem:[#allocation26_spill] sm:$0xff] }
 0x6ca   : > { %3870 = vst [vmem:[%s8251_s13 + $0x120] sm:$0xff] %v3854_v45  ;;  %v3839_v2 = vmul.f32 %v5470_v60, %v3802_v40  ;;  %4271 = vperm.xlu1 %4886, %v5266_v19   ;;  %v3807_v9 = vpop.permute.xlu0 %3806  ;;  %v5270_v1 = vpop.eup %5269  ;;  %5295 = vpow2.f32 %v4785_v53  ;;  %v4816_v63 = vmul.f32 -1.442695, %v2878_v41  ;;  %v2880_v30 = vadd.f32 %v8230_v62, %v8100_v21  ;;  %v8339_v21 = vld [vmem:[%s8672_s4 + $0xf0] sm:$0xff]  ;;  %v5475_v19 = vld [vmem:[%s5711_s28 + $0x1e0] sm:$0xff] }
 0x6cb   : > { %v3840_v48 = vmul.f32 %v5471_v59, %v3807_v9  ;;  %4276 = vperm.xlu0 %4885, %v5268_v16   ;;  %v5272_v11 = vpop.eup %5271  ;;  %5297 = vpow2.f32 %v4786_v51  ;;  %v3325_v0 = vadd.f32 1.0, %v5264_v26  ;;  %v3745_v33 = vmul.f32 %v5472_v5, %v8221_v22 }
 0x6cc   : > { %v3855_v43 = vsel %vm262_vm0, %v3743_v61, %v3839_v2  ;;  %v5274_v44 = vpop.eup %5273  ;;  %5299 = vrcp.f32 %v3295_v39  ;;  %v3326_v62 = vadd.f32 1.0, %v5270_v1  ;;  %v3746_v32 = vmul.f32 %v5473_v46, %v8223_v55 }
 0x6cd   : > { %3871 = vst [vmem:[%s8251_s13 + $0x140] sm:$0xff] %v3855_v43  ;;  %v3856_v34 = vsel %vm262_vm0, %v3744_v37, %v3840_v48  ;;  %v3812_v10 = vpop.permute.xlu1 %3811  ;;  %v5276_v20 = vpop.eup %5275  ;;  %5301 = vrcp.f32 %v3296_v38  ;;  %v4723_v22 = vmul.f32 -1.442695, %v8286_v14  ;;  %v4817_v58 = vmul.f32 -1.442695, %v2879_v12  ;;  %v8906_v48 = vld [vmem:[#allocation62_spill] sm:$0xff] }
 0x6ce   : > { %3872 = vst [vmem:[%s8251_s13 + $0x160] sm:$0xff] %v3856_v34  ;;  %v3841_v47 = vmul.f32 %v5472_v5, %v3812_v10  ;;  %4281 = vperm.xlu1 %4886, %v5272_v11   ;;  %v3817_v23 = vpop.permute.xlu0 %3816  ;;  %v5278_v27 = vpop.eup %5277  ;;  %5303 = vpow2.f32 %v4815_v7  ;;  %v4724_v18 = vmul.f32 -1.442695, %v8291_v28  ;;  %v4818_v55 = vmul.f32 -1.442695, %v2880_v30 }
 0x6cf   : > { %v3842_v17 = vmul.f32 %v5473_v46, %v3817_v23  ;;  %4286 = vperm.xlu0 %4885, %v5274_v44   ;;  %v5280_v36 = vpop.eup %5279  ;;  %5305 = vpow2.f32 %v4816_v63  ;;  %v2787_v15 = vadd.f32 %v8339_v21, %v8903_v49  ;;  %v3747_v29 = vmul.f32 %v5474_v52, %v8232_v8  ;;  %v8907_v44 = vld [vmem:[#allocation61_spill] sm:$0xff]  ;;  %v8908_v23 = vld [vmem:[#allocation64_spill] sm:$0xff] }
 0x6d0   : > { %v3857_v54 = vsel %vm262_vm0, %v3745_v33, %v3841_v47  ;;  %v5282_v13 = vpop.eup %5281  ;;  %5307 = vrcp.f32 %v3325_v0  ;;  %v2788_v42 = vadd.f32 %v8347_v4, %v8904_v50  ;;  %v3748_v51 = vmul.f32 %v5475_v19, %v8236_v24  ;;  %v8905_v24 = vld [vmem:[#allocation51_spill] sm:$0xff] }
 0x6d1   : > { %3873 = vst [vmem:[%s8251_s13 + $0x180] sm:$0xff] %v3857_v54  ;;  %v3858_v35 = vsel %vm262_vm0, %v3746_v32, %v3842_v17  ;;  %v3822_v14 = vpop.permute.xlu1 %3821  ;;  %v5284_v53 = vpop.eup %5283  ;;  %5309 = vrcp.f32 %v3326_v62  ;;  %v3327_v40 = vadd.f32 1.0, %v5276_v20  ;;  %v3328_v39 = vadd.f32 1.0, %v5278_v27  ;;  %v8909_v54 = vld [vmem:[#allocation30_spill] sm:$0xff] }
 0x6d2   : > { %3874 = vst [vmem:[%s8251_s13 + $0x1a0] sm:$0xff] %v3858_v35  ;;  %v3843_v26 = vmul.f32 %v5474_v52, %v3822_v14  ;;  %4291 = vperm.xlu1 %4886, %v5280_v36   ;;  %v3827_v28 = vpop.permute.xlu0 %3826  ;;  %v5286_v45 = vpop.eup %5285  ;;  %5311 = vpow2.f32 %v4817_v58  ;;  %v4725_v9 = vmul.f32 -1.442695, %v2787_v15  ;;  %v2817_v1 = vadd.f32 %v8266_v31, %v8905_v24  ;;  %v8910_v14 = vld [vmem:[#allocation37_spill] sm:$0xff] }
 0x6d3   : > { %v3844_v41 = vmul.f32 %v5475_v19, %v3827_v28  ;;  %4296 = vperm.xlu0 %4885, %v5282_v13   ;;  %v5288_v16 = vpop.eup %5287  ;;  %5313 = vpow2.f32 %v4818_v55  ;;  %v4726_v37 = vmul.f32 -1.442695, %v2788_v42  ;;  %v2818_v7 = vadd.f32 %v8273_v3, %v8906_v48 }
 0x6d4   : > { %v3859_v8 = vsel %vm262_vm0, %v3747_v29, %v3843_v26  ;;  %v5290_v2 = vpop.eup %5289  ;;  %5315 = vpow2.f32 %v4723_v22  ;;  %v3357_v43 = vadd.f32 1.0, %v5284_v53  ;;  %v3358_v63 = vadd.f32 1.0, %v5286_v45 }
 0x6d5   : > { %3875 = vst [vmem:[%s8251_s13 + $0x1c0] sm:$0xff] %v3859_v8  ;;  %v3860_v60 = vsel %vm262_vm0, %v3748_v51, %v3844_v41  ;;  %v8365_v61 = vpop.permute.xlu1 %3895  ;;  %v5292_v59 = vpop.eup %5291  ;;  %5317 = vpow2.f32 %v4724_v18  ;;  %v4755_v10 = vmul.f32 -1.442695, %v2817_v1  ;;  %v2819_v0 = vadd.f32 %v8339_v21, %v8907_v44  ;;  %v8911_v41 = vld [vmem:[#allocation36_spill] sm:$0xff] }
 0x6d6   : > { %3876 = vst [vmem:[%s8251_s13 + $0x1e0] sm:$0xff] %v3860_v60  ;;  %4301 = vperm.xlu1 %4886, %v5288_v16   ;;  %v8370_v38 = vpop.permute.xlu0 %3900  ;;  %v5294_v12 = vpop.eup %5293  ;;  %5319 = vrcp.f32 %v3327_v40  ;;  %v4756_v47 = vmul.f32 -1.442695, %v2818_v7  ;;  %v2820_v20 = vadd.f32 %v8347_v4, %v8908_v23  ;;  %v2849_v36 = vadd.f32 %v8266_v31, %v8909_v54  ;;  %v8912_v16 = vld [vmem:[#allocation39_spill] sm:$0xff] }
 0x6d7   : > { %4306 = vperm.xlu0 %4885, %v5290_v2   ;;  %v5296_v11 = vpop.eup %5295  ;;  %5321 = vrcp.f32 %v3328_v39  ;;  %v4757_v58 = vmul.f32 -1.442695, %v2819_v0  ;;  %v2850_v13 = vadd.f32 %v8273_v3, %v8910_v14  ;;  %v2851_v45 = vadd.f32 %v8339_v21, %v8911_v41  ;;  %v3877_v14 = vld [vmem:[%s5711_s28 + $0x8] sm:$0xff] }
 0x6d8   : > { %v5298_v34 = vpop.eup %5297  ;;  %5323 = vpow2.f32 %v4725_v9  ;;  %v3359_v46 = vadd.f32 1.0, %v5296_v11  ;;  %v4758_v35 = vmul.f32 -1.442695, %v2820_v20  ;;  %v4787_v53 = vmul.f32 -1.442695, %v2849_v36 }
 0x6d9   : > { %v8374_v30 = vpop.permute.xlu1 %3905  ;;  %v5300_v33 = vpop.eup %5299  ;;  %5325 = vpow2.f32 %v4726_v37  ;;  %v3360_v17 = vadd.f32 1.0, %v5298_v34  ;;  %v4788_v19 = vmul.f32 -1.442695, %v2850_v13  ;;  %v2852_v39 = vadd.f32 %v8347_v4, %v8912_v16 }
 0x6da   : > { %4375 = vperm.xlu1 %4886, %v5292_v59   ;;  %v8378_v5 = vpop.permute.xlu0 %3910  ;;  %v5302_v62 = vpop.eup %5301  ;;  %5327 = vrcp.f32 %v3357_v43  ;;  %v4789_v7 = vmul.f32 -1.442695, %v2851_v45 }
 0x6db   : > { %4380 = vperm.xlu0 %4885, %v5294_v12   ;;  %v5304_v32 = vpop.eup %5303  ;;  %5329 = vrcp.f32 %v3358_v63  ;;  %v2881_v12 = vadd.f32 %v8266_v31, %v8112_v6  ;;  %v4790_v11 = vmul.f32 -1.442695, %v2852_v39  ;;  %v2882_v63 = vadd.f32 %v8273_v3, %v8108_v56 }
 0x6dc   : > { %v5306_v22 = vpop.eup %5305  ;;  %5331 = vpow2.f32 %v4755_v10  ;;  %v3389_v15 = vadd.f32 1.0, %v5304_v32  ;;  %v2883_v31 = vadd.f32 %v8339_v21, %v8128_v57  ;;  %v2884_v3 = vadd.f32 %v8347_v4, %v8120_v25 }
 0x6dd   : > { %v8382_v27 = vpop.permute.xlu1 %3915  ;;  %v5308_v55 = vpop.eup %5307  ;;  %5333 = vpow2.f32 %v4756_v47  ;;  %v3390_v29 = vadd.f32 1.0, %v5306_v22  ;;  %v4819_v6 = vmul.f32 -1.442695, %v2881_v12  ;;  %v4820_v56 = vmul.f32 -1.442695, %v2882_v63  ;;  %v3881_v63 = vld [vmem:[%s5711_s28 + $0x88] sm:$0xff] }
 0x6de   : > { %4385 = vperm.xlu1 %4886, %v5300_v33   ;;  %v8386_v18 = vpop.permute.xlu0 %3920  ;;  %v5310_v49 = vpop.eup %5309  ;;  %5335 = vrcp.f32 %v3359_v46  ;;  %v4821_v21 = vmul.f32 -1.442695, %v2883_v31  ;;  %v4822_v25 = vmul.f32 -1.442695, %v2884_v3 }
 0x6df   : > { %4390 = vperm.xlu0 %4885, %v5302_v62   ;;  %v5312_v52 = vpop.eup %5311  ;;  %5337 = vrcp.f32 %v3360_v17 }
 0x6e0   : > { %v5314_v28 = vpop.eup %5313  ;;  %5339 = vpow2.f32 %v4757_v58  ;;  %v3391_v40 = vadd.f32 1.0, %v5312_v52 }
 0x6e1   : > { %v8390_v26 = vpop.permute.xlu1 %3925  ;;  %v5316_v42 = vpop.eup %5315  ;;  %5341 = vpow2.f32 %v4758_v35  ;;  %v3392_v60 = vadd.f32 1.0, %v5314_v28 }
 0x6e2   : > { %4395 = vperm.xlu1 %4886, %v5308_v55   ;;  %v8392_v50 = vpop.permute.xlu0 %3930  ;;  %v5318_v51 = vpop.eup %5317  ;;  %5343 = vrcp.f32 %v3389_v15  ;;  %v3297_v24 = vadd.f32 1.0, %v5316_v42  ;;  %v3878_v15 = vld [vmem:[%s5711_s28 + $0x28] sm:$0xff]  ;;  %v3973_v42 = vmul.f32 %v8365_v61, %v3877_v14 }
 0x6e3   : > { %4400 = vperm.xlu0 %4885, %v5310_v49   ;;  %v5320_v8 = vpop.eup %5319  ;;  %5345 = vrcp.f32 %v3390_v29  ;;  %v3298_v37 = vadd.f32 1.0, %v5318_v51  ;;  %v3974_v45 = vmul.f32 %v8370_v38, %v3878_v15 }
 0x6e4   : > { %v5322_v9 = vpop.eup %5321  ;;  %5347 = vpow2.f32 %v4787_v53 }
 0x6e5   : > { %v8398_v2 = vpop.permute.xlu1 %3935  ;;  %v5324_v59 = vpop.eup %5323  ;;  %5349 = vpow2.f32 %v4788_v19 }
 0x6e6   : > { %4405 = vperm.xlu1 %4886, %v5320_v8   ;;  %v8400_v1 = vpop.permute.xlu0 %3940  ;;  %v5326_v48 = vpop.eup %5325  ;;  %5351 = vrcp.f32 %v3391_v40  ;;  %v3299_v44 = vadd.f32 1.0, %v5324_v59  ;;  %v3879_v40 = vld [vmem:[%s5711_s28 + $0x48] sm:$0xff] }
 0x6e7   : > { %4410 = vperm.xlu0 %4885, %v5322_v9   ;;  %v5328_v43 = vpop.eup %5327  ;;  %5353 = vrcp.f32 %v3392_v60  ;;  %v3300_v47 = vadd.f32 1.0, %v5326_v48  ;;  %v3880_v60 = vld [vmem:[%s5711_s28 + $0x68] sm:$0xff]  ;;  %v3975_v48 = vmul.f32 %v8374_v30, %v3879_v40 }
 0x6e8   : > { %v5330_v10 = vpop.eup %5329  ;;  %5355 = vrcp.f32 %v3297_v24 }
 0x6e9   : > { %v8406_v34 = vpop.permute.xlu1 %3945  ;;  %v5332_v33 = vpop.eup %5331  ;;  %5357 = vrcp.f32 %v3298_v37 }
 0x6ea   : > { %4415 = vperm.xlu1 %4886, %v5328_v43   ;;  %v8408_v0 = vpop.permute.xlu0 %3950  ;;  %v5334_v23 = vpop.eup %5333  ;;  %5359 = vpow2.f32 %v4789_v7  ;;  %v3329_v32 = vadd.f32 1.0, %v5332_v33 }
 0x6eb   : > { %4420 = vperm.xlu0 %4885, %v5330_v10   ;;  %v5336_v20 = vpop.eup %5335  ;;  %5361 = vpow2.f32 %v4790_v11  ;;  %v3330_v58 = vadd.f32 1.0, %v5334_v23  ;;  %v3976_v11 = vmul.f32 %v8378_v5, %v3880_v60 }
 0x6ec   : > { %v5338_v46 = vpop.eup %5337  ;;  %5363 = vrcp.f32 %v3299_v44 }
 0x6ed   : > { %v8414_v62 = vpop.permute.xlu1 %3955  ;;  %v5340_v22 = vpop.eup %5339  ;;  %5365 = vrcp.f32 %v3300_v47  ;;  %v3882_v47 = vld [vmem:[%s5711_s28 + $0xa8] sm:$0xff] }
 0x6ee   : > { %4425 = vperm.xlu1 %4886, %v5336_v20   ;;  %v8416_v17 = vpop.permute.xlu0 %3960  ;;  %v5342_v57 = vpop.eup %5341  ;;  %5367 = vpow2.f32 %v4819_v6  ;;  %v3331_v49 = vadd.f32 1.0, %v5340_v22  ;;  %v3978_v22 = vmul.f32 %v8386_v18, %v3882_v47 }
 0x6ef   : > { %4430 = vperm.xlu0 %4885, %v5338_v46   ;;  %v5344_v54 = vpop.eup %5343  ;;  %5369 = vpow2.f32 %v4820_v56  ;;  %v3332_v29 = vadd.f32 1.0, %v5342_v57  ;;  %v3977_v56 = vmul.f32 %v8382_v27, %v3881_v63 }
 0x6f0   : > { %v5346_v36 = vpop.eup %5345  ;;  %5371 = vrcp.f32 %v3329_v32 }
 0x6f1   : > { %v8418_v4 = vpop.permute.xlu1 %3965  ;;  %v5348_v35 = vpop.eup %5347  ;;  %5373 = vrcp.f32 %v3330_v58  ;;  %v3883_v58 = vld [vmem:[%s5711_s28 + $0xc8] sm:$0xff] }
 0x6f2   : > { %4435 = vperm.xlu1 %4886, %v5344_v54   ;;  %v8420_v55 = vpop.permute.xlu0 %3970  ;;  %v5350_v13 = vpop.eup %5349  ;;  %5375 = vpow2.f32 %v4821_v21  ;;  %v3361_v39 = vadd.f32 1.0, %v5348_v35 }
 0x6f3   : > { %4440 = vperm.xlu0 %4885, %v5346_v36   ;;  %v5352_v52 = vpop.eup %5351  ;;  %5377 = vpow2.f32 %v4822_v25  ;;  %v3362_v61 = vadd.f32 1.0, %v5350_v13  ;;  %v3884_v25 = vld [vmem:[%s5711_s28 + $0xe8] sm:$0xff] }
 0x6f4   : > { %v5354_v53 = vpop.eup %5353  ;;  %5379 = vrcp.f32 %v3331_v49  ;;  %v3979_v49 = vmul.f32 %v8390_v26, %v3883_v58 }
 0x6f5   : > { %v3992_v28 = vpop.permute.xlu1 %3991  ;;  %v5356_v41 = vpop.eup %5355  ;;  %5381 = vrcp.f32 %v3332_v29  ;;  %v3980_v29 = vmul.f32 %v8392_v50, %v3884_v25 }
 0x6f6   : > { %v4069_v19 = vmul.f32 %v3992_v28, %v3877_v14  ;;  %4445 = vperm.xlu1 %4886, %v5352_v52   ;;  %v3997_v51 = vpop.permute.xlu0 %3996  ;;  %v5358_v16 = vpop.eup %5357  ;;  %5383 = vrcp.f32 %v3361_v39  ;;  %v3885_v28 = vld [vmem:[%s5711_s28 + $0x108] sm:$0xff] }
 0x6f7   : > { %v4070_v8 = vmul.f32 %v3997_v51, %v3878_v15  ;;  %4450 = vperm.xlu0 %4885, %v5354_v53   ;;  %v5360_v24 = vpop.eup %5359  ;;  %5385 = vrcp.f32 %v3362_v61  ;;  %v3888_v61 = vld [vmem:[%s5711_s28 + $0x168] sm:$0xff] }
 0x6f8   : > { %v4085_v9 = vsel %vm262_vm0, %v3973_v42, %v4069_v19  ;;  %v5362_v38 = vpop.eup %5361  ;;  %v3363_v33 = vadd.f32 1.0, %v5360_v24  ;;  %v3886_v19 = vld [vmem:[%s5711_s28 + $0x128] sm:$0xff] }
 0x6f9   : > { %4101 = vst [vmem:[%s8251_s13 + $0x8] sm:$0xff] %v4085_v9  ;;  %v4086_v59 = vsel %vm262_vm0, %v3974_v45, %v4070_v8  ;;  %v4002_v37 = vpop.permute.xlu1 %4001  ;;  %v5364_v43 = vpop.eup %5363  ;;  %v3364_v6 = vadd.f32 1.0, %v5362_v38  ;;  %v3981_v8 = vmul.f32 %v8398_v2, %v3885_v28  ;;  %v3887_v9 = vld [vmem:[%s5711_s28 + $0x148] sm:$0xff] }
 0x6fa   : > { %4102 = vst [vmem:[%s8251_s13 + $0x28] sm:$0xff] %v4086_v59  ;;  %v4071_v7 = vmul.f32 %v4002_v37, %v3879_v40  ;;  %4471 = vperm.xlu1 %4886, %v5356_v41   ;;  %v4007_v12 = vpop.permute.xlu0 %4006  ;;  %v5366_v44 = vpop.eup %5365  ;;  %5387 = vrcp.f32 %v3363_v33 }
 0x6fb   : > { %v4072_v10 = vmul.f32 %v4007_v12, %v3880_v60  ;;  %4476 = vperm.xlu0 %4885, %v5358_v16   ;;  %v5368_v30 = vpop.eup %5367  ;;  %5389 = vrcp.f32 %v3364_v6  ;;  %v3982_v60 = vmul.f32 %v8400_v1, %v3886_v19 }
 0x6fc   : > { %v4087_v23 = vsel %vm262_vm0, %v3975_v48, %v4071_v7  ;;  %v5370_v5 = vpop.eup %5369  ;;  %v3393_v54 = vadd.f32 1.0, %v5368_v30  ;;  %v3983_v7 = vmul.f32 %v8406_v34, %v3887_v9 }
 0x6fd   : > { %4103 = vst [vmem:[%s8251_s13 + $0x48] sm:$0xff] %v4087_v23  ;;  %v4088_v31 = vsel %vm262_vm0, %v3976_v11, %v4072_v10  ;;  %v4012_v20 = vpop.permute.xlu1 %4011  ;;  %v5372_v32 = vpop.eup %5371  ;;  %v3394_v35 = vadd.f32 1.0, %v5370_v5  ;;  %v3889_v11 = vld [vmem:[%s5711_s28 + $0x188] sm:$0xff] }
 0x6fe   : > { %4104 = vst [vmem:[%s8251_s13 + $0x68] sm:$0xff] %v4088_v31  ;;  %v4073_v3 = vmul.f32 %v4012_v20, %v3881_v63  ;;  %4481 = vperm.xlu1 %4886, %v5364_v43   ;;  %v4017_v46 = vpop.permute.xlu0 %4016  ;;  %v5374_v21 = vpop.eup %5373  ;;  %5391 = vrcp.f32 %v3393_v54  ;;  %v3984_v43 = vmul.f32 %v8408_v0, %v3888_v61  ;;  %v3890_v10 = vld [vmem:[%s5711_s28 + $0x1a8] sm:$0xff]  ;;  %v3985_v30 = vmul.f32 %v8414_v62, %v3889_v11 }
 0x6ff   : > { %v4074_v57 = vmul.f32 %v4017_v46, %v3882_v47  ;;  %4486 = vperm.xlu0 %4885, %v5366_v44   ;;  %v5376_v27 = vpop.eup %5375  ;;  %5393 = vrcp.f32 %v3394_v35  ;;  %v3986_v31 = vmul.f32 %v8416_v17, %v3890_v10  ;;  %v3891_v20 = vld [vmem:[%s5711_s28 + $0x1c8] sm:$0xff] }
 0x700   : > { %v4089_v36 = vsel %vm262_vm0, %v3977_v56, %v4073_v3  ;;  %v5378_v18 = vpop.eup %5377  ;;  %v3395_v42 = vadd.f32 1.0, %v5376_v27  ;;  %v3892_v56 = vld [vmem:[%s5711_s28 + $0x1e8] sm:$0xff] }
 0x701   : > { %4105 = vst [vmem:[%s8251_s13 + $0x88] sm:$0xff] %v4089_v36  ;;  %v4090_v14 = vsel %vm262_vm0, %v3978_v22, %v4074_v57  ;;  %v4022_v13 = vpop.permute.xlu1 %4021  ;;  %v5380_v41 = vpop.eup %5379  ;;  %v3396_v26 = vadd.f32 1.0, %v5378_v18 }
 0x702   : > { %4106 = vst [vmem:[%s8251_s13 + $0xa8] sm:$0xff] %v4090_v14  ;;  %v4075_v15 = vmul.f32 %v4022_v13, %v3883_v58  ;;  %4491 = vperm.xlu1 %4886, %v5372_v32   ;;  %v4027_v52 = vpop.permute.xlu0 %4026  ;;  %v5382_v50 = vpop.eup %5381  ;;  %5395 = vrcp.f32 %v3395_v42  ;;  %v3987_v58 = vmul.f32 %v8418_v4, %v3891_v20 }
 0x703   : > { %v4076_v53 = vmul.f32 %v4027_v52, %v3884_v25  ;;  %4496 = vperm.xlu0 %4885, %v5374_v21   ;;  %v5384_v37 = vpop.eup %5383  ;;  %5397 = vrcp.f32 %v3396_v26  ;;  %v3988_v21 = vmul.f32 %v8420_v55, %v3892_v56 }
 0x704   : > { %v4091_v51 = vsel %vm262_vm0, %v3979_v49, %v4075_v15  ;;  %v5386_v48 = vpop.eup %5385 }
 0x705   : > { %4107 = vst [vmem:[%s8251_s13 + $0xc8] sm:$0xff] %v4091_v51  ;;  %v4092_v45 = vsel %vm262_vm0, %v3980_v29, %v4076_v53  ;;  %v4032_v40 = vpop.permute.xlu1 %4031 }
 0x706   : > { %4108 = vst [vmem:[%s8251_s13 + $0xe8] sm:$0xff] %v4092_v45  ;;  %v4077_v16 = vmul.f32 %v4032_v40, %v3885_v28  ;;  %4501 = vperm.xlu1 %4886, %v5380_v41   ;;  %v4037_v39 = vpop.permute.xlu0 %4036  ;;  %v4117_v45 = vld [vmem:[%s5711_s28 + $0x10] sm:$0xff] }
 0x707   : > { %v4078_v24 = vmul.f32 %v4037_v39, %v3886_v19  ;;  %4506 = vperm.xlu0 %4885, %v5382_v50   ;;  %v5388_v33 = vpop.eup %5387  ;;  %v4118_v40 = vld [vmem:[%s5711_s28 + $0x30] sm:$0xff] }
 0x708   : > { %v4093_v59 = vsel %vm262_vm0, %v3981_v8, %v4077_v16  ;;  %v5390_v23 = vpop.eup %5389 }
 0x709   : > { %4109 = vst [vmem:[%s8251_s13 + $0x108] sm:$0xff] %v4093_v59  ;;  %v4094_v2 = vsel %vm262_vm0, %v3982_v60, %v4078_v24  ;;  %v4042_v38 = vpop.permute.xlu1 %4041 }
 0x70a   : > { %4110 = vst [vmem:[%s8251_s13 + $0x128] sm:$0xff] %v4094_v2  ;;  %v4079_v1 = vmul.f32 %v4042_v38, %v3887_v9  ;;  %4511 = vperm.xlu1 %4886, %v5384_v37   ;;  %v4047_v12 = vpop.permute.xlu0 %4046  ;;  %v4119_v9 = vld [vmem:[%s5711_s28 + $0x50] sm:$0xff] }
 0x70b   : > { %v4080_v63 = vmul.f32 %v4047_v12, %v3888_v61  ;;  %4516 = vperm.xlu0 %4885, %v5386_v48   ;;  %v5392_v46 = vpop.eup %5391  ;;  %v4120_v61 = vld [vmem:[%s5711_s28 + $0x70] sm:$0xff] }
 0x70c   : > { %v4095_v44 = vsel %vm262_vm0, %v3983_v7, %v4079_v1  ;;  %v5394_v62 = vpop.eup %5393  ;;  %v4121_v12 = vld [vmem:[%s5711_s28 + $0x90] sm:$0xff] }
 0x70d   : > { %4111 = vst [vmem:[%s8251_s13 + $0x148] sm:$0xff] %v4095_v44  ;;  %v4096_v34 = vsel %vm262_vm0, %v3984_v43, %v4080_v63  ;;  %v4052_v47 = vpop.permute.xlu1 %4051 }
 0x70e   : > { %4112 = vst [vmem:[%s8251_s13 + $0x168] sm:$0xff] %v4096_v34  ;;  %v4081_v0 = vmul.f32 %v4052_v47, %v3889_v11  ;;  %4521 = vperm.xlu1 %4886, %v5388_v33   ;;  %v4057_v6 = vpop.permute.xlu0 %4056  ;;  %v4122_v11 = vld [vmem:[%s5711_s28 + $0xb0] sm:$0xff] }
 0x70f   : > { %v4082_v5 = vmul.f32 %v4057_v6, %v3890_v10  ;;  %4526 = vperm.xlu0 %4885, %v5390_v23   ;;  %v5396_v36 = vpop.eup %5395  ;;  %v4124_v6 = vld [vmem:[%s5711_s28 + $0xf0] sm:$0xff] }
 0x710   : > { %v4097_v3 = vsel %vm262_vm0, %v3985_v30, %v4081_v0  ;;  %v5398_v14 = vpop.eup %5397  ;;  %v4123_v30 = vld [vmem:[%s5711_s28 + $0xd0] sm:$0xff] }
 0x711   : > { %4113 = vst [vmem:[%s8251_s13 + $0x188] sm:$0xff] %v4097_v3  ;;  %v4098_v32 = vsel %vm262_vm0, %v3986_v31, %v4082_v5  ;;  %v4062_v22 = vpop.permute.xlu1 %4061 }
 0x712   : > { %4114 = vst [vmem:[%s8251_s13 + $0x1a8] sm:$0xff] %v4098_v32  ;;  %v4083_v57 = vmul.f32 %v4062_v22, %v3891_v20  ;;  %4531 = vperm.xlu1 %4886, %v5392_v46   ;;  %v4067_v17 = vpop.permute.xlu0 %4066  ;;  %v4125_v22 = vld [vmem:[%s5711_s28 + $0x110] sm:$0xff] }
 0x713   : > { %v4084_v54 = vmul.f32 %v4067_v17, %v3892_v56  ;;  %4536 = vperm.xlu0 %4885, %v5394_v62  }
 0x714   : > { %v4099_v25 = vsel %vm262_vm0, %v3987_v58, %v4083_v57  ;;  %v4126_v58 = vld [vmem:[%s5711_s28 + $0x130] sm:$0xff] }
 0x715   : > { %4115 = vst [vmem:[%s8251_s13 + $0x1c8] sm:$0xff] %v4099_v25  ;;  %v4100_v27 = vsel %vm262_vm0, %v3988_v21, %v4084_v54  ;;  %v4136_v35 = vpop.permute.xlu1 %4135 }
 0x716   : > { %4116 = vst [vmem:[%s8251_s13 + $0x1e8] sm:$0xff] %v4100_v27  ;;  %4541 = vperm.xlu1 %4886, %v5396_v36   ;;  %v4141_v13 = vpop.permute.xlu0 %4140  ;;  %v4213_v8 = vmul.f32 %v4136_v35, %v4117_v45  ;;  %v4127_v35 = vld [vmem:[%s5711_s28 + $0x150] sm:$0xff] }
 0x717   : > { %4546 = vperm.xlu0 %4885, %v5398_v14   ;;  %v4214_v60 = vmul.f32 %v4141_v13, %v4118_v40  ;;  %v4128_v13 = vld [vmem:[%s5711_s28 + $0x170] sm:$0xff] }
 0x719   : > { %v4146_v4 = vpop.permute.xlu1 %4145 }
 0x71a   : > { %v4151_v18 = vpop.permute.xlu0 %4150  ;;  %v4215_v38 = vmul.f32 %v4146_v4, %v4119_v9 }
 0x71b   : > { %v4216_v1 = vmul.f32 %v4151_v18, %v4120_v61 }
 0x71d   : > { %v4156_v49 = vpop.permute.xlu1 %4155 }
 0x71e   : > { %v4161_v55 = vpop.permute.xlu0 %4160  ;;  %v4217_v33 = vmul.f32 %v4156_v49, %v4121_v12 }
 0x71f   : > { %v4218_v23 = vmul.f32 %v4161_v55, %v4122_v11 }
 0x721   : > { %v4166_v15 = vpop.permute.xlu1 %4165 }
 0x722   : > { %v4171_v52 = vpop.permute.xlu0 %4170  ;;  %v4219_v56 = vmul.f32 %v4166_v15, %v4123_v30 }
 0x723   : > { %v4220_v32 = vmul.f32 %v4171_v52, %v4124_v6 }
 0x725   : > { %v4176_v29 = vpop.permute.xlu1 %4175 }
 0x726   : > { %v4181_v28 = vpop.permute.xlu0 %4180  ;;  %v4221_v54 = vmul.f32 %v4176_v29, %v4125_v22 }
 0x727   : > { %v4222_v27 = vmul.f32 %v4181_v28, %v4126_v58  ;;  %v4129_v28 = vld [vmem:[%s5711_s28 + $0x190] sm:$0xff] }
 0x729   : > { %v8486_v53 = vpop.permute.xlu1 %4185 }
 0x72a   : > { %v8488_v42 = vpop.permute.xlu0 %4190  ;;  %v4223_v55 = vmul.f32 %v8486_v53, %v4127_v35 }
 0x72b   : > { %v4224_v29 = vmul.f32 %v8488_v42, %v4128_v13  ;;  %v4131_v42 = vld [vmem:[%s5711_s28 + $0x1d0] sm:$0xff] }
 0x72d   : > { %v8490_v19 = vpop.permute.xlu1 %4195 }
 0x72e   : > { %v8492_v51 = vpop.permute.xlu0 %4200  ;;  %v4225_v53 = vmul.f32 %v8490_v19, %v4129_v28 }
 0x731   : > { %v8494_v41 = vpop.permute.xlu1 %4205 }
 0x732   : > { %v8496_v26 = vpop.permute.xlu0 %4210 }
 0x735   : > { %v4232_v50 = vpop.permute.xlu1 %4231 }
 0x736   : > { %v4309_v16 = vmul.f32 %v4232_v50, %v4117_v45  ;;  %v4237_v39 = vpop.permute.xlu0 %4236 }
 0x737   : > { %v4310_v24 = vmul.f32 %v4237_v39, %v4118_v40  ;;  %v4130_v40 = vld [vmem:[%s5711_s28 + $0x1b0] sm:$0xff] }
 0x738   : > { %v4325_v59 = vsel %vm262_vm0, %v4213_v8, %v4309_v16 }
 0x739   : > { %4341 = vst [vmem:[%s8251_s13 + $0x10] sm:$0xff] %v4325_v59  ;;  %v4326_v37 = vsel %vm262_vm0, %v4214_v60, %v4310_v24  ;;  %v4242_v2 = vpop.permute.xlu1 %4241 }
 0x73a   : > { %4342 = vst [vmem:[%s8251_s13 + $0x30] sm:$0xff] %v4326_v37  ;;  %v4311_v48 = vmul.f32 %v4242_v2, %v4119_v9  ;;  %v4247_v7 = vpop.permute.xlu0 %4246  ;;  %v4226_v9 = vmul.f32 %v8492_v51, %v4130_v40 }
 0x73b   : > { %v4312_v43 = vmul.f32 %v4247_v7, %v4120_v61  ;;  %v4132_v61 = vld [vmem:[%s5711_s28 + $0x1f0] sm:$0xff] }
 0x73c   : > { %v4327_v63 = vsel %vm262_vm0, %v4215_v38, %v4311_v48  ;;  %v4227_v38 = vmul.f32 %v8494_v41, %v4131_v42  ;;  %v4228_v7 = vmul.f32 %v8496_v26, %v4132_v61 }
 0x73d   : > { %4343 = vst [vmem:[%s8251_s13 + $0x50] sm:$0xff] %v4327_v63  ;;  %v4328_v10 = vsel %vm262_vm0, %v4216_v1, %v4312_v43  ;;  %v4252_v44 = vpop.permute.xlu1 %4251 }
 0x73e   : > { %4344 = vst [vmem:[%s8251_s13 + $0x70] sm:$0xff] %v4328_v10  ;;  %v4313_v34 = vmul.f32 %v4252_v44, %v4121_v12  ;;  %v4257_v47 = vpop.permute.xlu0 %4256 }
 0x73f   : > { %v4314_v0 = vmul.f32 %v4257_v47, %v4122_v11 }
 0x740   : > { %v4329_v31 = vsel %vm262_vm0, %v4217_v33, %v4313_v34 }
 0x741   : > { %4345 = vst [vmem:[%s8251_s13 + $0x90] sm:$0xff] %v4329_v31  ;;  %v4330_v20 = vsel %vm262_vm0, %v4218_v23, %v4314_v0  ;;  %v4262_v5 = vpop.permute.xlu1 %4261 }
 0x742   : > { %4346 = vst [vmem:[%s8251_s13 + $0xb0] sm:$0xff] %v4330_v20  ;;  %v4315_v3 = vmul.f32 %v4262_v5, %v4123_v30  ;;  %v4267_v46 = vpop.permute.xlu0 %4266  ;;  %v4357_v5 = vld [vmem:[%s5711_s28 + $0x18] sm:$0xff] }
 0x743   : > { %v4316_v62 = vmul.f32 %v4267_v46, %v4124_v6 }
 0x744   : > { %v4331_v57 = vsel %vm262_vm0, %v4219_v56, %v4315_v3  ;;  %v4358_v56 = vld [vmem:[%s5711_s28 + $0x38] sm:$0xff] }
 0x745   : > { %4347 = vst [vmem:[%s8251_s13 + $0xd0] sm:$0xff] %v4331_v57  ;;  %v4332_v17 = vsel %vm262_vm0, %v4220_v32, %v4316_v62  ;;  %v4272_v21 = vpop.permute.xlu1 %4271 }
 0x746   : > { %4348 = vst [vmem:[%s8251_s13 + $0xf0] sm:$0xff] %v4332_v17  ;;  %v4317_v25 = vmul.f32 %v4272_v21, %v4125_v22  ;;  %v4277_v36 = vpop.permute.xlu0 %4276  ;;  %v4360_v17 = vld [vmem:[%s5711_s28 + $0x78] sm:$0xff] }
 0x747   : > { %v4318_v14 = vmul.f32 %v4277_v36, %v4126_v58  ;;  %v4359_v58 = vld [vmem:[%s5711_s28 + $0x58] sm:$0xff] }
 0x748   : > { %v4333_v4 = vsel %vm262_vm0, %v4221_v54, %v4317_v25 }
 0x749   : > { %4349 = vst [vmem:[%s8251_s13 + $0x110] sm:$0xff] %v4333_v4  ;;  %v4334_v18 = vsel %vm262_vm0, %v4222_v27, %v4318_v14  ;;  %v4282_v49 = vpop.permute.xlu1 %4281 }
 0x74a   : > { %4350 = vst [vmem:[%s8251_s13 + $0x130] sm:$0xff] %v4334_v18  ;;  %v4319_v15 = vmul.f32 %v4282_v49, %v4127_v35  ;;  %v4287_v52 = vpop.permute.xlu0 %4286  ;;  %v4362_v18 = vld [vmem:[%s5711_s28 + $0xb8] sm:$0xff] }
 0x74b   : > { %v4320_v45 = vmul.f32 %v4287_v52, %v4128_v13  ;;  %v4361_v13 = vld [vmem:[%s5711_s28 + $0x98] sm:$0xff] }
 0x74c   : > { %v4335_v50 = vsel %vm262_vm0, %v4223_v55, %v4319_v15 }
 0x74d   : > { %4351 = vst [vmem:[%s8251_s13 + $0x150] sm:$0xff] %v4335_v50  ;;  %v4336_v8 = vsel %vm262_vm0, %v4224_v29, %v4320_v45  ;;  %v4292_v16 = vpop.permute.xlu1 %4291 }
 0x74e   : > { %4352 = vst [vmem:[%s8251_s13 + $0x170] sm:$0xff] %v4336_v8  ;;  %v4321_v39 = vmul.f32 %v4292_v16, %v4129_v28  ;;  %v4297_v60 = vpop.permute.xlu0 %4296  ;;  %v4364_v8 = vld [vmem:[%s5711_s28 + $0xf8] sm:$0xff] }
 0x74f   : > { %v4322_v24 = vmul.f32 %v4297_v60, %v4130_v40  ;;  %v4363_v40 = vld [vmem:[%s5711_s28 + $0xd8] sm:$0xff] }
 0x750   : > { %v4337_v59 = vsel %vm262_vm0, %v4225_v53, %v4321_v39 }
 0x751   : > { %4353 = vst [vmem:[%s8251_s13 + $0x190] sm:$0xff] %v4337_v59  ;;  %v4338_v37 = vsel %vm262_vm0, %v4226_v9, %v4322_v24  ;;  %v4302_v2 = vpop.permute.xlu1 %4301 }
 0x752   : > { %4354 = vst [vmem:[%s8251_s13 + $0x1b0] sm:$0xff] %v4338_v37  ;;  %v4323_v19 = vmul.f32 %v4302_v2, %v4131_v42  ;;  %v4307_v48 = vpop.permute.xlu0 %4306  ;;  %v4366_v37 = vld [vmem:[%s5711_s28 + $0x138] sm:$0xff] }
 0x753   : > { %v4324_v1 = vmul.f32 %v4307_v48, %v4132_v61  ;;  %v4365_v61 = vld [vmem:[%s5711_s28 + $0x118] sm:$0xff] }
 0x754   : > { %v4339_v51 = vsel %vm262_vm0, %v4227_v38, %v4323_v19 }
 0x755   : > { %4355 = vst [vmem:[%s8251_s13 + $0x1d0] sm:$0xff] %v4339_v51  ;;  %v4340_v12 = vsel %vm262_vm0, %v4228_v7, %v4324_v1  ;;  %v4376_v43 = vpop.permute.xlu1 %4375 }
 0x756   : > { %4356 = vst [vmem:[%s8251_s13 + $0x1f0] sm:$0xff] %v4340_v12  ;;  %v4381_v11 = vpop.permute.xlu0 %4380  ;;  %v4453_v46 = vmul.f32 %v4376_v43, %v4357_v5  ;;  %v4367_v12 = vld [vmem:[%s5711_s28 + $0x158] sm:$0xff] }
 0x757   : > { %v4454_v62 = vmul.f32 %v4381_v11, %v4358_v56  ;;  %v4368_v11 = vld [vmem:[%s5711_s28 + $0x178] sm:$0xff] }
 0x759   : > { %v4386_v63 = vpop.permute.xlu1 %4385 }
 0x75a   : > { %v4391_v10 = vpop.permute.xlu0 %4390  ;;  %v4455_v36 = vmul.f32 %v4386_v63, %v4359_v58 }
 0x75b   : > { %v4456_v14 = vmul.f32 %v4391_v10, %v4360_v17 }
 0x75d   : > { %v4396_v44 = vpop.permute.xlu1 %4395 }
 0x75e   : > { %v4401_v41 = vpop.permute.xlu0 %4400  ;;  %v4457_v52 = vmul.f32 %v4396_v44, %v4361_v13 }
 0x75f   : > { %v4458_v45 = vmul.f32 %v4401_v41, %v4362_v18 }
 0x761   : > { %v4406_v33 = vpop.permute.xlu1 %4405 }
 0x762   : > { %v4411_v34 = vpop.permute.xlu0 %4410  ;;  %v4459_v60 = vmul.f32 %v4406_v33, %v4363_v40 }
 0x763   : > { %v4460_v24 = vmul.f32 %v4411_v34, %v4364_v8 }
 0x765   : > { %v4416_v47 = vpop.permute.xlu1 %4415 }
 0x766   : > { %v4421_v26 = vpop.permute.xlu0 %4420  ;;  %v4461_v48 = vmul.f32 %v4416_v47, %v4365_v61 }
 0x767   : > { %v4462_v51 = vmul.f32 %v4421_v26, %v4366_v37  ;;  %v4369_v26 = vld [vmem:[%s5711_s28 + $0x198] sm:$0xff] }
 0x769   : > { %v8552_v23 = vpop.permute.xlu1 %4425 }
 0x76a   : > { %v8554_v30 = vpop.permute.xlu0 %4430  ;;  %v4463_v41 = vmul.f32 %v8552_v23, %v4367_v12 }
 0x76b   : > { %v4464_v47 = vmul.f32 %v8554_v30, %v4368_v11 }
 0x76d   : > { %v8556_v0 = vpop.permute.xlu1 %4435 }
 0x76e   : > { %v8558_v6 = vpop.permute.xlu0 %4440  ;;  %v4465_v23 = vmul.f32 %v8556_v0, %v4369_v26 }
 0x771   : > { %v8560_v31 = vpop.permute.xlu1 %4445 }
 0x772   : > { %v8562_v20 = vpop.permute.xlu0 %4450 }
 0x775   : > { %v4472_v3 = vpop.permute.xlu1 %4471 }
 0x776   : > { %v4549_v32 = vmul.f32 %v4472_v3, %v4357_v5  ;;  %v4477_v22 = vpop.permute.xlu0 %4476 }
 0x777   : > { %v4550_v57 = vmul.f32 %v4477_v22, %v4358_v56  ;;  %v4370_v56 = vld [vmem:[%s5711_s28 + $0x1b8] sm:$0xff] }
 0x778   : > { %v4565_v21 = vsel %vm262_vm0, %v4453_v46, %v4549_v32  ;;  %v4466_v30 = vmul.f32 %v8558_v6, %v4370_v56 }
 0x779   : > { %4581 = vst [vmem:[%s8251_s13 + $0x18] sm:$0xff] %v4565_v21  ;;  %v4566_v54 = vsel %vm262_vm0, %v4454_v62, %v4550_v57  ;;  %v4482_v25 = vpop.permute.xlu1 %4481 }
 0x77a   : > { %4582 = vst [vmem:[%s8251_s13 + $0x38] sm:$0xff] %v4566_v54  ;;  %v4551_v27 = vmul.f32 %v4482_v25, %v4359_v58  ;;  %v4487_v35 = vpop.permute.xlu0 %4486  ;;  %v4371_v58 = vld [vmem:[%s5711_s28 + $0x1d8] sm:$0xff] }
 0x77b   : > { %v4552_v4 = vmul.f32 %v4487_v35, %v4360_v17  ;;  %v4372_v17 = vld [vmem:[%s5711_s28 + $0x1f8] sm:$0xff]  ;;  %v4467_v0 = vmul.f32 %v8560_v31, %v4371_v58 }
 0x77c   : > { %v4567_v49 = vsel %vm262_vm0, %v4455_v36, %v4551_v27  ;;  %v4468_v27 = vmul.f32 %v8562_v20, %v4372_v17 }
 0x77d   : > { %4583 = vst [vmem:[%s8251_s13 + $0x58] sm:$0xff] %v4567_v49  ;;  %v4568_v55 = vsel %vm262_vm0, %v4456_v14, %v4552_v4  ;;  %v4492_v15 = vpop.permute.xlu1 %4491 }
 0x77e   : > { %4584 = vst [vmem:[%s8251_s13 + $0x78] sm:$0xff] %v4568_v55  ;;  %v4553_v29 = vmul.f32 %v4492_v15, %v4361_v13  ;;  %v4497_v28 = vpop.permute.xlu0 %4496 }
 0x77f   : > { %v4554_v50 = vmul.f32 %v4497_v28, %v4362_v18 }
 0x780   : > { %v4569_v16 = vsel %vm262_vm0, %v4457_v52, %v4553_v29 }
 0x781   : > { %4585 = vst [vmem:[%s8251_s13 + $0x98] sm:$0xff] %v4569_v16  ;;  %v4570_v53 = vsel %vm262_vm0, %v4458_v45, %v4554_v50  ;;  %v4502_v39 = vpop.permute.xlu1 %4501 }
 0x782   : > { %4586 = vst [vmem:[%s8251_s13 + $0xb8] sm:$0xff] %v4570_v53  ;;  %v4555_v9 = vmul.f32 %v4502_v39, %v4363_v40  ;;  %v4507_v42 = vpop.permute.xlu0 %4506 }
 0x783   : > { %v4556_v59 = vmul.f32 %v4507_v42, %v4364_v8 }
 0x784   : > { %v4571_v2 = vsel %vm262_vm0, %v4459_v60, %v4555_v9 }
 0x785   : > { %4587 = vst [vmem:[%s8251_s13 + $0xd8] sm:$0xff] %v4571_v2  ;;  %v4572_v38 = vsel %vm262_vm0, %v4460_v24, %v4556_v59  ;;  %v4512_v19 = vpop.permute.xlu1 %4511 }
 0x786   : > { %4588 = vst [vmem:[%s8251_s13 + $0xf8] sm:$0xff] %v4572_v38  ;;  %v4557_v7 = vmul.f32 %v4512_v19, %v4365_v61  ;;  %v4517_v1 = vpop.permute.xlu0 %4516 }
 0x787   : > { %v4558_v43 = vmul.f32 %v4517_v1, %v4366_v37 }
 0x788   : > { %v4573_v63 = vsel %vm262_vm0, %v4461_v48, %v4557_v7 }
 0x789   : > { %4589 = vst [vmem:[%s8251_s13 + $0x118] sm:$0xff] %v4573_v63  ;;  %v4574_v10 = vsel %vm262_vm0, %v4462_v51, %v4558_v43  ;;  %v4522_v44 = vpop.permute.xlu1 %4521 }
 0x78a   : > { %4590 = vst [vmem:[%s8251_s13 + $0x138] sm:$0xff] %v4574_v10  ;;  %v4559_v33 = vmul.f32 %v4522_v44, %v4367_v12  ;;  %v4527_v34 = vpop.permute.xlu0 %4526 }
 0x78b   : > { %v4560_v5 = vmul.f32 %v4527_v34, %v4368_v11 }
 0x78c   : > { %v4575_v3 = vsel %vm262_vm0, %v4463_v41, %v4559_v33 }
 0x78d   : > { %4591 = vst [vmem:[%s8251_s13 + $0x158] sm:$0xff] %v4575_v3  ;;  %v4576_v46 = vsel %vm262_vm0, %v4464_v47, %v4560_v5  ;;  %v4532_v32 = vpop.permute.xlu1 %4531 }
 0x78e   : > { %4592 = vst [vmem:[%s8251_s13 + $0x178] sm:$0xff] %v4576_v46  ;;  %v4561_v22 = vmul.f32 %v4532_v32, %v4369_v26  ;;  %v4537_v62 = vpop.permute.xlu0 %4536 }
 0x78f   : > { %v4562_v57 = vmul.f32 %v4537_v62, %v4370_v56 }
 0x790   : > { %v4577_v21 = vsel %vm262_vm0, %v4465_v23, %v4561_v22 }
 0x791   : > { %4593 = vst [vmem:[%s8251_s13 + $0x198] sm:$0xff] %v4577_v21  ;;  %v4578_v54 = vsel %vm262_vm0, %v4466_v30, %v4562_v57  ;;  %v4542_v25 = vpop.permute.xlu1 %4541 }
 0x792   : > { %4594 = vst [vmem:[%s8251_s13 + $0x1b8] sm:$0xff] %v4578_v54  ;;  %v4563_v36 = vmul.f32 %v4542_v25, %v4371_v58  ;;  %v4547_v6 = vpop.permute.xlu0 %4546 }
 0x793   : > { %v4564_v35 = vmul.f32 %v4547_v6, %v4372_v17 }
 0x794   : > { %v4579_v14 = vsel %vm262_vm0, %v4467_v0, %v4563_v36 }
 0x795   : > { %4595 = vst [vmem:[%s8251_s13 + $0x1d8] sm:$0xff] %v4579_v14  ;;  %v4580_v31 = vsel %vm262_vm0, %v4468_v27, %v4564_v35 }
 0x796   : > { %4596 = vst [vmem:[%s8251_s13 + $0x1f8] sm:$0xff] %v4580_v31 }
 0x797   : > { %5517 = shalt.err (!%p5514_p10)
}
 0x798   : > { %s5518_s13 = scalar_lea.hbm %s8619_s22, 8192  ;;  %s5522_s14 = scalar_lea.hbm %s8673_s5, 16384 }
 0x799   : > { %p5519_p0 = scmp.ne.s32.totalorder %s8619_s22, %s5518_s13  ;;  %p5523_p1 = scmp.lt.s32.totalorder %s8619_s22, %s8673_s5 }
 0x79a   : > { %p5524_p3 = scmp.lt.s32.totalorder %s5522_s14, %s5518_s13 }
 0x79b   : > { %p5520_p2 = pnand %p5519_p0, %p8913_p12 }
 0x79c   : > { %p5525_p6 = por %p5524_p3, %p5523_p1 }
 0x79d   : > { %p5521_p9 = pneg %p5520_p2 }
 0x79f   : > { %p5526_p11 = pnand %p5525_p6, %p5521_p9 }
 0x7a1   : > { %5529 = shalt.err (!%p5526_p11)
}
 0x7a2   : > { %s5576_s8 = smov 512   ;;  %s5577_s28 = smov 32  }
 0x7a3   : > { %4835 = dma.vmem_to_hbm [thread:$0]  (%p8913_p12), %s8621_s7, 8192, %s8619_s22, %s4598_s10, %s5576_s8, %s5576_s8, %s5577_s28  }
 0x7a4 PF: > { %s4627_s9 = sand.u32 1, %s5556_s18   ;;  %p8914_p13 = scmp.ne.s32.totalorder %s8692_s6, 0 }
 0x7a5   : > { %p8915_p4 = scmp.ge.s32.totalorder %s5568_s21, 2  ;;  %s4628_s11 = scalar_lea.sflag [#allocation4], %s4627_s9 }
 0x7a7   : > { %p4842_p5 = pnand %p8915_p4, %p8914_p13 }
 0x7a9   : > { %p4843_p7 = pneg %p4842_p5 }
 0x7ab   : > { %5551 = dma.done.wait (%p4843_p7), %s4628_s11, 8192  }
 0x7ac   : > { %5553 = vsyncadd (%p4843_p7), %s4628_s11, 4294959104  ;;  %p18_p8 = scmp.ge.s32.totalorder %s5633_s24, 4   ;;  %s8916_s18 = smov %s5560_s19 }
 0x7ad   : > { %s8917_s19 = smov %s5564_s20  ;;  %s8918_s20 = smov %s5645_s27 }
 0x7ae   : > { %s8919_s21 = smov %s5633_s24  ;;  %20 = sbr.rel (!%p18_p8) target bundleno = 5 (0x5), region = 85 }
 0x7b3   :  { %4633 = vsyncpa [#allocation3], 1 }
 0x7b4   :  { %4635 = vsyncpa [#allocation3 + $0x1], 1 }
 0x7b5   :  { %4636 = vsyncpa [#allocation4], 1 }
 0x7b6   :  { %4638 = vsyncpa [#allocation4 + $0x1], 1 }

</bundles_post_ra>
